<compile_context>
chip_gen: v5e
topology: v5e:2x2
jax: 0.10.0
libtpu: 0.0.40
codegen_flags: <defaults>
</compile_context>

<pallas_src>
import jax
import jax.numpy as jnp
from jax import lax
from jax.experimental import pallas as pl
from jax.experimental.pallas import tpu as pltpu


def _make_lae_kernel(R, ww, C):
    """Kernel for one (batch, row-tile) grid step; R output rows, ww output cols."""
    nb = R * ww                                   # output positions in this tile

    def _silu(v):
        # exact SiLU: v * sigmoid(v) = v / (1 + exp(-v)); exp(-v)->inf gives 0.
        return v / (1.0 + jnp.exp(-v))

    def kernel(am0_ref, ah0_ref, am1_ref, ah1_ref, cm_ref, ch_ref,
               w_att_ref, b_att_ref, w_ds_ref, b_ds_ref,
               out_ref, quads_ref, col_ref):
        # ---------- attention branch: AvgPool(3,1,1) -> 1x1 conv(+BN) -> SiLU ----
        # quadrant (s1, s2) pooled sums go straight into a (4*nb, C) bf16 scratch;
        # the avg-pool's 1/9 is folded into w_att at BN-fold time.
        att_refs = ((am0_ref, ah0_ref), (am1_ref, ah1_ref))
        for s1 in range(2):
            am_ref, ah_ref = att_refs[s1]
            for s2 in range(2):
                c0 = s2 * ww
                wm = am_ref[0, :, c0:c0 + ww + 2, :].astype(jnp.float32)  # (R, ww+2, C)
                wh = ah_ref[0, :, c0:c0 + ww + 2, :].astype(jnp.float32)  # (2, ww+2, C)
                csm = wm[:, 0:ww] + wm[:, 1:ww + 1] + wm[:, 2:ww + 2]     # (R, ww, C)
                csh = wh[:, 0:ww] + wh[:, 1:ww + 1] + wh[:, 2:ww + 2]     # (2, ww, C)
                cs = jnp.concatenate([csm, csh], axis=0)                  # (R+2, ww, C)
                pooled = cs[0:R] + cs[1:R + 1] + cs[2:R + 2]              # (R, ww, C)
                q = 2 * s1 + s2
                quads_ref[q * nb:(q + 1) * nb, :] = (
                    pooled.reshape(nb, C).astype(jnp.bfloat16))

        # single fused (4*nb, C) x (C, C) matmul for all four quadrants
        logits = (jnp.dot(quads_ref[...], w_att_ref[...],
                          preferred_element_type=jnp.float32)
                  + b_att_ref[...])                                       # (4nb, C)
        logits = _silu(logits)

        # softmax over the 4 quadrants (row blocks of the fused matmul result)
        l = [logits[s * nb:(s + 1) * nb] for s in range(4)]
        m = jnp.maximum(jnp.maximum(l[0], l[1]), jnp.maximum(l[2], l[3]))
        e = [jnp.exp(v - m) for v in l]
        inv_den = pl.reciprocal(e[0] + e[1] + e[2] + e[3], approx=True)   # den in [1,4]

        # ---------- ds_conv branch: grouped 3x3/s2 conv(+BN) -> SiLU --------------
        # tap (dy, dx) is a contiguous slice of space-to-depth plane (dy%2, dx%2);
        # build a (nb, 9C) bf16 im2col scratch and do ONE K=9C matmul so the
        # accumulation stays inside the MXU.
        for dy in range(3):
            for dx in range(3):
                p = (dy % 2) * 2 + (dx % 2)
                c0 = dx // 2
                if dy // 2 == 0:
                    tap = cm_ref[0, p, :, c0:c0 + ww, :]                  # (R, ww, C)
                else:
                    tap = jnp.concatenate(
                        [cm_ref[0, p, 1:R, c0:c0 + ww, :],
                         ch_ref[0, p, :, c0:c0 + ww, :]], axis=0)         # (R, ww, C)
                k = dy * 3 + dx
                col_ref[:, k * C:(k + 1) * C] = tap.reshape(nb, C)

        conv = (jnp.dot(col_ref[...], w_ds_ref[...],
                        preferred_element_type=jnp.float32)
                + b_ds_ref[...])                                          # (nb, 4C)
        d = _silu(conv)

        # weighted sum over the 4 output groups (output channel o = s*C + c)
        out = (d[:, 0 * C:1 * C] * e[0] + d[:, 1 * C:2 * C] * e[1]
               + d[:, 2 * C:3 * C] * e[2] + d[:, 3 * C:4 * C] * e[3])
        out_ref[0] = out * inv_den

    return kernel


def _pick_num_row_tiles(hh, ww, C, budget_bytes=24 << 20):
    """Pick T so one grid step's VMEM working set stays well under the limit."""
    # double-buffered bf16 weights + biases
    fixed = 2 * 2 * (9 * C * 4 * C + C * C + 5 * C)
    # rough bytes per output row: bf16 att/conv windows (double-buffered), bf16
    # quads + im2col scratch, f32 logits/softmax/conv intermediates, f32 out.
    per_row = 150 * ww * C
    max_rows = max(2, (budget_bytes - fixed) // per_row)
    best = 2
    for r in range(2, hh + 1, 2):                 # even R, R | hh
        if hh % r == 0 and r <= max_rows:
            best = r
    return hh // best


def lae_forward(x_nchw, w_att, b_att, w_ds, b_ds, num_row_tiles=None):
    """x_nchw: (B, C, H, W) float32 with H, W multiples of 4.
    Returns (B, C, H//2, W//2) float32."""
    B, C, H, W = x_nchw.shape
    if H % 4 or W % 4:
        # TODO(synk): support H, W == 2 (mod 4) via 1-row halo blocks.
        raise ValueError("lae_forward requires H % 4 == 0 and W % 4 == 0")
    hh, ww = H // 2, W // 2

    T = num_row_tiles or _pick_num_row_tiles(hh, ww, C)
    if hh % T or (hh // T) % 2:
        raise ValueError(f"num_row_tiles={T} must split hh={hh} into even tiles")
    R = hh // T
    nb = R * ww
    r2 = R // 2

    # NCHW -> NHWC bf16 with a shared zero pad of 1 (used by both branches).
    x = jnp.transpose(x_nchw, (0, 2, 3, 1)).astype(jnp.bfloat16)
    xp = jnp.pad(x, ((0, 0), (1, 1), (1, 1), (0, 0)))              # (B, H+2, W+2, C)
    # space-to-depth (parity split) view for the stride-2 conv taps:
    #   s2d[b, 2*pr+pc, i, j, c] = xp[b, 2i+pr, 2j+pc, c]
    s2d = xp.reshape(B, hh + 1, 2, ww + 1, 2, C)
    s2d = jnp.transpose(s2d, (0, 2, 4, 1, 3, 5)).reshape(B, 4, hh + 1, ww + 1, C)

    in_specs = [
        # attention windows: main R rows + 2 halo rows, quadrant row-halves s1=0/1
        pl.BlockSpec((1, R, W + 2, C), lambda b, t: (b, t, 0, 0)),
        pl.BlockSpec((1, 2, W + 2, C), lambda b, t: (b, (t + 1) * r2, 0, 0)),
        pl.BlockSpec((1, R, W + 2, C), lambda b, t: (b, T + t, 0, 0)),
        pl.BlockSpec((1, 2, W + 2, C), lambda b, t: (b, hh // 2 + (t + 1) * r2, 0, 0)),
        # conv space-to-depth windows: main R plane-rows + 1 halo row, all 4 planes
        pl.BlockSpec((1, 4, R, ww + 1, C), lambda b, t: (b, 0, t, 0, 0)),
        pl.BlockSpec((1, 4, 1, ww + 1, C), lambda b, t: (b, 0, (t + 1) * R, 0, 0)),
        # folded weights / biases (constant index_map -> DMA'd once per call)
        pl.BlockSpec((C, C), lambda b, t: (0, 0)),
        pl.BlockSpec((1, C), lambda b, t: (0, 0)),
        pl.BlockSpec((9 * C, 4 * C), lambda b, t: (0, 0)),
        pl.BlockSpec((1, 4 * C), lambda b, t: (0, 0)),
    ]

    out = pl.pallas_call(
        _make_lae_kernel(R, ww, C),
        out_shape=jax.ShapeDtypeStruct((B, hh * ww, C), jnp.float32),
        grid_spec=pltpu.PrefetchScalarGridSpec(
            num_scalar_prefetch=0,
            grid=(B, T),
            in_specs=in_specs,
            out_specs=pl.BlockSpec((1, nb, C), lambda b, t: (b, t, 0)),
            scratch_shapes=[
                pltpu.VMEM((4 * nb, C), jnp.bfloat16),      # pooled quadrants
                pltpu.VMEM((nb, 9 * C), jnp.bfloat16),      # conv im2col block
            ]),
        compiler_params=pltpu.CompilerParams(
            dimension_semantics=("parallel", "parallel"),
            vmem_limit_bytes=48 * 1024 * 1024),
    )(xp, xp, xp, xp, s2d, s2d, w_att, b_att, w_ds, b_ds)

    return jnp.transpose(out.reshape(B, hh, ww, C), (0, 3, 1, 2))


def fold_params(W1, g1, b1, m1, v1, W2, g2, b2, m2, v2, C, groups, eps=1e-5):
    """Fold BatchNorm (eval semantics) into the conv weights; matmul operands bf16."""
    s1 = g1 / jnp.sqrt(v1 + eps)
    # the avg-pool's 1/9 is linear, so it is folded into the 1x1 conv weight.
    w_att = ((W1 * s1[:, None]).T / 9.0).astype(jnp.bfloat16)        # (cin, cout)
    b_att = (b1 - m1 * s1).reshape(1, C)

    s2 = g2 / jnp.sqrt(v2 + eps)
    cin_pg = C // groups
    cout_pg = (4 * C) // groups
    # dense block-diagonal im2col weight, row = (dy*3+dx)*C + cin, col = cout
    Wd = jnp.zeros((3, 3, C, 4 * C), jnp.float32)
    for gi in range(groups):
        blk = W2[gi * cout_pg:(gi + 1) * cout_pg]                    # (cout_pg, cin_pg, 3, 3)
        Wd = Wd.at[:, :, gi * cin_pg:(gi + 1) * cin_pg,
                   gi * cout_pg:(gi + 1) * cout_pg].set(jnp.transpose(blk, (2, 3, 1, 0)))
    w_ds = (Wd.reshape(9 * C, 4 * C) * s2[None, :]).astype(jnp.bfloat16)
    b_ds = (b2 - m2 * s2).reshape(1, 4 * C)
    return w_att, b_att, w_ds, b_ds


def lae_reference(x, W1, g1, b1, m1, v1, W2, g2, b2, m2, v2, groups, eps=1e-5):
    """Pure-JAX (XLA, f32) reference of the PyTorch forward for verification."""
    B, C, H, W = x.shape
    hh, ww = H // 2, W // 2
    xp = jnp.pad(x, ((0, 0), (0, 0), (1, 1), (1, 1)))
    pooled = sum(xp[:, :, dy:dy + H, dx:dx + W]
                 for dy in range(3) for dx in range(3)) / 9.0
    att = lax.conv_general_dilated(pooled, W1.reshape(C, C, 1, 1), (1, 1), 'VALID',
                                   dimension_numbers=('NCHW', 'OIHW', 'NCHW'))
    att = (att - m1[None, :, None, None]) * (g1 / jnp.sqrt(v1 + eps))[None, :, None, None] \
        + b1[None, :, None, None]
    att = jax.nn.silu(att)
    att = att.reshape(B, C, 2, hh, 2, ww).transpose(0, 1, 3, 5, 2, 4).reshape(B, C, hh, ww, 4)
    att = jax.nn.softmax(att, axis=-1)

    y = lax.conv_general_dilated(x, W2, (2, 2), ((1, 1), (1, 1)),
                                 dimension_numbers=('NCHW', 'OIHW', 'NCHW'),
                                 feature_group_count=groups)
    y = (y - m2[None, :, None, None]) * (g2 / jnp.sqrt(v2 + eps))[None, :, None, None] \
        + b2[None, :, None, None]
    y = jax.nn.silu(y)
    y = y.reshape(B, 4, C, hh, ww).transpose(0, 2, 3, 4, 1)
    return jnp.sum(y * att, axis=-1)


if __name__ == "__main__":
    B, C, H, W = 2, 16, 16, 16
    group = 8
    groups = C // group                                  # conv groups of ds_conv

    key = jax.random.PRNGKey(0)
    ks = jax.random.split(key, 11)
    x = jax.random.normal(ks[0], (B, C, H, W), jnp.float32)

    # attention: Conv(ch, ch, k=1) = 1x1 conv (no bias) + BN + SiLU
    W1 = jax.random.normal(ks[1], (C, C), jnp.float32) * 0.1
    g1 = jax.random.uniform(ks[2], (C,), jnp.float32, 0.5, 1.5)
    b1 = jax.random.normal(ks[3], (C,), jnp.float32) * 0.1
    m1 = jax.random.normal(ks[4], (C,), jnp.float32) * 0.1
    v1 = jax.random.uniform(ks[5], (C,), jnp.float32, 0.5, 1.5)

    # ds_conv: Conv(ch, 4*ch, k=3, s=2, g=ch//8) + BN + SiLU
    W2 = jax.random.normal(ks[6], (4 * C, C // groups, 3, 3), jnp.float32) * 0.1
    g2 = jax.random.uniform(ks[7], (4 * C,), jnp.float32, 0.5, 1.5)
    b2 = jax.random.normal(ks[8], (4 * C,), jnp.float32) * 0.1
    m2 = jax.random.normal(ks[9], (4 * C,), jnp.float32) * 0.1
    v2 = jax.random.uniform(ks[10], (4 * C,), jnp.float32, 0.5, 1.5)

    w_att, b_att, w_ds, b_ds = fold_params(W1, g1, b1, m1, v1, W2, g2, b2, m2, v2, C, groups)

    ref = jax.block_until_ready(
        lae_reference(x, W1, g1, b1, m1, v1, W2, g2, b2, m2, v2, groups))

    # auto row tiling (single tile at this tiny size) ...
    out_a = jax.block_until_ready(lae_forward(x, w_att, b_att, w_ds, b_ds))
    # ... and a forced 2-tile run to exercise the halo BlockSpecs / index maps.
    out_b = jax.block_until_ready(
        lae_forward(x, w_att, b_att, w_ds, b_ds, num_row_tiles=2))

    assert out_a.shape == (B, C, H // 2, W // 2), out_a.shape
    err_a = float(jnp.max(jnp.abs(out_a - ref)))
    err_b = float(jnp.max(jnp.abs(out_b - ref)))
    assert err_a < 5e-2, f"max abs err (auto tiles) {err_a}"
    assert err_b < 5e-2, f"max abs err (2 row tiles) {err_b}"
    print("KERNEL_OK")
</pallas_src>

<mosaic_0001>
module attributes {stable_mosaic.version = 11 : i64} {
  func.func @kernel(%arg0: i32, %arg1: i32, %arg2: memref<1x8x18x16xbf16, #tpu.memory_space<vmem>>, %arg3: memref<1x2x18x16xbf16, #tpu.memory_space<vmem>>, %arg4: memref<1x8x18x16xbf16, #tpu.memory_space<vmem>>, %arg5: memref<1x2x18x16xbf16, #tpu.memory_space<vmem>>, %arg6: memref<1x4x8x9x16xbf16, #tpu.memory_space<vmem>>, %arg7: memref<1x4x1x9x16xbf16, #tpu.memory_space<vmem>>, %arg8: memref<16x16xbf16, #tpu.memory_space<vmem>>, %arg9: memref<1x16xf32, #tpu.memory_space<vmem>>, %arg10: memref<144x64xbf16, #tpu.memory_space<vmem>>, %arg11: memref<1x64xf32, #tpu.memory_space<vmem>>, %arg12: memref<1x64x16xf32, #tpu.memory_space<vmem>>, %arg13: memref<256x16xbf16, #tpu.memory_space<vmem>>, %arg14: memref<64x144xbf16, #tpu.memory_space<vmem>>) attributes {dimension_semantics = [#tpu.dimension_semantics<parallel>, #tpu.dimension_semantics<parallel>], iteration_bounds = array<i64: 2, 1>, scalar_prefetch = 0 : i64, scratch_operands = 2 : i64, tpu.core_type = #tpu.core_type<tc>, window_params = [{transform_indices = @transform_0, window_bounds = array<i64: 1, 8, 18, 16>}, {transform_indices = @transform_1, window_bounds = array<i64: 1, 2, 18, 16>}, {transform_indices = @transform_2, window_bounds = array<i64: 1, 8, 18, 16>}, {transform_indices = @transform_3, window_bounds = array<i64: 1, 2, 18, 16>}, {transform_indices = @transform_4, window_bounds = array<i64: 1, 4, 8, 9, 16>}, {transform_indices = @transform_5, window_bounds = array<i64: 1, 4, 1, 9, 16>}, {pipeline_mode = #tpu.pipeline_mode<synchronous>, transform_indices = @transform_6, window_bounds = array<i64: 16, 16>}, {pipeline_mode = #tpu.pipeline_mode<synchronous>, transform_indices = @transform_7, window_bounds = array<i64: 1, 16>}, {pipeline_mode = #tpu.pipeline_mode<synchronous>, transform_indices = @transform_8, window_bounds = array<i64: 144, 64>}, {pipeline_mode = #tpu.pipeline_mode<synchronous>, transform_indices = @transform_9, window_bounds = array<i64: 1, 64>}, {transform_indices = @transform_10, window_bounds = array<i64: 1, 64, 16>}]} {
    %c0 = arith.constant 0 : index
    %c0_0 = arith.constant 0 : index
    %c0_1 = arith.constant 0 : index
    %c0_2 = arith.constant 0 : index
    %0 = vector.load %arg2[%c0, %c0_0, %c0_1, %c0_2] : memref<1x8x18x16xbf16, #tpu.memory_space<vmem>>, vector<1x8x10x16xbf16>
    %1 = vector.shape_cast %0 : vector<1x8x10x16xbf16> to vector<8x10x16xbf16>
    %2 = arith.extf %1 : vector<8x10x16xbf16> to vector<8x10x16xf32>
    %c0_3 = arith.constant 0 : index
    %c0_4 = arith.constant 0 : index
    %c0_5 = arith.constant 0 : index
    %c0_6 = arith.constant 0 : index
    %3 = vector.load %arg3[%c0_3, %c0_4, %c0_5, %c0_6] : memref<1x2x18x16xbf16, #tpu.memory_space<vmem>>, vector<1x2x10x16xbf16>
    %4 = vector.shape_cast %3 : vector<1x2x10x16xbf16> to vector<2x10x16xbf16>
    %5 = arith.extf %4 : vector<2x10x16xbf16> to vector<2x10x16xf32>
    %6 = vector.extract_strided_slice %2 {offsets = [0, 0, 0], sizes = [8, 8, 16], strides = [1, 1, 1]} : vector<8x10x16xf32> to vector<8x8x16xf32>
    %7 = vector.extract_strided_slice %2 {offsets = [0, 1, 0], sizes = [8, 8, 16], strides = [1, 1, 1]} : vector<8x10x16xf32> to vector<8x8x16xf32>
    %8 = arith.addf %6, %7 : vector<8x8x16xf32>
    %9 = vector.extract_strided_slice %2 {offsets = [0, 2, 0], sizes = [8, 8, 16], strides = [1, 1, 1]} : vector<8x10x16xf32> to vector<8x8x16xf32>
    %10 = arith.addf %8, %9 : vector<8x8x16xf32>
    %11 = vector.extract_strided_slice %5 {offsets = [0, 0, 0], sizes = [2, 8, 16], strides = [1, 1, 1]} : vector<2x10x16xf32> to vector<2x8x16xf32>
    %12 = vector.extract_strided_slice %5 {offsets = [0, 1, 0], sizes = [2, 8, 16], strides = [1, 1, 1]} : vector<2x10x16xf32> to vector<2x8x16xf32>
    %13 = arith.addf %11, %12 : vector<2x8x16xf32>
    %14 = vector.extract_strided_slice %5 {offsets = [0, 2, 0], sizes = [2, 8, 16], strides = [1, 1, 1]} : vector<2x10x16xf32> to vector<2x8x16xf32>
    %15 = arith.addf %13, %14 : vector<2x8x16xf32>
    %16 = tpu.concatenate %10, %15 in 0 : vector<8x8x16xf32>, vector<2x8x16xf32> -> vector<10x8x16xf32>
    %17 = vector.extract_strided_slice %16 {offsets = [0, 0, 0], sizes = [8, 8, 16], strides = [1, 1, 1]} : vector<10x8x16xf32> to vector<8x8x16xf32>
    %18 = vector.extract_strided_slice %16 {offsets = [1, 0, 0], sizes = [8, 8, 16], strides = [1, 1, 1]} : vector<10x8x16xf32> to vector<8x8x16xf32>
    %19 = arith.addf %17, %18 : vector<8x8x16xf32>
    %20 = vector.extract_strided_slice %16 {offsets = [2, 0, 0], sizes = [8, 8, 16], strides = [1, 1, 1]} : vector<10x8x16xf32> to vector<8x8x16xf32>
    %21 = arith.addf %19, %20 : vector<8x8x16xf32>
    %22 = vector.shape_cast %21 : vector<8x8x16xf32> to vector<64x16xf32>
    %23 = arith.truncf %22 : vector<64x16xf32> to vector<64x16xbf16>
    %c0_7 = arith.constant 0 : index
    %c0_8 = arith.constant 0 : index
    %24 = vector.load %arg13[%c0_7, %c0_8] : memref<256x16xbf16, #tpu.memory_space<vmem>>, vector<64x16xbf16>
    tpu.vector_store %arg13[%c0_7, %c0_8], %23 {strides = array<i32>} : memref<256x16xbf16, #tpu.memory_space<vmem>>, vector<64x16xbf16>,
    %c0_9 = arith.constant 0 : index
    %c0_10 = arith.constant 0 : index
    %c8 = arith.constant 8 : index
    %c0_11 = arith.constant 0 : index
    %25 = vector.load %arg2[%c0_9, %c0_10, %c8, %c0_11] : memref<1x8x18x16xbf16, #tpu.memory_space<vmem>>, vector<1x8x10x16xbf16>
    %26 = vector.shape_cast %25 : vector<1x8x10x16xbf16> to vector<8x10x16xbf16>
    %27 = arith.extf %26 : vector<8x10x16xbf16> to vector<8x10x16xf32>
    %c0_12 = arith.constant 0 : index
    %c0_13 = arith.constant 0 : index
    %c8_14 = arith.constant 8 : index
    %c0_15 = arith.constant 0 : index
    %28 = vector.load %arg3[%c0_12, %c0_13, %c8_14, %c0_15] : memref<1x2x18x16xbf16, #tpu.memory_space<vmem>>, vector<1x2x10x16xbf16>
    %29 = vector.shape_cast %28 : vector<1x2x10x16xbf16> to vector<2x10x16xbf16>
    %30 = arith.extf %29 : vector<2x10x16xbf16> to vector<2x10x16xf32>
    %31 = vector.extract_strided_slice %27 {offsets = [0, 0, 0], sizes = [8, 8, 16], strides = [1, 1, 1]} : vector<8x10x16xf32> to vector<8x8x16xf32>
    %32 = vector.extract_strided_slice %27 {offsets = [0, 1, 0], sizes = [8, 8, 16], strides = [1, 1, 1]} : vector<8x10x16xf32> to vector<8x8x16xf32>
    %33 = arith.addf %31, %32 : vector<8x8x16xf32>
    %34 = vector.extract_strided_slice %27 {offsets = [0, 2, 0], sizes = [8, 8, 16], strides = [1, 1, 1]} : vector<8x10x16xf32> to vector<8x8x16xf32>
    %35 = arith.addf %33, %34 : vector<8x8x16xf32>
    %36 = vector.extract_strided_slice %30 {offsets = [0, 0, 0], sizes = [2, 8, 16], strides = [1, 1, 1]} : vector<2x10x16xf32> to vector<2x8x16xf32>
    %37 = vector.extract_strided_slice %30 {offsets = [0, 1, 0], sizes = [2, 8, 16], strides = [1, 1, 1]} : vector<2x10x16xf32> to vector<2x8x16xf32>
    %38 = arith.addf %36, %37 : vector<2x8x16xf32>
    %39 = vector.extract_strided_slice %30 {offsets = [0, 2, 0], sizes = [2, 8, 16], strides = [1, 1, 1]} : vector<2x10x16xf32> to vector<2x8x16xf32>
    %40 = arith.addf %38, %39 : vector<2x8x16xf32>
    %41 = tpu.concatenate %35, %40 in 0 : vector<8x8x16xf32>, vector<2x8x16xf32> -> vector<10x8x16xf32>
    %42 = vector.extract_strided_slice %41 {offsets = [0, 0, 0], sizes = [8, 8, 16], strides = [1, 1, 1]} : vector<10x8x16xf32> to vector<8x8x16xf32>
    %43 = vector.extract_strided_slice %41 {offsets = [1, 0, 0], sizes = [8, 8, 16], strides = [1, 1, 1]} : vector<10x8x16xf32> to vector<8x8x16xf32>
    %44 = arith.addf %42, %43 : vector<8x8x16xf32>
    %45 = vector.extract_strided_slice %41 {offsets = [2, 0, 0], sizes = [8, 8, 16], strides = [1, 1, 1]} : vector<10x8x16xf32> to vector<8x8x16xf32>
    %46 = arith.addf %44, %45 : vector<8x8x16xf32>
    %47 = vector.shape_cast %46 : vector<8x8x16xf32> to vector<64x16xf32>
    %48 = arith.truncf %47 : vector<64x16xf32> to vector<64x16xbf16>
    %c64 = arith.constant 64 : index
    %c0_16 = arith.constant 0 : index
    %49 = vector.load %arg13[%c64, %c0_16] : memref<256x16xbf16, #tpu.memory_space<vmem>>, vector<64x16xbf16>
    tpu.vector_store %arg13[%c64, %c0_16], %48 {strides = array<i32>} : memref<256x16xbf16, #tpu.memory_space<vmem>>, vector<64x16xbf16>,
    %c0_17 = arith.constant 0 : index
    %c0_18 = arith.constant 0 : index
    %c0_19 = arith.constant 0 : index
    %c0_20 = arith.constant 0 : index
    %50 = vector.load %arg4[%c0_17, %c0_18, %c0_19, %c0_20] : memref<1x8x18x16xbf16, #tpu.memory_space<vmem>>, vector<1x8x10x16xbf16>
    %51 = vector.shape_cast %50 : vector<1x8x10x16xbf16> to vector<8x10x16xbf16>
    %52 = arith.extf %51 : vector<8x10x16xbf16> to vector<8x10x16xf32>
    %c0_21 = arith.constant 0 : index
    %c0_22 = arith.constant 0 : index
    %c0_23 = arith.constant 0 : index
    %c0_24 = arith.constant 0 : index
    %53 = vector.load %arg5[%c0_21, %c0_22, %c0_23, %c0_24] : memref<1x2x18x16xbf16, #tpu.memory_space<vmem>>, vector<1x2x10x16xbf16>
    %54 = vector.shape_cast %53 : vector<1x2x10x16xbf16> to vector<2x10x16xbf16>
    %55 = arith.extf %54 : vector<2x10x16xbf16> to vector<2x10x16xf32>
    %56 = vector.extract_strided_slice %52 {offsets = [0, 0, 0], sizes = [8, 8, 16], strides = [1, 1, 1]} : vector<8x10x16xf32> to vector<8x8x16xf32>
    %57 = vector.extract_strided_slice %52 {offsets = [0, 1, 0], sizes = [8, 8, 16], strides = [1, 1, 1]} : vector<8x10x16xf32> to vector<8x8x16xf32>
    %58 = arith.addf %56, %57 : vector<8x8x16xf32>
    %59 = vector.extract_strided_slice %52 {offsets = [0, 2, 0], sizes = [8, 8, 16], strides = [1, 1, 1]} : vector<8x10x16xf32> to vector<8x8x16xf32>
    %60 = arith.addf %58, %59 : vector<8x8x16xf32>
    %61 = vector.extract_strided_slice %55 {offsets = [0, 0, 0], sizes = [2, 8, 16], strides = [1, 1, 1]} : vector<2x10x16xf32> to vector<2x8x16xf32>
    %62 = vector.extract_strided_slice %55 {offsets = [0, 1, 0], sizes = [2, 8, 16], strides = [1, 1, 1]} : vector<2x10x16xf32> to vector<2x8x16xf32>
    %63 = arith.addf %61, %62 : vector<2x8x16xf32>
    %64 = vector.extract_strided_slice %55 {offsets = [0, 2, 0], sizes = [2, 8, 16], strides = [1, 1, 1]} : vector<2x10x16xf32> to vector<2x8x16xf32>
    %65 = arith.addf %63, %64 : vector<2x8x16xf32>
    %66 = tpu.concatenate %60, %65 in 0 : vector<8x8x16xf32>, vector<2x8x16xf32> -> vector<10x8x16xf32>
    %67 = vector.extract_strided_slice %66 {offsets = [0, 0, 0], sizes = [8, 8, 16], strides = [1, 1, 1]} : vector<10x8x16xf32> to vector<8x8x16xf32>
    %68 = vector.extract_strided_slice %66 {offsets = [1, 0, 0], sizes = [8, 8, 16], strides = [1, 1, 1]} : vector<10x8x16xf32> to vector<8x8x16xf32>
    %69 = arith.addf %67, %68 : vector<8x8x16xf32>
    %70 = vector.extract_strided_slice %66 {offsets = [2, 0, 0], sizes = [8, 8, 16], strides = [1, 1, 1]} : vector<10x8x16xf32> to vector<8x8x16xf32>
    %71 = arith.addf %69, %70 : vector<8x8x16xf32>
    %72 = vector.shape_cast %71 : vector<8x8x16xf32> to vector<64x16xf32>
    %73 = arith.truncf %72 : vector<64x16xf32> to vector<64x16xbf16>
    %c128 = arith.constant 128 : index
    %c0_25 = arith.constant 0 : index
    %74 = vector.load %arg13[%c128, %c0_25] : memref<256x16xbf16, #tpu.memory_space<vmem>>, vector<64x16xbf16>
    tpu.vector_store %arg13[%c128, %c0_25], %73 {strides = array<i32>} : memref<256x16xbf16, #tpu.memory_space<vmem>>, vector<64x16xbf16>,
    %c0_26 = arith.constant 0 : index
    %c0_27 = arith.constant 0 : index
    %c8_28 = arith.constant 8 : index
    %c0_29 = arith.constant 0 : index
    %75 = vector.load %arg4[%c0_26, %c0_27, %c8_28, %c0_29] : memref<1x8x18x16xbf16, #tpu.memory_space<vmem>>, vector<1x8x10x16xbf16>
    %76 = vector.shape_cast %75 : vector<1x8x10x16xbf16> to vector<8x10x16xbf16>
    %77 = arith.extf %76 : vector<8x10x16xbf16> to vector<8x10x16xf32>
    %c0_30 = arith.constant 0 : index
    %c0_31 = arith.constant 0 : index
    %c8_32 = arith.constant 8 : index
    %c0_33 = arith.constant 0 : index
    %78 = vector.load %arg5[%c0_30, %c0_31, %c8_32, %c0_33] : memref<1x2x18x16xbf16, #tpu.memory_space<vmem>>, vector<1x2x10x16xbf16>
    %79 = vector.shape_cast %78 : vector<1x2x10x16xbf16> to vector<2x10x16xbf16>
    %80 = arith.extf %79 : vector<2x10x16xbf16> to vector<2x10x16xf32>
    %81 = vector.extract_strided_slice %77 {offsets = [0, 0, 0], sizes = [8, 8, 16], strides = [1, 1, 1]} : vector<8x10x16xf32> to vector<8x8x16xf32>
    %82 = vector.extract_strided_slice %77 {offsets = [0, 1, 0], sizes = [8, 8, 16], strides = [1, 1, 1]} : vector<8x10x16xf32> to vector<8x8x16xf32>
    %83 = arith.addf %81, %82 : vector<8x8x16xf32>
    %84 = vector.extract_strided_slice %77 {offsets = [0, 2, 0], sizes = [8, 8, 16], strides = [1, 1, 1]} : vector<8x10x16xf32> to vector<8x8x16xf32>
    %85 = arith.addf %83, %84 : vector<8x8x16xf32>
    %86 = vector.extract_strided_slice %80 {offsets = [0, 0, 0], sizes = [2, 8, 16], strides = [1, 1, 1]} : vector<2x10x16xf32> to vector<2x8x16xf32>
    %87 = vector.extract_strided_slice %80 {offsets = [0, 1, 0], sizes = [2, 8, 16], strides = [1, 1, 1]} : vector<2x10x16xf32> to vector<2x8x16xf32>
    %88 = arith.addf %86, %87 : vector<2x8x16xf32>
    %89 = vector.extract_strided_slice %80 {offsets = [0, 2, 0], sizes = [2, 8, 16], strides = [1, 1, 1]} : vector<2x10x16xf32> to vector<2x8x16xf32>
    %90 = arith.addf %88, %89 : vector<2x8x16xf32>
    %91 = tpu.concatenate %85, %90 in 0 : vector<8x8x16xf32>, vector<2x8x16xf32> -> vector<10x8x16xf32>
    %92 = vector.extract_strided_slice %91 {offsets = [0, 0, 0], sizes = [8, 8, 16], strides = [1, 1, 1]} : vector<10x8x16xf32> to vector<8x8x16xf32>
    %93 = vector.extract_strided_slice %91 {offsets = [1, 0, 0], sizes = [8, 8, 16], strides = [1, 1, 1]} : vector<10x8x16xf32> to vector<8x8x16xf32>
    %94 = arith.addf %92, %93 : vector<8x8x16xf32>
    %95 = vector.extract_strided_slice %91 {offsets = [2, 0, 0], sizes = [8, 8, 16], strides = [1, 1, 1]} : vector<10x8x16xf32> to vector<8x8x16xf32>
    %96 = arith.addf %94, %95 : vector<8x8x16xf32>
    %97 = vector.shape_cast %96 : vector<8x8x16xf32> to vector<64x16xf32>
    %98 = arith.truncf %97 : vector<64x16xf32> to vector<64x16xbf16>
    %c192 = arith.constant 192 : index
    %c0_34 = arith.constant 0 : index
    %99 = vector.load %arg13[%c192, %c0_34] : memref<256x16xbf16, #tpu.memory_space<vmem>>, vector<64x16xbf16>
    tpu.vector_store %arg13[%c192, %c0_34], %98 {strides = array<i32>} : memref<256x16xbf16, #tpu.memory_space<vmem>>, vector<64x16xbf16>,
    %c0_35 = arith.constant 0 : index
    %c0_36 = arith.constant 0 : index
    %100 = vector.load %arg13[%c0_35, %c0_36] : memref<256x16xbf16, #tpu.memory_space<vmem>>, vector<256x16xbf16>
    %c0_37 = arith.constant 0 : index
    %c0_38 = arith.constant 0 : index
    %101 = vector.load %arg8[%c0_37, %c0_38] : memref<16x16xbf16, #tpu.memory_space<vmem>>, vector<16x16xbf16>
    %cst = arith.constant dense<0.000000e+00> : vector<256x16xf32>
    %102 = tpu.matmul %100, %101, %cst {dimension_numbers = #tpu.dot_dimension_numbers<[1], [0], [0], [1], [0, 0, 1, 1], [], []>} : vector<256x16xbf16>, vector<16x16xbf16>, vector<256x16xf32> -> vector<256x16xf32>
    %c0_39 = arith.constant 0 : index
    %c0_40 = arith.constant 0 : index
    %103 = vector.load %arg9[%c0_39, %c0_40] : memref<1x16xf32, #tpu.memory_space<vmem>>, vector<1x16xf32>
    %104 = vector.broadcast %103 : vector<1x16xf32> to vector<256x16xf32>
    %105 = arith.addf %102, %104 : vector<256x16xf32>
    %cst_41 = arith.constant 0.000000e+00 : f32
    %106 = vector.broadcast %cst_41 : f32 to vector<256x16xf32>
    %107 = arith.subf %106, %105 : vector<256x16xf32>
    %108 = math.exp %107 : vector<256x16xf32>
    %cst_42 = arith.constant 1.000000e+00 : f32
    %109 = vector.broadcast %cst_42 : f32 to vector<256x16xf32>
    %110 = arith.addf %109, %108 : vector<256x16xf32>
    %111 = arith.divf %105, %110 : vector<256x16xf32>
    %112 = vector.extract_strided_slice %111 {offsets = [0, 0], sizes = [64, 16], strides = [1, 1]} : vector<256x16xf32> to vector<64x16xf32>
    %113 = vector.extract_strided_slice %111 {offsets = [64, 0], sizes = [64, 16], strides = [1, 1]} : vector<256x16xf32> to vector<64x16xf32>
    %114 = vector.extract_strided_slice %111 {offsets = [128, 0], sizes = [64, 16], strides = [1, 1]} : vector<256x16xf32> to vector<64x16xf32>
    %115 = vector.extract_strided_slice %111 {offsets = [192, 0], sizes = [64, 16], strides = [1, 1]} : vector<256x16xf32> to vector<64x16xf32>
    %116 = arith.maximumf %112, %113 : vector<64x16xf32>
    %117 = arith.maximumf %114, %115 : vector<64x16xf32>
    %118 = arith.maximumf %116, %117 : vector<64x16xf32>
    %119 = arith.subf %112, %118 : vector<64x16xf32>
    %120 = math.exp %119 : vector<64x16xf32>
    %121 = arith.subf %113, %118 : vector<64x16xf32>
    %122 = math.exp %121 : vector<64x16xf32>
    %123 = arith.subf %114, %118 : vector<64x16xf32>
    %124 = math.exp %123 : vector<64x16xf32>
    %125 = arith.subf %115, %118 : vector<64x16xf32>
    %126 = math.exp %125 : vector<64x16xf32>
    %127 = arith.addf %120, %122 : vector<64x16xf32>
    %128 = arith.addf %127, %124 : vector<64x16xf32>
    %129 = arith.addf %128, %126 : vector<64x16xf32>
    %130 = tpu.reciprocal %129 {approx = true} : vector<64x16xf32> -> vector<64x16xf32>
    %c0_43 = arith.constant 0 : index
    %c0_44 = arith.constant 0 : index
    %c0_45 = arith.constant 0 : index
    %c0_46 = arith.constant 0 : index
    %c0_47 = arith.constant 0 : index
    %131 = vector.load %arg6[%c0_43, %c0_44, %c0_45, %c0_46, %c0_47] : memref<1x4x8x9x16xbf16, #tpu.memory_space<vmem>>, vector<1x1x8x8x16xbf16>
    %132 = vector.shape_cast %131 : vector<1x1x8x8x16xbf16> to vector<8x8x16xbf16>
    %133 = vector.shape_cast %132 : vector<8x8x16xbf16> to vector<64x16xbf16>
    %c0_48 = arith.constant 0 : index
    %c0_49 = arith.constant 0 : index
    %134 = vector.load %arg14[%c0_48, %c0_49] : memref<64x144xbf16, #tpu.memory_space<vmem>>, vector<64x16xbf16>
    tpu.vector_store %arg14[%c0_48, %c0_49], %133 {strides = array<i32>} : memref<64x144xbf16, #tpu.memory_space<vmem>>, vector<64x16xbf16>,
    %c0_50 = arith.constant 0 : index
    %c1 = arith.constant 1 : index
    %c0_51 = arith.constant 0 : index
    %c0_52 = arith.constant 0 : index
    %c0_53 = arith.constant 0 : index
    %135 = vector.load %arg6[%c0_50, %c1, %c0_51, %c0_52, %c0_53] : memref<1x4x8x9x16xbf16, #tpu.memory_space<vmem>>, vector<1x1x8x8x16xbf16>
    %136 = vector.shape_cast %135 : vector<1x1x8x8x16xbf16> to vector<8x8x16xbf16>
    %137 = vector.shape_cast %136 : vector<8x8x16xbf16> to vector<64x16xbf16>
    %c0_54 = arith.constant 0 : index
    %c16 = arith.constant 16 : index
    %138 = vector.load %arg14[%c0_54, %c16] : memref<64x144xbf16, #tpu.memory_space<vmem>>, vector<64x16xbf16>
    tpu.vector_store %arg14[%c0_54, %c16], %137 {strides = array<i32>} : memref<64x144xbf16, #tpu.memory_space<vmem>>, vector<64x16xbf16>,
    %c0_55 = arith.constant 0 : index
    %c0_56 = arith.constant 0 : index
    %c0_57 = arith.constant 0 : index
    %c1_58 = arith.constant 1 : index
    %c0_59 = arith.constant 0 : index
    %139 = vector.load %arg6[%c0_55, %c0_56, %c0_57, %c1_58, %c0_59] : memref<1x4x8x9x16xbf16, #tpu.memory_space<vmem>>, vector<1x1x8x8x16xbf16>
    %140 = vector.shape_cast %139 : vector<1x1x8x8x16xbf16> to vector<8x8x16xbf16>
    %141 = vector.shape_cast %140 : vector<8x8x16xbf16> to vector<64x16xbf16>
    %c0_60 = arith.constant 0 : index
    %c32 = arith.constant 32 : index
    %142 = vector.load %arg14[%c0_60, %c32] : memref<64x144xbf16, #tpu.memory_space<vmem>>, vector<64x16xbf16>
    tpu.vector_store %arg14[%c0_60, %c32], %141 {strides = array<i32>} : memref<64x144xbf16, #tpu.memory_space<vmem>>, vector<64x16xbf16>,
    %c0_61 = arith.constant 0 : index
    %c2 = arith.constant 2 : index
    %c0_62 = arith.constant 0 : index
    %c0_63 = arith.constant 0 : index
    %c0_64 = arith.constant 0 : index
    %143 = vector.load %arg6[%c0_61, %c2, %c0_62, %c0_63, %c0_64] : memref<1x4x8x9x16xbf16, #tpu.memory_space<vmem>>, vector<1x1x8x8x16xbf16>
    %144 = vector.shape_cast %143 : vector<1x1x8x8x16xbf16> to vector<8x8x16xbf16>
    %145 = vector.shape_cast %144 : vector<8x8x16xbf16> to vector<64x16xbf16>
    %c0_65 = arith.constant 0 : index
    %c48 = arith.constant 48 : index
    %146 = vector.load %arg14[%c0_65, %c48] : memref<64x144xbf16, #tpu.memory_space<vmem>>, vector<64x16xbf16>
    tpu.vector_store %arg14[%c0_65, %c48], %145 {strides = array<i32>} : memref<64x144xbf16, #tpu.memory_space<vmem>>, vector<64x16xbf16>,
    %c0_66 = arith.constant 0 : index
    %c3 = arith.constant 3 : index
    %c0_67 = arith.constant 0 : index
    %c0_68 = arith.constant 0 : index
    %c0_69 = arith.constant 0 : index
    %147 = vector.load %arg6[%c0_66, %c3, %c0_67, %c0_68, %c0_69] : memref<1x4x8x9x16xbf16, #tpu.memory_space<vmem>>, vector<1x1x8x8x16xbf16>
    %148 = vector.shape_cast %147 : vector<1x1x8x8x16xbf16> to vector<8x8x16xbf16>
    %149 = vector.shape_cast %148 : vector<8x8x16xbf16> to vector<64x16xbf16>
    %c0_70 = arith.constant 0 : index
    %c64_71 = arith.constant 64 : index
    %150 = vector.load %arg14[%c0_70, %c64_71] : memref<64x144xbf16, #tpu.memory_space<vmem>>, vector<64x16xbf16>
    tpu.vector_store %arg14[%c0_70, %c64_71], %149 {strides = array<i32>} : memref<64x144xbf16, #tpu.memory_space<vmem>>, vector<64x16xbf16>,
    %c0_72 = arith.constant 0 : index
    %c2_73 = arith.constant 2 : index
    %c0_74 = arith.constant 0 : index
    %c1_75 = arith.constant 1 : index
    %c0_76 = arith.constant 0 : index
    %151 = vector.load %arg6[%c0_72, %c2_73, %c0_74, %c1_75, %c0_76] : memref<1x4x8x9x16xbf16, #tpu.memory_space<vmem>>, vector<1x1x8x8x16xbf16>
    %152 = vector.shape_cast %151 : vector<1x1x8x8x16xbf16> to vector<8x8x16xbf16>
    %153 = vector.shape_cast %152 : vector<8x8x16xbf16> to vector<64x16xbf16>
    %c0_77 = arith.constant 0 : index
    %c80 = arith.constant 80 : index
    %154 = vector.load %arg14[%c0_77, %c80] : memref<64x144xbf16, #tpu.memory_space<vmem>>, vector<64x16xbf16>
    tpu.vector_store %arg14[%c0_77, %c80], %153 {strides = array<i32>} : memref<64x144xbf16, #tpu.memory_space<vmem>>, vector<64x16xbf16>,
    %c0_78 = arith.constant 0 : index
    %c0_79 = arith.constant 0 : index
    %c1_80 = arith.constant 1 : index
    %c0_81 = arith.constant 0 : index
    %c0_82 = arith.constant 0 : index
    %155 = vector.load %arg6[%c0_78, %c0_79, %c1_80, %c0_81, %c0_82] : memref<1x4x8x9x16xbf16, #tpu.memory_space<vmem>>, vector<1x1x7x8x16xbf16>
    %156 = vector.shape_cast %155 : vector<1x1x7x8x16xbf16> to vector<7x8x16xbf16>
    %c0_83 = arith.constant 0 : index
    %c0_84 = arith.constant 0 : index
    %c0_85 = arith.constant 0 : index
    %c0_86 = arith.constant 0 : index
    %c0_87 = arith.constant 0 : index
    %157 = vector.load %arg7[%c0_83, %c0_84, %c0_85, %c0_86, %c0_87] : memref<1x4x1x9x16xbf16, #tpu.memory_space<vmem>>, vector<1x1x1x8x16xbf16>
    %158 = vector.shape_cast %157 : vector<1x1x1x8x16xbf16> to vector<1x8x16xbf16>
    %159 = tpu.concatenate %156, %158 in 0 : vector<7x8x16xbf16>, vector<1x8x16xbf16> -> vector<8x8x16xbf16>
    %160 = vector.shape_cast %159 : vector<8x8x16xbf16> to vector<64x16xbf16>
    %c0_88 = arith.constant 0 : index
    %c96 = arith.constant 96 : index
    %161 = vector.load %arg14[%c0_88, %c96] : memref<64x144xbf16, #tpu.memory_space<vmem>>, vector<64x16xbf16>
    tpu.vector_store %arg14[%c0_88, %c96], %160 {strides = array<i32>} : memref<64x144xbf16, #tpu.memory_space<vmem>>, vector<64x16xbf16>,
    %c0_89 = arith.constant 0 : index
    %c1_90 = arith.constant 1 : index
    %c1_91 = arith.constant 1 : index
    %c0_92 = arith.constant 0 : index
    %c0_93 = arith.constant 0 : index
    %162 = vector.load %arg6[%c0_89, %c1_90, %c1_91, %c0_92, %c0_93] : memref<1x4x8x9x16xbf16, #tpu.memory_space<vmem>>, vector<1x1x7x8x16xbf16>
    %163 = vector.shape_cast %162 : vector<1x1x7x8x16xbf16> to vector<7x8x16xbf16>
    %c0_94 = arith.constant 0 : index
    %c1_95 = arith.constant 1 : index
    %c0_96 = arith.constant 0 : index
    %c0_97 = arith.constant 0 : index
    %c0_98 = arith.constant 0 : index
    %164 = vector.load %arg7[%c0_94, %c1_95, %c0_96, %c0_97, %c0_98] : memref<1x4x1x9x16xbf16, #tpu.memory_space<vmem>>, vector<1x1x1x8x16xbf16>
    %165 = vector.shape_cast %164 : vector<1x1x1x8x16xbf16> to vector<1x8x16xbf16>
    %166 = tpu.concatenate %163, %165 in 0 : vector<7x8x16xbf16>, vector<1x8x16xbf16> -> vector<8x8x16xbf16>
    %167 = vector.shape_cast %166 : vector<8x8x16xbf16> to vector<64x16xbf16>
    %c0_99 = arith.constant 0 : index
    %c112 = arith.constant 112 : index
    %168 = vector.load %arg14[%c0_99, %c112] : memref<64x144xbf16, #tpu.memory_space<vmem>>, vector<64x16xbf16>
    tpu.vector_store %arg14[%c0_99, %c112], %167 {strides = array<i32>} : memref<64x144xbf16, #tpu.memory_space<vmem>>, vector<64x16xbf16>,
    %c0_100 = arith.constant 0 : index
    %c0_101 = arith.constant 0 : index
    %c1_102 = arith.constant 1 : index
    %c1_103 = arith.constant 1 : index
    %c0_104 = arith.constant 0 : index
    %169 = vector.load %arg6[%c0_100, %c0_101, %c1_102, %c1_103, %c0_104] : memref<1x4x8x9x16xbf16, #tpu.memory_space<vmem>>, vector<1x1x7x8x16xbf16>
    %170 = vector.shape_cast %169 : vector<1x1x7x8x16xbf16> to vector<7x8x16xbf16>
    %c0_105 = arith.constant 0 : index
    %c0_106 = arith.constant 0 : index
    %c0_107 = arith.constant 0 : index
    %c1_108 = arith.constant 1 : index
    %c0_109 = arith.constant 0 : index
    %171 = vector.load %arg7[%c0_105, %c0_106, %c0_107, %c1_108, %c0_109] : memref<1x4x1x9x16xbf16, #tpu.memory_space<vmem>>, vector<1x1x1x8x16xbf16>
    %172 = vector.shape_cast %171 : vector<1x1x1x8x16xbf16> to vector<1x8x16xbf16>
    %173 = tpu.concatenate %170, %172 in 0 : vector<7x8x16xbf16>, vector<1x8x16xbf16> -> vector<8x8x16xbf16>
    %174 = vector.shape_cast %173 : vector<8x8x16xbf16> to vector<64x16xbf16>
    %c0_110 = arith.constant 0 : index
    %c128_111 = arith.constant 128 : index
    %175 = vector.load %arg14[%c0_110, %c128_111] : memref<64x144xbf16, #tpu.memory_space<vmem>>, vector<64x16xbf16>
    tpu.vector_store %arg14[%c0_110, %c128_111], %174 {strides = array<i32>} : memref<64x144xbf16, #tpu.memory_space<vmem>>, vector<64x16xbf16>,
    %c0_112 = arith.constant 0 : index
    %c0_113 = arith.constant 0 : index
    %176 = vector.load %arg14[%c0_112, %c0_113] : memref<64x144xbf16, #tpu.memory_space<vmem>>, vector<64x144xbf16>
    %c0_114 = arith.constant 0 : index
    %c0_115 = arith.constant 0 : index
    %177 = vector.load %arg10[%c0_114, %c0_115] : memref<144x64xbf16, #tpu.memory_space<vmem>>, vector<144x64xbf16>
    %cst_116 = arith.constant dense<0.000000e+00> : vector<64x64xf32>
    %178 = tpu.matmul %176, %177, %cst_116 {dimension_numbers = #tpu.dot_dimension_numbers<[1], [0], [0], [1], [0, 0, 1, 1], [], []>} : vector<64x144xbf16>, vector<144x64xbf16>, vector<64x64xf32> -> vector<64x64xf32>
    %c0_117 = arith.constant 0 : index
    %c0_118 = arith.constant 0 : index
    %179 = vector.load %arg11[%c0_117, %c0_118] : memref<1x64xf32, #tpu.memory_space<vmem>>, vector<1x64xf32>
    %180 = vector.broadcast %179 : vector<1x64xf32> to vector<64x64xf32>
    %181 = arith.addf %178, %180 : vector<64x64xf32>
    %cst_119 = arith.constant 0.000000e+00 : f32
    %182 = vector.broadcast %cst_119 : f32 to vector<64x64xf32>
    %183 = arith.subf %182, %181 : vector<64x64xf32>
    %184 = math.exp %183 : vector<64x64xf32>
    %cst_120 = arith.constant 1.000000e+00 : f32
    %185 = vector.broadcast %cst_120 : f32 to vector<64x64xf32>
    %186 = arith.addf %185, %184 : vector<64x64xf32>
    %187 = arith.divf %181, %186 : vector<64x64xf32>
    %188 = vector.extract_strided_slice %187 {offsets = [0, 0], sizes = [64, 16], strides = [1, 1]} : vector<64x64xf32> to vector<64x16xf32>
    %189 = arith.mulf %188, %120 : vector<64x16xf32>
    %190 = vector.extract_strided_slice %187 {offsets = [0, 16], sizes = [64, 16], strides = [1, 1]} : vector<64x64xf32> to vector<64x16xf32>
    %191 = arith.mulf %190, %122 : vector<64x16xf32>
    %192 = arith.addf %189, %191 : vector<64x16xf32>
    %193 = vector.extract_strided_slice %187 {offsets = [0, 32], sizes = [64, 16], strides = [1, 1]} : vector<64x64xf32> to vector<64x16xf32>
    %194 = arith.mulf %193, %124 : vector<64x16xf32>
    %195 = arith.addf %192, %194 : vector<64x16xf32>
    %196 = vector.extract_strided_slice %187 {offsets = [0, 48], sizes = [64, 16], strides = [1, 1]} : vector<64x64xf32> to vector<64x16xf32>
    %197 = arith.mulf %196, %126 : vector<64x16xf32>
    %198 = arith.addf %195, %197 : vector<64x16xf32>
    %199 = arith.mulf %198, %130 : vector<64x16xf32>
    %c0_121 = arith.constant 0 : index
    %c0_122 = arith.constant 0 : index
    %c0_123 = arith.constant 0 : index
    %200 = vector.load %arg12[%c0_121, %c0_122, %c0_123] : memref<1x64x16xf32, #tpu.memory_space<vmem>>, vector<1x64x16xf32>
    %201 = vector.shape_cast %200 : vector<1x64x16xf32> to vector<64x16xf32>
    %202 = vector.shape_cast %199 : vector<64x16xf32> to vector<1x64x16xf32>
    tpu.vector_store %arg12[%c0_121, %c0_122, %c0_123], %202 {strides = array<i32>} : memref<1x64x16xf32, #tpu.memory_space<vmem>>, vector<1x64x16xf32>,
    return
  }
  func.func @transform_0(%arg0: i32, %arg1: i32) -> (i32, i32, i32, i32) {
    %c0_i32 = arith.constant 0 : i32
    %c0_i32_0 = arith.constant 0 : i32
    %c0_i32_1 = arith.constant 0 : i32
    return %arg0, %arg1, %c0_i32, %c0_i32_0 : i32, i32, i32, i32
  }
  func.func @transform_1(%arg0: i32, %arg1: i32) -> (i32, i32, i32, i32) {
    %c1_i32 = arith.constant 1 : i32
    %0 = arith.addi %arg1, %c1_i32 : i32
    %c4_i32 = arith.constant 4 : i32
    %1 = arith.muli %0, %c4_i32 : i32
    %c0_i32 = arith.constant 0 : i32
    %c0_i32_0 = arith.constant 0 : i32
    %c0_i32_1 = arith.constant 0 : i32
    return %arg0, %1, %c0_i32, %c0_i32_0 : i32, i32, i32, i32
  }
  func.func @transform_2(%arg0: i32, %arg1: i32) -> (i32, i32, i32, i32) {
    %c1_i32 = arith.constant 1 : i32
    %0 = arith.addi %c1_i32, %arg1 : i32
    %c0_i32 = arith.constant 0 : i32
    %c0_i32_0 = arith.constant 0 : i32
    %c0_i32_1 = arith.constant 0 : i32
    return %arg0, %0, %c0_i32, %c0_i32_0 : i32, i32, i32, i32
  }
  func.func @transform_3(%arg0: i32, %arg1: i32) -> (i32, i32, i32, i32) {
    %c1_i32 = arith.constant 1 : i32
    %0 = arith.addi %arg1, %c1_i32 : i32
    %c4_i32 = arith.constant 4 : i32
    %1 = arith.muli %0, %c4_i32 : i32
    %c4_i32_0 = arith.constant 4 : i32
    %2 = arith.addi %c4_i32_0, %1 : i32
    %c0_i32 = arith.constant 0 : i32
    %c0_i32_1 = arith.constant 0 : i32
    %c0_i32_2 = arith.constant 0 : i32
    return %arg0, %2, %c0_i32, %c0_i32_1 : i32, i32, i32, i32
  }
  func.func @transform_4(%arg0: i32, %arg1: i32) -> (i32, i32, i32, i32, i32) {
    %c0_i32 = arith.constant 0 : i32
    %c0_i32_0 = arith.constant 0 : i32
    %c0_i32_1 = arith.constant 0 : i32
    %c0_i32_2 = arith.constant 0 : i32
    return %arg0, %c0_i32, %arg1, %c0_i32_0, %c0_i32_1 : i32, i32, i32, i32, i32
  }
  func.func @transform_5(%arg0: i32, %arg1: i32) -> (i32, i32, i32, i32, i32) {
    %c1_i32 = arith.constant 1 : i32
    %0 = arith.addi %arg1, %c1_i32 : i32
    %c8_i32 = arith.constant 8 : i32
    %1 = arith.muli %0, %c8_i32 : i32
    %c0_i32 = arith.constant 0 : i32
    %c0_i32_0 = arith.constant 0 : i32
    %c0_i32_1 = arith.constant 0 : i32
    %c0_i32_2 = arith.constant 0 : i32
    return %arg0, %c0_i32, %1, %c0_i32_0, %c0_i32_1 : i32, i32, i32, i32, i32
  }
  func.func @transform_6(%arg0: i32, %arg1: i32) -> (i32, i32) {
    %c0_i32 = arith.constant 0 : i32
    %c0_i32_0 = arith.constant 0 : i32
    %c0_i32_1 = arith.constant 0 : i32
    return %c0_i32, %c0_i32_0 : i32, i32
  }
  func.func @transform_7(%arg0: i32, %arg1: i32) -> (i32, i32) {
    %c0_i32 = arith.constant 0 : i32
    %c0_i32_0 = arith.constant 0 : i32
    %c0_i32_1 = arith.constant 0 : i32
    return %c0_i32, %c0_i32_0 : i32, i32
  }
  func.func @transform_8(%arg0: i32, %arg1: i32) -> (i32, i32) {
    %c0_i32 = arith.constant 0 : i32
    %c0_i32_0 = arith.constant 0 : i32
    %c0_i32_1 = arith.constant 0 : i32
    return %c0_i32, %c0_i32_0 : i32, i32
  }
  func.func @transform_9(%arg0: i32, %arg1: i32) -> (i32, i32) {
    %c0_i32 = arith.constant 0 : i32
    %c0_i32_0 = arith.constant 0 : i32
    %c0_i32_1 = arith.constant 0 : i32
    return %c0_i32, %c0_i32_0 : i32, i32
  }
  func.func @transform_10(%arg0: i32, %arg1: i32) -> (i32, i32, i32) {
    %c0_i32 = arith.constant 0 : i32
    %c0_i32_0 = arith.constant 0 : i32
    return %arg0, %arg1, %c0_i32 : i32, i32, i32
  }
}

</mosaic_0001>

<bundles_post_ra>
// kernel: tpu_custom_call.1
= control target key start
LH: loop header
LB: loop body
LE: loop exit
PB: predicated region body
PF: predicated region fallthrough
CT: control target
= control target key end

     0   :  { %s7657_s0 = inlined_call_operand.vmem [shape: bf16[2,18,18,16], index: 0, kind: input, shape index: {}]   ;;  %s7658_s1 = inlined_call_operand.vmem [shape: bf16[2,18,18,16], index: 1, kind: input, shape index: {}]   ;;  %s7659_s2 = inlined_call_operand.vmem [shape: bf16[2,18,18,16], index: 2, kind: input, shape index: {}]   ;;  %s7660_s3 = inlined_call_operand.vmem [shape: bf16[2,18,18,16], index: 3, kind: input, shape index: {}]   ;;  %s7661_s4 = inlined_call_operand.vmem [shape: bf16[2,4,9,9,16], index: 4, kind: input, shape index: {}]   ;;  %s7662_s5 = inlined_call_operand.vmem [shape: bf16[2,4,9,9,16], index: 5, kind: input, shape index: {}]   ;;  %s7663_s6 = inlined_call_operand.vmem [shape: bf16[16,16], index: 6, kind: input, shape index: {}]   ;;  %s7664_s7 = inlined_call_operand.vmem [shape: f32[1,16], index: 7, kind: input, shape index: {}]   ;;  %s7665_s8 = inlined_call_operand.vmem [shape: bf16[144,64], index: 8, kind: input, shape index: {}]   ;;  %s7666_s9 = inlined_call_operand.vmem [shape: f32[1,64], index: 9, kind: input, shape index: {}]   ;;  %s7667_s10 = inlined_call_operand.vmem [shape: f32[2,64,16], index: 10, kind: output, shape index: {}]  }
   0x1   :  { %7676 = sst [smem:[#allocation8_spill]] %s7661_s4 }
   0x2   :  { %s5189_s13 = smov 0   ;;  %s5191_s14 = smov 0  }
   0x3   :  { %s5193_s15 = smov 0   ;;  %s5195_s16 = smov 0  }
   0x4   :  { %s5197_s17 = smov 0  }
   0x5 LB: > { %s32_s18 = sadd.s32 1, %s5105_s16  ;;  %p172_p1 = scmp.ne.s32.totalorder %s5097_s14, %s5093_s13  ;;  %s5109_s17 = sphi %s5197_s17, %s20_s17   ;;  %s5105_s16 = sphi %s5195_s16, %s7831_s16   ;;  %s5101_s15 = sphi %s5193_s15, %s7830_s15   ;;  %s5097_s14 = sphi %s5191_s14, %s7829_s14   ;;  %s5093_s13 = sphi %s5189_s13, %s7828_s13  }
   0x6   : > { %p34_p0 = scmp.ge.s32.totalorder %s32_s18, 2  ;;  %p173_p2 = scmp.eq.s32.totalorder %s5109_s17, 0 }
   0x7   : > { %s165_s21 = sadd.s32 1, %s5097_s14  ;;  %p4429_p5 = scmp.ge.s32.totalorder %s5109_s17, 2 }
   0x8   : > { %s7833_s18 = smov (%p34_p0, %s32_s18), 0  ;;  %p5220_p3 = por %p173_p2, %p172_p1 }
   0x9   : > { %7677 = sst [smem:[#allocation6_spill]] %s7833_s18  ;;  %s160_s20 = ssub.s32 %s5105_s16, %s7833_s18 }
   0xa   : > { %p163_p4 = scmp.eq.s32.totalorder %s160_s20, 0  ;;  %354 = sbr.rel (%p4429_p5) target bundleno = 67 (0x43), region = 32 }
   0xc   : > { %s5228_s22 = scalar_select %p163_p4, %s5097_s14, %s165_s21  }
   0xe   : > { %7679 = sst [smem:[#allocation7_spill]] %s5228_s22 }
   0xf   : > { %445 = sbr.rel (!%p5220_p3) target bundleno = 58 (0x3a), region = 52  ;;  %s447_s23 = sand.u32 (%p5220_p3), 1, %s5097_s14  }
  0x10   : > { %s4729_s24 = smul.u32 (%p5220_p3), 288, %s5105_s16  ;;  %s5235_s25 = sshll.u32 (%p5220_p3), %s447_s23, 8 }
  0x11   : > { %s7680_s4 = sld [smem:[#allocation8_spill]] (%p5220_p3)  ;;  %s449_s29 = scalar_lea.vmem (%p5220_p3), [#allocation4], %s5235_s25  }
  0x12   : > { %s7681_s30 = smov (%p5220_p3), %s449_s29  ;;  %s5250_s12 = smov (%p5220_p3), 0  }
  0x13   : > { %s5252_s20 = smov (%p5220_p3), 0  }
  0x17   : > { %s5240_s28 = scalar_lea.vmem %s7680_s4, %s4729_s24  }
  0x18   : > { %s7682_s11 = smov %s5240_s28 }
  0x19 LB: >> { %v482_v0 = vld [vmem:[%s5117_s11] sm:$0xf]  ;;  %v484_v1 = vld [vmem:[%s5117_s11 + $0x4] sm:$0xf]  ;;  %v486_v2 = vld [vmem:[%s5117_s11 + $0x8] sm:$0xf]  ;;  %s5125_s20 = sphi %s5252_s20, %s476_s20   ;;  %s5121_s12 = sphi %s5250_s12, %s7685_s12   ;;  %s5117_s11 = sphi %s7682_s11, %s7684_s11   ;;  %s5113_s30 = sphi %s7681_s30, %s7683_s30  }
  0x1a   : >> { %483 = vst [vmem:[%s5113_s30] sm:$0xf] %v482_v0  ;;  %v488_v3 = vld [vmem:[%s5117_s11 + $0xc] sm:$0xf]  ;;  %v490_v4 = vld [vmem:[%s5117_s11 + $0x10] sm:$0xf]  ;;  %s546_s21 = sadd.s32 1, %s5121_s12 }
  0x1b   : >> { %485 = vst [vmem:[%s5113_s30 + $0x4] sm:$0xf] %v484_v1  ;;  %v492_v5 = vld [vmem:[%s5117_s11 + $0x14] sm:$0xf]  ;;  %v494_v6 = vld [vmem:[%s5117_s11 + $0x18] sm:$0xf] }
  0x1c   : >> { %487 = vst [vmem:[%s5113_s30 + $0x8] sm:$0xf] %v486_v2  ;;  %v496_v7 = vld [vmem:[%s5117_s11 + $0x1c] sm:$0xf]  ;;  %v498_v8 = vld [vmem:[%s5117_s11 + $0x48] sm:$0xf] }
  0x1d   : >> { %489 = vst [vmem:[%s5113_s30 + $0xc] sm:$0xf] %v488_v3  ;;  %v500_v9 = vld [vmem:[%s5117_s11 + $0x4c] sm:$0xf]  ;;  %v502_v10 = vld [vmem:[%s5117_s11 + $0x50] sm:$0xf] }
  0x1e   : >> { %491 = vst [vmem:[%s5113_s30 + $0x10] sm:$0xf] %v490_v4  ;;  %v504_v11 = vld [vmem:[%s5117_s11 + $0x54] sm:$0xf]  ;;  %v506_v12 = vld [vmem:[%s5117_s11 + $0x58] sm:$0xf] }
  0x1f   : >> { %493 = vst [vmem:[%s5113_s30 + $0x14] sm:$0xf] %v492_v5  ;;  %v508_v13 = vld [vmem:[%s5117_s11 + $0x5c] sm:$0xf]  ;;  %v510_v14 = vld [vmem:[%s5117_s11 + $0x60] sm:$0xf] }
  0x20   : >> { %495 = vst [vmem:[%s5113_s30 + $0x18] sm:$0xf] %v494_v6  ;;  %v512_v15 = vld [vmem:[%s5117_s11 + $0x64] sm:$0xf]  ;;  %v514_v16 = vld [vmem:[%s5117_s11 + $0x90] sm:$0xf] }
  0x21   : >> { %497 = vst [vmem:[%s5113_s30 + $0x1c] sm:$0xf] %v496_v7  ;;  %v516_v17 = vld [vmem:[%s5117_s11 + $0x94] sm:$0xf]  ;;  %p547_p6 = scmp.ge.s32.totalorder %s546_s21, 2  ;;  %s476_s20 = sadd.s32 1, %s5125_s20  }
  0x22   : >> { %499 = vst [vmem:[%s5113_s30 + $0x40] sm:$0xf] %v498_v8  ;;  %v518_v18 = vld [vmem:[%s5117_s11 + $0x98] sm:$0xf]  ;;  %v520_v19 = vld [vmem:[%s5117_s11 + $0x9c] sm:$0xf] }
  0x23   : >> { %501 = vst [vmem:[%s5113_s30 + $0x44] sm:$0xf] %v500_v9  ;;  %s7835_s21 = smov (%p547_p6, %s546_s21), 0  ;;  %v522_v20 = vld [vmem:[%s5117_s11 + $0xa0] sm:$0xf]  ;;  %p475_p7 = scmp.ge.s32.totalorder %s476_s20, 2 }
  0x24   : >> { %503 = vst [vmem:[%s5113_s30 + $0x48] sm:$0xf] %v502_v10  ;;  %v524_v21 = vld [vmem:[%s5117_s11 + $0xa4] sm:$0xf]  ;;  %s4432_s23 = sshll.u32 %s7835_s21, 5  ;;  %s7685_s12 = smov %s7835_s21 }
  0x25   : >> { %505 = vst [vmem:[%s5113_s30 + $0x4c] sm:$0xf] %v504_v11  ;;  %v526_v22 = vld [vmem:[%s5117_s11 + $0xa8] sm:$0xf]  ;;  %s551_s24 = scalar_lea.vmem %s5240_s28, %s4432_s23   ;;  %s552_s26 = scalar_lea.vmem %s449_s29, %s4432_s23 [#allocation4]   ;;  %v528_v23 = vld [vmem:[%s5117_s11 + $0xac] sm:$0xf] }
  0x26   : >> { %507 = vst [vmem:[%s5113_s30 + $0x50] sm:$0xf] %v506_v12  ;;  %v530_v24 = vld [vmem:[%s5117_s11 + $0xd8] sm:$0xf]  ;;  %v532_v25 = vld [vmem:[%s5117_s11 + $0xdc] sm:$0xf] }
  0x27   : >> { %509 = vst [vmem:[%s5113_s30 + $0x54] sm:$0xf] %v508_v13  ;;  %v534_v26 = vld [vmem:[%s5117_s11 + $0xe0] sm:$0xf]  ;;  %v536_v27 = vld [vmem:[%s5117_s11 + $0xe4] sm:$0xf] }
  0x28   : >> { %511 = vst [vmem:[%s5113_s30 + $0x58] sm:$0xf] %v510_v14  ;;  %v538_v28 = vld [vmem:[%s5117_s11 + $0xe8] sm:$0xf]  ;;  %v540_v29 = vld [vmem:[%s5117_s11 + $0xec] sm:$0xf] }
  0x29   : >> { %513 = vst [vmem:[%s5113_s30 + $0x5c] sm:$0xf] %v512_v15  ;;  %v542_v30 = vld [vmem:[%s5117_s11 + $0xf0] sm:$0xf]  ;;  %v544_v31 = vld [vmem:[%s5117_s11 + $0xf4] sm:$0xf]  ;;  %s7684_s11 = smov %s551_s24 }
  0x2a   : >> { %515 = vst [vmem:[%s5113_s30 + $0x80] sm:$0xf] %v514_v16 }
  0x2b   : >> { %517 = vst [vmem:[%s5113_s30 + $0x84] sm:$0xf] %v516_v17 }
  0x2c   : >> { %519 = vst [vmem:[%s5113_s30 + $0x88] sm:$0xf] %v518_v18 }
  0x2d   : >> { %521 = vst [vmem:[%s5113_s30 + $0x8c] sm:$0xf] %v520_v19 }
  0x2e   : >> { %523 = vst [vmem:[%s5113_s30 + $0x90] sm:$0xf] %v522_v20 }
  0x2f   : >> { %525 = vst [vmem:[%s5113_s30 + $0x94] sm:$0xf] %v524_v21 }
  0x30   : >> { %527 = vst [vmem:[%s5113_s30 + $0x98] sm:$0xf] %v526_v22 }
  0x31   : >> { %529 = vst [vmem:[%s5113_s30 + $0x9c] sm:$0xf] %v528_v23 }
  0x32   : >> { %531 = vst [vmem:[%s5113_s30 + $0xc0] sm:$0xf] %v530_v24 }
  0x33   : >> { %533 = vst [vmem:[%s5113_s30 + $0xc4] sm:$0xf] %v532_v25 }
  0x34   : >> { %535 = vst [vmem:[%s5113_s30 + $0xc8] sm:$0xf] %v534_v26 }
  0x35   : >> { %537 = vst [vmem:[%s5113_s30 + $0xcc] sm:$0xf] %v536_v27  ;;  %478 = sbr.rel (!%p475_p7) target bundleno = 25 (0x19), region = 238 }
  0x36   : >> { %539 = vst [vmem:[%s5113_s30 + $0xd0] sm:$0xf] %v538_v28 }
  0x37   : >> { %541 = vst [vmem:[%s5113_s30 + $0xd4] sm:$0xf] %v540_v29 }
  0x38   : >> { %543 = vst [vmem:[%s5113_s30 + $0xd8] sm:$0xf] %v542_v30 }
  0x39   : >> { %545 = vst [vmem:[%s5113_s30 + $0xdc] sm:$0xf] %v544_v31  ;;  %s7683_s30 = smov %s552_s26 }
  0x3a PF: > { %743 = sbr.rel (!%p5220_p3) target bundleno = 67 (0x43), region = 114  ;;  %s745_s27 = sand.u32 (%p5220_p3), 1, %s5097_s14  }
  0x3b   : > { %s4441_s23 = smul.u32 (%p5220_p3), 288, %s5105_s16  ;;  %s4440_s4 = sshll.u32 (%p5220_p3), %s745_s27, 5 }
  0x3c   : > { %s747_s21 = scalar_lea.vmem (%p5220_p3), [#allocation5], %s4440_s4 }
  0x3d   : > { %s4269_s26 = scalar_lea.vmem (%p5220_p3), %s7662_s5, %s4441_s23 }
  0x3e   : > { %v4442_v32 = vld [vmem:[%s4269_s26 + $0x40] sm:$0xff] (%p5220_p3)   ;;  %v4444_v33 = vld [vmem:[%s4269_s26 + $0x88] sm:$0xff] (%p5220_p3)   ;;  %v4446_v34 = vld [vmem:[%s4269_s26 + $0xd0] sm:$0xff] (%p5220_p3)  }
  0x3f   : > { %772 = vst [vmem:[%s747_s21] sm:$0xff] %v4442_v32   ;;  %v4448_v35 = vld [vmem:[%s4269_s26 + $0x118] sm:$0xff]  }
  0x40   : > { %776 = vst [vmem:[%s747_s21 + $0x8] sm:$0xff] %v4444_v33  }
  0x41   : > { %780 = vst [vmem:[%s747_s21 + $0x10] sm:$0xff] %v4446_v34  }
  0x42   : > { %784 = vst [vmem:[%s747_s21 + $0x18] sm:$0xff] %v4448_v35  }
  0x43 PF: > { %p4450_p8 = scmp.ge.s32.totalorder %s5109_s17, 1  ;;  %p825_p9 = scmp.lt.s32.totalorder %s5109_s17, 3 }
  0x45   : > { %p826_p10 = pnand %p4450_p8, %p825_p9 }
  0x46   : > { %s832_s18 = sand.u32 (!%p826_p10), 1, %s5093_s13   ;;  %s5127_s28 = smov (!%p826_p10), 16  }
  0x47   : > { %829 = sbr.rel (%p826_p10) target bundleno = 751 (0x2ef), region = 155  ;;  %s4451_s19 = sshll.u32 (!%p826_p10), %s832_s18, 8 }
  0x48   : > { %s5362_s25 = scalar_lea.vmem (!%p826_p10), [#allocation4], %s4451_s19  ;;  %p946_p11 = scmp.lt.s32.totalorder (!%p826_p10), %s5101_s15, 1 }
  0x49   : > { %s5128_s30 = smov (!%p826_p10), 32   ;;  %s5129_s21 = smov (!%p826_p10), 64  }
  0x4a   : > { %s5130_s19 = smov (!%p826_p10), 48   ;;  %s5131_s22 = smov (!%p826_p10), 80  }
  0x4b   : > { %s5133_s27 = smov (!%p826_p10), 96  }
  0x4c   : > { %v4709_v36 = vld [vmem:[%s7663_s6] sm:$0xff]  ;;  %vm2910_vm0 = vsmask.f32 3328  ;;  %vm2911_vm1 = vsmask.f32 7440  ;;  %s7837_s15 = smov (!%p946_p11, %s5101_s15), 1 }
  0x4d   : > { %v4543_v37 = vld [vmem:[%s5362_s25 + $0x40] sm:$0xf]  ;;  %v2895_v39 = vld [vmem:[%s5362_s25 + $0x4] sm:$0x1]  ;;  %1986 = vmatpush.bf16.msra.mxu0 %v4709_v36  ;;  %4728 = vmatpush.bf16.msra.mxu3 %v4709_v36  ;;  %v2896_v43 = vld [vmem:[%s5362_s25 + $0x8] sm:$0xf] }
  0x4e   : > { %v2894_v38 = vld [vmem:[%s5362_s25] sm:$0xf]  ;;  %2861 = vrot.lane.b32.xlu0 %v4543_v37, %s5127_s28  ;;  %v2923_v42 = vshll.u32 %v2895_v39, 16  ;;  %4727 = vmatpush.bf16.msra.mxu2 %v4709_v36  ;;  %v2897_v44 = vld [vmem:[%s5362_s25 + $0xc] sm:$0x1]  ;;  %v2928_v48 = vshrl.u32 %v2896_v43, 16  ;;  %vm5375_vm2 = vmor %vm2910_vm0, %vm2911_vm1 }
  0x4f   : > { %v2914_v40 = vshrl.u32 %v2894_v38, 16  ;;  %v2917_v41 = vshll.u32 %v2894_v38, 16  ;;  %v2931_v49 = vshll.u32 %v2896_v43, 16  ;;  %v2937_v50 = vshll.u32 %v2897_v44, 16  ;;  %v4569_v51 = vld [vmem:[%s5362_s25 + $0x88] sm:$0xf] }
  0x50   : > { %v2925_v47 = vrot.slane %v2923_v42, 5  ;;  %v4570_v52 = vld [vmem:[%s5362_s25 + $0x8c] sm:$0x1]  ;;  %v2930_v54 = vrot.slane %v2928_v48, 4  ;;  %v3189_v55 = vshrl.u32 %v4569_v51, 16  ;;  %v3192_v56 = vshll.u32 %v4569_v51, 16 }
  0x51   : > { %v2916_v45 = vrot.slane %v2914_v40, 4  ;;  %v2919_v46 = vrot.slane %v2917_v41, 5  ;;  %v4544_v58 = vld [vmem:[%s5362_s25 + $0x48] sm:$0xf]  ;;  %v2933_v59 = vrot.slane %v2931_v49, 5  ;;  %v3198_v60 = vshll.u32 %v4570_v52, 16 }
  0x52   : > { %v3191_v62 = vrot.slane %v3189_v55, 4  ;;  %v3194_v63 = vrot.slane %v3192_v56, 5  ;;  %v2939_v2 = vrot.slane %v2937_v50, 5  ;;  %s5387_s29 = smul.u32 216, %s7837_s15  ;;  %vm1091_vm3 = vcmask 1046528  }
  0x53   : > { %v2920_v53 = vor.u32 %v2919_v46, %v2916_v45  ;;  %v2934_v0 = vor.u32 %v2933_v59, %v2930_v54  ;;  %v5390_v5 = vrot.slane %v3198_v60, 5  ;;  %vm1132_vm4 = vcmask 1045504   ;;  %v4559_v17 = vld [vmem:[%s5362_s25 + $0xc0] sm:$0xf] }
  0x54   : > { %v3195_v3 = vor.u32 %v3194_v63, %v3191_v62  ;;  %s5398_s20 = scalar_lea.vmem %s7657_s0, %s5387_s29  ;;  %s4687_s24 = sadd.s32 96, %s5387_s29  ;;  %vm1221_vm5 = vcmask 125952   ;;  %vm7670_vm6 = vcmask 130048   ;;  %vm2885_vm7 = vcmask 257152  }
  0x55   : > { %v2921_v61 = vrot.slane %v2920_v53, 4  ;;  %v2935_v4 = vrot.slane %v2934_v0, 4  ;;  %v1035_v7 = vld [vmem:[%s5398_s20] sm:$0xf]  ;;  %v1036_v8 = vld [vmem:[%s5398_s20 + $0x4] sm:$0x1]  ;;  %s5421_s26 = scalar_lea.vmem %s7659_s2, %s4687_s24  ;;  %s5478_s12 = scalar_lea.vmem %s7658_s1, %s4687_s24 }
  0x56   : > { %2863 = vrot.lane.b32.xlu0 %v4544_v58, %s5127_s28  ;;  %v5392_v6 = vrot.slane %v3195_v3, 4  ;;  %v1037_v9 = vld [vmem:[%s5398_s20 + $0xc] sm:$0xf]  ;;  %v1038_v11 = vld [vmem:[%s5398_s20 + $0x10] sm:$0x1]  ;;  %v1051_v14 = vunpack.c.l.bf16 %v1035_v7  ;;  %v1052_v15 = vunpack.c.l.bf16 %v1036_v8  ;;  %s5132_s24 = smov 112  }
  0x57   : > { %v2926_v1 = vsel %vm5375_vm2, %v2921_v61, %v2925_v47  ;;  %v2940_v10 = vsel %vm5375_vm2, %v2935_v4, %v2939_v2  ;;  %v1039_v12 = vld [vmem:[%s5398_s20 + $0x18] sm:$0xf]  ;;  %v1040_v13 = vld [vmem:[%s5398_s20 + $0x1c] sm:$0x1]  ;;  %v1053_v16 = vunpack.c.l.bf16 %v1037_v9  ;;  %v1041_v19 = vld [vmem:[%s5398_s20 + $0x24] sm:$0xf]  ;;  %v1054_v21 = vunpack.c.l.bf16 %v1038_v11 }
  0x58   : > { %3025 = vrot.lane.b32.xlu1 %v2926_v1, %s5128_s30  ;;  %v3201_v18 = vsel %vm5375_vm2, %v5392_v6, %v5390_v5  ;;  %v1042_v20 = vld [vmem:[%s5398_s20 + $0x28] sm:$0x1]  ;;  %v1055_v22 = vunpack.c.l.bf16 %v1039_v12  ;;  %v1056_v23 = vunpack.c.l.bf16 %v1040_v13  ;;  %v1057_v24 = vunpack.c.l.bf16 %v1041_v19  ;;  %v1426_v40 = vld [vmem:[%s5421_s26 + $0x18] sm:$0xf]  ;;  %v5430_v41 = vld [vmem:[%s5421_s26 + $0x1c] sm:$0x1] }
  0x59   : > { %v1058_v25 = vunpack.c.l.bf16 %v1042_v20  ;;  %v1092_v26 = vrot.slane %v1051_v14, 1  ;;  %v1093_v27 = vrot.slane %v1052_v15, 1  ;;  %v1095_v28 = vrot.slane %v1053_v16, 1  ;;  %v1428_v46 = vld [vmem:[%s5421_s26 + $0x24] sm:$0xf]  ;;  %s4691_s23 = sadd.s32 192, %s5387_s29 }
  0x5a   : > { %v1096_v29 = vrot.slane %v1054_v21, 1  ;;  %v1098_v30 = vrot.slane %v1055_v22, 1  ;;  %v1099_v31 = vrot.slane %v1056_v23, 1  ;;  %v1101_v33 = vrot.slane %v1057_v24, 1  ;;  %v5435_v47 = vld [vmem:[%s5421_s26 + $0x28] sm:$0x1]  ;;  %s5612_s11 = scalar_lea.vmem %s7660_s3, %s4691_s23 }
  0x5b   : > { %v1094_v32 = vsel %vm1091_vm3, %v1092_v26, %v1093_v27  ;;  %v1102_v34 = vrot.slane %v1058_v25, 1  ;;  %v1133_v35 = vrot.slane %v1051_v14, 2  ;;  %v1134_v39 = vrot.slane %v1052_v15, 2  ;;  %v1430_v52 = vld [vmem:[%s5421_s26 + $0x30] sm:$0xf] }
  0x5c   : > { %v1097_v36 = vsel %vm1091_vm3, %v1095_v28, %v1096_v29  ;;  %v1100_v37 = vsel %vm1091_vm3, %v1098_v30, %v1099_v31  ;;  %v1124_v38 = vadd.f32 %v1094_v32, %v1051_v14  ;;  %v1136_v45 = vrot.slane %v1053_v16, 2  ;;  %v4551_v53 = vld [vmem:[%s5362_s25 + $0x80] sm:$0xf]  ;;  %v1431_v59 = vld [vmem:[%s5421_s26 + $0x34] sm:$0x1] }
  0x5d   : > { %v1103_v42 = vsel %vm1091_vm3, %v1101_v33, %v1102_v34  ;;  %v1125_v43 = vadd.f32 %v1097_v36, %v1053_v16  ;;  %v1126_v44 = vadd.f32 %v1100_v37, %v1055_v22  ;;  %v1135_v49 = vsel %vm1132_vm4, %v1133_v35, %v1134_v39  ;;  %3075 = vrot.lane.b32.xlu2 %v4551_v53, %s5130_s19  ;;  %v1432_v61 = vld [vmem:[%s5421_s26 + $0x3c] sm:$0xf]  ;;  %v1433_v62 = vld [vmem:[%s5421_s26 + $0x40] sm:$0x1]  ;;  %v4560_v2 = vld [vmem:[%s5362_s25 + $0xc8] sm:$0xf] }
  0x5e   : > { %3125 = vrot.lane.b32.xlu0 %v4559_v17, %s5129_s21  ;;  %v1127_v48 = vadd.f32 %v1103_v42, %v1057_v24  ;;  %v1137_v50 = vrot.slane %v1054_v21, 2  ;;  %v1139_v51 = vrot.slane %v1055_v22, 2  ;;  %v1140_v54 = vrot.slane %v1056_v23, 2  ;;  %v4552_v22 = vld [vmem:[%s5362_s25 + $0x88] sm:$0xf] }
  0x5f   : > { %v1142_v55 = vrot.slane %v1057_v24, 2  ;;  %v1143_v56 = vrot.slane %v1058_v25, 2  ;;  %v1165_v58 = vadd.f32 %v1135_v49, %v1124_v38  ;;  %v1442_v63 = vunpack.c.l.bf16 %v1426_v40  ;;  %v4583_v32 = vld [vmem:[%s5362_s25 + $0x8] sm:$0xf]  ;;  %v1243_v33 = vld [vmem:[%s5398_s20 + $0x50] sm:$0x1] }
  0x60   : > { %3027 = vrot.lane.b32.xlu1 %v2940_v10, %s5128_s30  ;;  %v1138_v60 = vsel %vm1132_vm4, %v1136_v45, %v1137_v50  ;;  %v1443_v0 = vunpack.c.l.bf16 %v5430_v41  ;;  %v1444_v1 = vunpack.c.l.bf16 %v1428_v46  ;;  %v1141_v3 = vsel %vm1132_vm4, %v1139_v51, %v1140_v54  ;;  %v4590_v38 = vld [vmem:[%s5362_s25 + $0x48] sm:$0xf]  ;;  %v1245_v40 = vld [vmem:[%s5398_s20 + $0x5c] sm:$0x1]  ;;  %v5486_v45 = vld [vmem:[%s5398_s20 + $0x54] sm:$0xff]  }
  0x61   : > { %v1144_v4 = vsel %vm1132_vm4, %v1142_v55, %v1143_v56  ;;  %v1166_v7 = vadd.f32 %v1138_v60, %v1125_v43  ;;  %v1445_v8 = vunpack.c.l.bf16 %v5435_v47  ;;  %v5450_v9 = vadd.f32 %v1141_v3, %v1126_v44  ;;  %v5481_v39 = vld [vmem:[%s5398_s20 + $0x48] sm:$0xff]   ;;  %v1262_v54 = vld [vmem:[%s5478_s12 + $0x4] sm:$0xf]  ;;  %v1264_v56 = vld [vmem:[%s5478_s12 + $0x10] sm:$0xf] }
  0x62   : > { %v5452_v10 = vadd.f32 %v1144_v4, %v1127_v48  ;;  %v1446_v11 = vunpack.c.l.bf16 %v1430_v52  ;;  %v1447_v12 = vunpack.c.l.bf16 %v1431_v59  ;;  %v1448_v14 = vunpack.c.l.bf16 %v1432_v61  ;;  %v1263_v55 = vld [vmem:[%s5478_s12 + $0x8] sm:$0x1] }
  0x63   : > { %v1197_v13 = vadd.f32 %v1166_v7, %v1165_v58  ;;  %v1449_v15 = vunpack.c.l.bf16 %v1433_v62  ;;  %v1484_v16 = vrot.slane %v1442_v63, 1  ;;  %v1198_v17 = vadd.f32 %v5450_v9, %v1166_v7  ;;  %v1265_v62 = vld [vmem:[%s5478_s12 + $0x14] sm:$0x1] }
  0x64   : > { %v1485_v19 = vrot.slane %v1443_v0, 1  ;;  %v1487_v20 = vrot.slane %v1444_v1, 1  ;;  %v1488_v21 = vrot.slane %v1445_v8, 1  ;;  %v1490_v24 = vrot.slane %v1446_v11, 1 }
  0x65   : > { %v1205_v23 = vadd.f32 %v1197_v13, %v5450_v9  ;;  %v1491_v25 = vrot.slane %v1447_v12, 1  ;;  %v1493_v5 = vrot.slane %v1448_v14, 1  ;;  %v1206_v6 = vadd.f32 %v1198_v17, %v5452_v10  ;;  %3077 = vrot.lane.b32.xlu2 %v4552_v22, %s5130_s19 }
  0x66   : > { %3288 = vrot.lane.b32.xlu0 %v3201_v18, %s5131_s22  ;;  %v1486_v18 = vsel %vm1091_vm3, %v1484_v16, %v1485_v19  ;;  %v1489_v26 = vsel %vm1091_vm3, %v1487_v20, %v1488_v21  ;;  %v1494_v27 = vrot.slane %v1449_v15, 1  ;;  %v1524_v37 = vrot.slane %v1442_v63, 2  ;;  %v4546_v20 = vld [vmem:[%s5362_s25 + $0x58] sm:$0xf] }
  0x67   : > { %v1213_v28 = vpack.c.bf16 %v1205_v23, %v1205_v23  ;;  %v1492_v29 = vsel %vm1091_vm3, %v1490_v24, %v1491_v25  ;;  %v1512_v30 = vadd.f32 %v1486_v18, %v1442_v63  ;;  %v1513_v31 = vadd.f32 %v1489_v26, %v1444_v1  ;;  %v4591_v23 = vld [vmem:[%s5362_s25 + $0x50] sm:$0xf] }
  0x68   : > { %3127 = vrot.lane.b32.xlu1 %v4560_v2, %s5129_s21  ;;  %v1214_v34 = vpack.c.bf16 %v1206_v6, %v1206_v6  ;;  %v1495_v35 = vsel %vm1091_vm3, %v1493_v5, %v1494_v27  ;;  %v1514_v36 = vadd.f32 %v1492_v29, %v1446_v11  ;;  %v1525_v42 = vrot.slane %v1443_v0, 2 }
  0x69   : > { %1222 = vst.msk [vmem:[#allocation2] sm:$0xf] %vm1221_vm5, %v1213_v28  ;;  %v1515_v41 = vadd.f32 %v1495_v35, %v1448_v14  ;;  %v1527_v43 = vrot.slane %v1444_v1, 2  ;;  %v1528_v44 = vrot.slane %v1445_v8, 2  ;;  %v1530_v46 = vrot.slane %v1446_v11, 2 }
  0x6a   : > { %1223 = vst.msk [vmem:[#allocation2 + $0x4] sm:$0xf] %vm1221_vm5, %v1214_v34  ;;  %v1531_v47 = vrot.slane %v1447_v12, 2  ;;  %v1533_v48 = vrot.slane %v1448_v14, 2  ;;  %v1534_v49 = vrot.slane %v1449_v15, 2  ;;  %v1526_v50 = vsel %vm1132_vm4, %v1524_v37, %v1525_v42 }
  0x6b   : > { %v1529_v51 = vsel %vm1132_vm4, %v1527_v43, %v1528_v44  ;;  %v1258_v52 = vunpack.c.h.bf16 %v5481_v39  ;;  %v1259_v53 = vunpack.c.l.bf16 %v1243_v33  ;;  %v5498_v60 = vadd.f32 %v1526_v50, %v1512_v30  ;;  %v1044_v33 = vld [vmem:[%s5398_s20 + $0x34] sm:$0x1] }
  0x6c   : > { %v1532_v58 = vsel %vm1132_vm4, %v1530_v46, %v1531_v47  ;;  %v1535_v59 = vsel %vm1132_vm4, %v1533_v48, %v1534_v49  ;;  %v5500_v61 = vadd.f32 %v1529_v51, %v1513_v31  ;;  %v1260_v1 = vunpack.c.h.bf16 %v5486_v45  ;;  %v1046_v48 = vld [vmem:[%s5398_s20 + $0x40] sm:$0x1] }
  0x6d   : > { %v5504_v63 = vadd.f32 %v1532_v58, %v1514_v36  ;;  %v5506_v0 = vadd.f32 %v1535_v59, %v1515_v41  ;;  %v1261_v2 = vunpack.c.l.bf16 %v1245_v40  ;;  %v1266_v4 = vunpack.c.l.bf16 %v1262_v54  ;;  %v4553_v59 = vld [vmem:[%s5362_s25 + $0x90] sm:$0xf] }
  0x6e   : > { %3387 = vrot.lane.b32.xlu0 %v4590_v38, %s5132_s24  ;;  %v1584_v3 = vadd.f32 %v5500_v61, %v5498_v60  ;;  %v1267_v7 = vunpack.c.l.bf16 %v1263_v55  ;;  %v1268_v8 = vunpack.c.l.bf16 %v1264_v56  ;;  %v1269_v12 = vunpack.c.l.bf16 %v1265_v62  ;;  %v1045_v38 = vld [vmem:[%s5398_s20 + $0x3c] sm:$0xf] }
  0x6f   : > { %v1585_v11 = vadd.f32 %v5504_v63, %v5500_v61  ;;  %v1304_v13 = vrot.slane %v1258_v52, 1  ;;  %v1305_v14 = vrot.slane %v1259_v53, 1  ;;  %v1307_v16 = vrot.slane %v1260_v1, 1 }
  0x70   : > { %3336 = vrot.lane.b32.xlu1 %v4583_v32, %s5133_s27  ;;  %v1592_v15 = vadd.f32 %v1584_v3, %v5504_v63  ;;  %v1308_v17 = vrot.slane %v1261_v2, 1  ;;  %v1344_v19 = vrot.slane %v1258_v52, 2  ;;  %v1345_v25 = vrot.slane %v1259_v53, 2  ;;  %v1043_v32 = vld [vmem:[%s5398_s20 + $0x30] sm:$0xf] }
  0x71   : > { %v4693_v21 = vld [vmem:[#allocation2] sm:$0xff]  ;;  %v1593_v22 = vadd.f32 %v1585_v11, %v5506_v0  ;;  %v1306_v24 = vsel %vm1091_vm3, %v1304_v13, %v1305_v14  ;;  %v1347_v5 = vrot.slane %v1260_v1, 2  ;;  %v1348_v27 = vrot.slane %v1261_v2, 2 }
  0x72   : > { %v1600_v6 = vpack.c.bf16 %v1592_v15, %v1592_v15  ;;  %v1309_v18 = vsel %vm1091_vm3, %v1307_v16, %v1308_v17  ;;  %v1324_v26 = vadd.f32 %v1306_v24, %v1258_v52  ;;  %4527 = vmatmul.msk.bf16.vlgmr.msra.gmra.mxu0 %vm7670_vm6, %v4693_v21  ;;  %v1346_v30 = vsel %vm1132_vm4, %v1344_v19, %v1345_v25  ;;  %v1434_v16 = vld [vmem:[%s5421_s26 + $0x48] sm:$0xf]  ;;  %v1435_v17 = vld [vmem:[%s5421_s26 + $0x4c] sm:$0x1]  ;;  %v1436_v24 = vld [vmem:[%s5421_s26 + $0x54] sm:$0xf] }
  0x73   : > { %v1601_v28 = vpack.c.bf16 %v1593_v22, %v1593_v22  ;;  %v1325_v29 = vadd.f32 %v1309_v18, %v1260_v1  ;;  %v1370_v31 = vrot.slane %v1266_v4, 1  ;;  %v1349_v34 = vsel %vm1132_vm4, %v1347_v5, %v1348_v27  ;;  %v1437_v25 = vld [vmem:[%s5421_s26 + $0x58] sm:$0x1] }
  0x74   : > { %1608 = vst.msk [vmem:[#allocation2 + $0x48] sm:$0xf] %vm1221_vm5, %v1600_v6  ;;  %v5527_v35 = vadd.f32 %v1346_v30, %v1324_v26  ;;  %v1371_v36 = vrot.slane %v1267_v7, 1  ;;  %v1373_v37 = vrot.slane %v1268_v8, 1  ;;  %v1374_v41 = vrot.slane %v1269_v12, 1 }
  0x75   : > { %1609 = vst.msk [vmem:[#allocation2 + $0x4c] sm:$0xf] %vm1221_vm5, %v1601_v28  ;;  %v5531_v40 = vadd.f32 %v1349_v34, %v1325_v29  ;;  %v1380_v42 = vrot.slane %v1266_v4, 2  ;;  %v1381_v43 = vrot.slane %v1267_v7, 2  ;;  %v1383_v46 = vrot.slane %v1268_v8, 2 }
  0x76   : > { %2867 = vrot.lane.b32.xlu0 %v4546_v20, %s5127_s28  ;;  %v1372_v44 = vsel %vm1091_vm3, %v1370_v31, %v1371_v36  ;;  %v1384_v47 = vrot.slane %v1269_v12, 2  ;;  %v1059_v49 = vunpack.c.l.bf16 %v1043_v32  ;;  %v1375_v50 = vsel %vm1091_vm3, %v1373_v37, %v1374_v41 }
  0x77   : > { %v1378_v51 = vadd.f32 %v1372_v44, %v1266_v4  ;;  %v1382_v52 = vsel %vm1132_vm4, %v1380_v42, %v1381_v43  ;;  %v1396_v53 = vadd.f32 %v5531_v40, %v5527_v35  ;;  %v1379_v54 = vadd.f32 %v1375_v50, %v1268_v8  ;;  %v4567_v50 = vld [vmem:[%s5362_s25 + $0x80] sm:$0xf] }
  0x78   : > { %3389 = vrot.lane.b32.xlu1 %v4591_v23, %s5132_s24  ;;  %v1385_v55 = vsel %vm1132_vm4, %v1383_v46, %v1384_v47  ;;  %v1060_v56 = vunpack.c.l.bf16 %v1044_v33  ;;  %v1061_v58 = vunpack.c.l.bf16 %v1045_v38  ;;  %v1062_v1 = vunpack.c.l.bf16 %v1046_v48 }
  0x79   : > { %v1388_v62 = vadd.f32 %v1382_v52, %v1378_v51  ;;  %v1104_v2 = vrot.slane %v1059_v49, 1  ;;  %v1145_v3 = vrot.slane %v1059_v49, 2  ;;  %v1389_v7 = vadd.f32 %v1385_v55, %v1379_v54  ;;  %v4568_v55 = vld [vmem:[%s5362_s25 + $0x84] sm:$0x1] }
  0x7a   : > { %v1105_v4 = vrot.slane %v1060_v56, 1  ;;  %v1107_v11 = vrot.slane %v1061_v58, 1  ;;  %v1146_v12 = vrot.slane %v1060_v56, 2  ;;  %v1108_v14 = vrot.slane %v1062_v1, 1  ;;  %v4562_v56 = vld [vmem:[%s5362_s25 + $0xd8] sm:$0xf] }
  0x7b   : > { %v1397_v13 = vadd.f32 %v1388_v62, %v5531_v40  ;;  %v1404_v8 = vadd.f32 %v1396_v53, %v1388_v62  ;;  %v1148_v15 = vrot.slane %v1061_v58, 2  ;;  %v1149_v22 = vrot.slane %v1062_v1, 2 }
  0x7c   : > { %v4702_v19 = vld [vmem:[#allocation2 + $0x48] sm:$0xff]  ;;  %v1106_v20 = vsel %vm1091_vm3, %v1104_v2, %v1105_v4  ;;  %v1147_v21 = vsel %vm1132_vm4, %v1145_v3, %v1146_v12  ;;  %v1199_v23 = vadd.f32 %v5452_v10, %v5450_v9  ;;  %v1109_v18 = vsel %vm1091_vm3, %v1107_v11, %v1108_v14  ;;  %v5575_v2 = vld [vmem:[%s5421_s26] sm:$0xff]   ;;  %v2899_v12 = vld [vmem:[%s5362_s25 + $0x14] sm:$0x1] }
  0x7d   : > { %v1405_v5 = vadd.f32 %v1397_v13, %v1389_v7  ;;  %v1412_v6 = vpack.c.bf16 %v1404_v8, %v1404_v8  ;;  %v1128_v26 = vadd.f32 %v1106_v20, %v1059_v49  ;;  %4536 = vmatmul.msk.bf16.vlgmr.msra.gmra.mxu3 %vm7670_vm6, %v4702_v19  ;;  %v1129_v27 = vadd.f32 %v1109_v18, %v1061_v58 }
  0x7e   : > { %3079 = vrot.lane.b32.xlu0 %v4553_v59, %s5130_s19  ;;  %v1150_v28 = vsel %vm1132_vm4, %v1148_v15, %v1149_v22  ;;  %v1450_v29 = vunpack.c.l.bf16 %v1434_v16  ;;  %v1451_v30 = vunpack.c.l.bf16 %v1435_v17  ;;  %v1452_v9 = vunpack.c.l.bf16 %v1436_v24  ;;  %v1423_v16 = vld [vmem:[%s5421_s26 + $0x4] sm:$0x1]  ;;  %v1425_v22 = vld [vmem:[%s5421_s26 + $0x10] sm:$0x1] }
  0x7f   : > { %v1413_v31 = vpack.c.bf16 %v1405_v5, %v1405_v5  ;;  %1420 = vst.msk [vmem:[#allocation2 + $0x38] sm:$0xf] %vm1221_vm5, %v1412_v6  ;;  %v5555_v32 = vadd.f32 %v1147_v21, %v1128_v26  ;;  %v1453_v33 = vunpack.c.l.bf16 %v1437_v25  ;;  %v5557_v34 = vadd.f32 %v1150_v28, %v1129_v27 }
  0x80   : > { %v1496_v36 = vrot.slane %v1450_v29, 1  ;;  %v1497_v37 = vrot.slane %v1451_v30, 1  ;;  %v1536_v38 = vrot.slane %v1450_v29, 2  ;;  %v1499_v43 = vrot.slane %v1452_v9, 1 }
  0x81   : > { %1421 = vst.msk [vmem:[#allocation2 + $0x3c] sm:$0xf] %vm1221_vm5, %v1413_v31  ;;  %v1200_v41 = vadd.f32 %v5555_v32, %v5452_v10  ;;  %v1207_v42 = vadd.f32 %v1199_v23, %v5555_v32  ;;  %v1500_v44 = vrot.slane %v1453_v33, 1  ;;  %v1537_v47 = vrot.slane %v1451_v30, 2  ;;  %v2898_v10 = vld [vmem:[%s5362_s25 + $0x10] sm:$0xf] }
  0x82   : > { %v1498_v46 = vsel %vm1091_vm3, %v1496_v36, %v1497_v37  ;;  %v1539_v48 = vrot.slane %v1452_v9, 2  ;;  %v1540_v49 = vrot.slane %v1453_v33, 2  ;;  %v1586_v1 = vadd.f32 %v5506_v0, %v5504_v63  ;;  %v5586_v63 = vld [vmem:[%s5421_s26 + $0xc] sm:$0xff]  }
  0x83   : > { %v1208_v51 = vadd.f32 %v1200_v41, %v5557_v34  ;;  %v1215_v52 = vpack.c.bf16 %v1207_v42, %v1207_v42  ;;  %v1501_v53 = vsel %vm1091_vm3, %v1499_v43, %v1500_v44  ;;  %v1516_v54 = vadd.f32 %v1498_v46, %v1450_v29  ;;  %v1050_v46 = vld [vmem:[%s5398_s20 + $0x58] sm:$0x1] }
  0x84   : > { %v1517_v58 = vadd.f32 %v1501_v53, %v1452_v9  ;;  %v1538_v59 = vsel %vm1132_vm4, %v1536_v38, %v1537_v47  ;;  %v1541_v62 = vsel %vm1132_vm4, %v1539_v48, %v1540_v49  ;;  %v3175_v4 = vshrl.u32 %v4567_v50, 16  ;;  %v1048_v38 = vld [vmem:[%s5398_s20 + $0x4c] sm:$0x1] }
  0x85   : > { %v1216_v3 = vpack.c.bf16 %v1208_v51, %v1208_v51  ;;  %1224 = vst.msk [vmem:[#allocation2 + $0x8] sm:$0xf] %vm1221_vm5, %v1215_v52  ;;  %v5579_v7 = vadd.f32 %v1538_v59, %v1516_v54  ;;  %v3178_v11 = vshll.u32 %v4567_v50, 16  ;;  %v3184_v8 = vshll.u32 %v4568_v55, 16 }
  0x86   : > { %3131 = vrot.lane.b32.xlu0 %v4562_v56, %s5129_s21  ;;  %v5582_v13 = vadd.f32 %v1541_v62, %v1517_v58  ;;  %v2942_v14 = vshrl.u32 %v2898_v10, 16  ;;  %v2945_v15 = vshll.u32 %v2898_v10, 16  ;;  %v3177_v20 = vrot.slane %v3175_v4, 4  ;;  %v4585_v62 = vld [vmem:[%s5362_s25 + $0x18] sm:$0xf] }
  0x87   : > { %1225 = vst.msk [vmem:[#allocation2 + $0xc] sm:$0xf] %vm1221_vm5, %v1216_v3  ;;  %v1587_v17 = vadd.f32 %v5579_v7, %v5506_v0  ;;  %v1594_v19 = vadd.f32 %v1586_v1, %v5579_v7  ;;  %v3180_v21 = vrot.slane %v3178_v11, 5  ;;  %v3186_v24 = vrot.slane %v3184_v8, 5 }
  0x88   : > { %v4700_v23 = vld [vmem:[#allocation2 + $0x38] sm:$0xff]  ;;  %v2944_v25 = vrot.slane %v2942_v14, 4  ;;  %v2947_v5 = vrot.slane %v2945_v15, 5  ;;  %v2951_v6 = vshll.u32 %v2899_v12, 16  ;;  %v1438_v28 = vunpack.c.l.bf16 %v5575_v2  ;;  %v1454_v15 = vld [vmem:[%s5612_s11] sm:$0xf] }
  0x89   : > { %v1595_v18 = vadd.f32 %v1587_v17, %v5582_v13  ;;  %v1602_v26 = vpack.c.bf16 %v1594_v19, %v1594_v19  ;;  %v3181_v27 = vor.u32 %v3180_v21, %v3177_v20  ;;  %4534 = vmatmul.msk.bf16.vlgmr.msra.gmra.mxu2 %vm7670_vm6, %v4700_v23  ;;  %v1439_v30 = vunpack.c.l.bf16 %v1423_v16  ;;  %v1455_v21 = vld [vmem:[%s5612_s11 + $0x4] sm:$0x1] }
  0x8a   : > { %v2948_v0 = vor.u32 %v2947_v5, %v2944_v25  ;;  %v2953_v29 = vrot.slane %v2951_v6, 5  ;;  %v1440_v31 = vunpack.c.l.bf16 %v5586_v63  ;;  %v1441_v36 = vunpack.c.l.bf16 %v1425_v22  ;;  %v4584_v22 = vld [vmem:[%s5362_s25 + $0x10] sm:$0xf]  ;;  %v1456_v5 = vld [vmem:[%s5612_s11 + $0xc] sm:$0xf] }
  0x8b   : > { %v1603_v9 = vpack.c.bf16 %v1595_v18, %v1595_v18  ;;  %1610 = vst.msk [vmem:[#allocation2 + $0x50] sm:$0xf] %vm1221_vm5, %v1602_v26  ;;  %v3182_v33 = vrot.slane %v3181_v27, 4  ;;  %v1478_v37 = vrot.slane %v1438_v28, 1  ;;  %v1479_v42 = vrot.slane %v1439_v30, 1 }
  0x8c   : > { %v2949_v41 = vrot.slane %v2948_v0, 4  ;;  %v1481_v43 = vrot.slane %v1440_v31, 1  ;;  %v1518_v44 = vrot.slane %v1438_v28, 2  ;;  %v1482_v48 = vrot.slane %v1441_v36, 1  ;;  %v4554_v18 = vld [vmem:[%s5362_s25 + $0x98] sm:$0xf] }
  0x8d   : > { %1611 = vst.msk [vmem:[#allocation2 + $0x54] sm:$0xf] %vm1221_vm5, %v1603_v9  ;;  %v3187_v47 = vsel %vm5375_vm2, %v3182_v33, %v3186_v24  ;;  %v1519_v49 = vrot.slane %v1439_v30, 2  ;;  %v1521_v50 = vrot.slane %v1440_v31, 2  ;;  %v1480_v53 = vsel %vm1091_vm3, %v1478_v37, %v1479_v42 }
  0x8e   : > { %v4694_v51 = vld [vmem:[#allocation2 + $0x8] sm:$0xff]  ;;  %3286 = vrot.lane.b32.xlu2 %v3187_v47, %s5131_s22  ;;  %v2954_v52 = vsel %vm5375_vm2, %v2949_v41, %v2953_v29  ;;  %v1522_v54 = vrot.slane %v1441_v36, 2  ;;  %v1063_v55 = vunpack.c.l.bf16 %v5481_v39  ;;  %v1483_v10 = vsel %vm1091_vm3, %v1481_v43, %v1482_v48  ;;  %3340 = vrot.lane.b32.xlu0 %v4585_v62, %s5133_s27  ;;  %v1457_v29 = vld [vmem:[%s5612_s11 + $0x10] sm:$0x1]  ;;  %v4593_v36 = vld [vmem:[%s5362_s25 + $0x60] sm:$0xf] }
  0x8f   : > { %3029 = vrot.lane.b32.xlu1 %v2954_v52, %s5128_s30  ;;  %v1510_v56 = vadd.f32 %v1480_v53, %v1438_v28  ;;  %v1520_v58 = vsel %vm1132_vm4, %v1518_v44, %v1519_v49  ;;  %v1064_v59 = vunpack.c.l.bf16 %v1048_v38  ;;  %4528 = vmatmul.msk.bf16.gmra.mxu0 %vm7670_vm6, %v4694_v51  ;;  %v1511_v39 = vadd.f32 %v1483_v10, %v1440_v31 }
  0x90   : > { %v1523_v1 = vsel %vm1132_vm4, %v1521_v50, %v1522_v54  ;;  %v1065_v3 = vunpack.c.l.bf16 %v5486_v45  ;;  %v1066_v4 = vunpack.c.l.bf16 %v1050_v46  ;;  %v1110_v12 = vrot.slane %v1063_v55, 1  ;;  %v4572_v54 = vld [vmem:[%s5362_s25 + $0x94] sm:$0x1] }
  0x91   : > { %v1550_v11 = vadd.f32 %v1520_v58, %v1510_v56  ;;  %v1111_v8 = vrot.slane %v1064_v59, 1  ;;  %v1151_v14 = vrot.slane %v1063_v55, 2  ;;  %v1551_v16 = vadd.f32 %v1523_v1, %v1511_v39 }
  0x92   : > { %v1113_v17 = vrot.slane %v1065_v3, 1  ;;  %v1114_v19 = vrot.slane %v1066_v4, 1  ;;  %v1152_v20 = vrot.slane %v1064_v59, 2  ;;  %v1154_v45 = vrot.slane %v1065_v3, 2 }
  0x93   : > { %v1112_v23 = vsel %vm1091_vm3, %v1110_v12, %v1111_v8  ;;  %v1155_v24 = vrot.slane %v1066_v4, 2  ;;  %v1201_v25 = vadd.f32 %v5557_v34, %v5555_v32  ;;  %v1582_v26 = vadd.f32 %v1551_v16, %v1550_v11 }
  0x94   : > { %v4703_v6 = vld [vmem:[#allocation2 + $0x50] sm:$0xff]  ;;  %v1583_v27 = vadd.f32 %v5498_v60, %v1551_v16  ;;  %v1115_v28 = vsel %vm1091_vm3, %v1113_v17, %v1114_v19  ;;  %v1130_v0 = vadd.f32 %v1112_v23, %v1063_v55  ;;  %v1153_v31 = vsel %vm1132_vm4, %v1151_v14, %v1152_v20  ;;  %v2901_v14 = vld [vmem:[%s5362_s25 + $0x1c] sm:$0x1]  ;;  %v1067_v20 = vld [vmem:[%s5478_s12] sm:$0xf] }
  0x95   : > { %v1131_v30 = vadd.f32 %v1115_v28, %v1065_v3  ;;  %v1156_v9 = vsel %vm1132_vm4, %v1154_v45, %v1155_v24  ;;  %v1458_v33 = vunpack.c.l.bf16 %v1454_v15  ;;  %4537 = vmatmul.msk.bf16.gmra.mxu3 %vm7670_vm6, %v4703_v6  ;;  %v1590_v32 = vadd.f32 %v1582_v26, %v5498_v60  ;;  %v2900_v3 = vld [vmem:[%s5362_s25 + $0x18] sm:$0xf]  ;;  %v1068_v45 = vld [vmem:[%s5478_s12 + $0x4] sm:$0x1] }
  0x96   : > { %3338 = vrot.lane.b32.xlu2 %v4584_v22, %s5133_s27  ;;  %v1591_v37 = vadd.f32 %v1583_v27, %v5500_v61  ;;  %v5640_v38 = vadd.f32 %v1153_v31, %v1130_v0  ;;  %v1459_v41 = vunpack.c.l.bf16 %v1455_v21  ;;  %v1460_v43 = vunpack.c.l.bf16 %v1456_v5  ;;  %v4571_v61 = vld [vmem:[%s5362_s25 + $0x90] sm:$0xf]  ;;  %3393 = vrot.lane.b32.xlu0 %v4593_v36, %s5132_s24 }
  0x97   : > { %3081 = vrot.lane.b32.xlu1 %v4554_v18, %s5130_s19  ;;  %v5643_v42 = vadd.f32 %v1156_v9, %v1131_v30  ;;  %v1461_v44 = vunpack.c.l.bf16 %v1457_v29  ;;  %v1562_v46 = vrot.slane %v1458_v33, 1  ;;  %v1598_v47 = vpack.c.bf16 %v1590_v32, %v1590_v32  ;;  %v1069_v18 = vld [vmem:[%s5478_s12 + $0xc] sm:$0xf]  ;;  %v1070_v29 = vld [vmem:[%s5478_s12 + $0x10] sm:$0x1] }
  0x98   : > { %v1599_v48 = vpack.c.bf16 %v1591_v37, %v1591_v37  ;;  %v1202_v49 = vadd.f32 %v5640_v38, %v5557_v34  ;;  %v1209_v60 = vadd.f32 %v1201_v25, %v5640_v38  ;;  %v1563_v50 = vrot.slane %v1459_v41, 1  ;;  %v4545_v34 = vld [vmem:[%s5362_s25 + $0x50] sm:$0xf] }
  0x99   : > { %v1565_v51 = vrot.slane %v1460_v43, 1  ;;  %v1566_v52 = vrot.slane %v1461_v44, 1  ;;  %v1572_v53 = vrot.slane %v1458_v33, 2  ;;  %1606 = vst.msk [vmem:[#allocation2 + $0x40] sm:$0xf] %vm1221_vm5, %v1598_v47  ;;  %v1573_v56 = vrot.slane %v1459_v41, 2 }
  0x9a   : > { %v1210_v55 = vadd.f32 %v1202_v49, %v5643_v42  ;;  %v1217_v10 = vpack.c.bf16 %v1209_v60, %v1209_v60  ;;  %v1575_v58 = vrot.slane %v1460_v43, 2  ;;  %1607 = vst.msk [vmem:[#allocation2 + $0x44] sm:$0xf] %vm1221_vm5, %v1599_v48  ;;  %v1564_v59 = vsel %vm1091_vm3, %v1562_v46, %v1563_v50  ;;  %v5672_v48 = vld [vmem:[%s5421_s26 + $0x8] sm:$0x1] }
  0x9b   : > { %v1567_v62 = vsel %vm1091_vm3, %v1565_v51, %v1566_v52  ;;  %v1576_v39 = vrot.slane %v1461_v44, 2  ;;  %v1588_v1 = vadd.f32 %v5582_v13, %v5579_v7  ;;  %v1570_v11 = vadd.f32 %v1564_v59, %v1458_v33  ;;  %v5677_v51 = vld [vmem:[%s5421_s26 + $0x14] sm:$0x1] }
  0x9c   : > { %v1218_v4 = vpack.c.bf16 %v1210_v55, %v1210_v55  ;;  %1226 = vst.msk [vmem:[#allocation2 + $0x10] sm:$0xf] %vm1221_vm5, %v1217_v10  ;;  %v1571_v12 = vadd.f32 %v1567_v62, %v1460_v43  ;;  %v1574_v8 = vsel %vm1132_vm4, %v1572_v53, %v1573_v56  ;;  %v3203_v16 = vshrl.u32 %v4571_v61, 16  ;;  %v1618_v56 = vld [vmem:[%s5421_s26 + $0x1c] sm:$0xf] }
  0x9d   : > { %v1577_v15 = vsel %vm1132_vm4, %v1575_v58, %v1576_v39  ;;  %v3206_v17 = vshll.u32 %v4571_v61, 16  ;;  %v3212_v19 = vshll.u32 %v4572_v54, 16  ;;  %v1580_v7 = vadd.f32 %v1574_v8, %v1570_v11  ;;  %v1619_v39 = vld [vmem:[%s5421_s26 + $0x20] sm:$0x1]  ;;  %v1620_v11 = vld [vmem:[%s5421_s26 + $0x28] sm:$0xf] }
  0x9e   : > { %1227 = vst.msk [vmem:[#allocation2 + $0x14] sm:$0xf] %vm1221_vm5, %v1218_v4  ;;  %v1581_v21 = vadd.f32 %v1577_v15, %v1571_v12  ;;  %2865 = vrot.lane.b32.xlu2 %v4545_v34, %s5127_s28  ;;  %v2956_v22 = vshrl.u32 %v2900_v3, 16  ;;  %v2959_v23 = vshll.u32 %v2900_v3, 16  ;;  %v3205_v24 = vrot.slane %v3203_v16, 4 }
  0x9f   : > { %v3208_v25 = vrot.slane %v3206_v17, 5  ;;  %v3214_v5 = vrot.slane %v3212_v19, 5  ;;  %v2965_v6 = vshll.u32 %v2901_v14, 16  ;;  %v1589_v26 = vadd.f32 %v1580_v7, %v5582_v13  ;;  %v1621_v16 = vld [vmem:[%s5421_s26 + $0x2c] sm:$0x1] }
  0xa0   : > { %v1596_v27 = vadd.f32 %v1588_v1, %v1580_v7  ;;  %v2958_v28 = vrot.slane %v2956_v22, 4  ;;  %v2961_v0 = vrot.slane %v2959_v23, 5  ;;  %v1071_v9 = vunpack.c.l.bf16 %v1067_v20 }
  0xa1   : > { %v3209_v30 = vor.u32 %v3208_v25, %v3205_v24  ;;  %v2967_v31 = vrot.slane %v2965_v6, 5  ;;  %v1072_v33 = vunpack.c.l.bf16 %v1068_v45  ;;  %v4701_v36 = vld [vmem:[#allocation2 + $0x40] sm:$0xff]  ;;  %v1597_v32 = vadd.f32 %v1589_v26, %v1581_v21 }
  0xa2   : > { %v1604_v37 = vpack.c.bf16 %v1596_v27, %v1596_v27  ;;  %v2962_v41 = vor.u32 %v2961_v0, %v2958_v28  ;;  %v1073_v43 = vunpack.c.l.bf16 %v1069_v18  ;;  %v1074_v46 = vunpack.c.l.bf16 %v1070_v29  ;;  %4535 = vmatmul.msk.bf16.gmra.mxu2 %vm7670_vm6, %v4701_v36 }
  0xa3   : > { %v3210_v44 = vrot.slane %v3209_v30, 4  ;;  %v1177_v47 = vrot.slane %v1071_v9, 1  ;;  %v1178_v13 = vrot.slane %v1072_v33, 1  ;;  %v1605_v49 = vpack.c.bf16 %v1597_v32, %v1597_v32 }
  0xa4   : > { %1612 = vst.msk [vmem:[#allocation2 + $0x58] sm:$0xf] %vm1221_vm5, %v1604_v37  ;;  %v2963_v60 = vrot.slane %v2962_v41, 4  ;;  %v1180_v61 = vrot.slane %v1073_v43, 1  ;;  %v1187_v50 = vrot.slane %v1071_v9, 2  ;;  %v1181_v55 = vrot.slane %v1074_v46, 1 }
  0xa5   : > { %v4695_v52 = vld [vmem:[#allocation2 + $0x10] sm:$0xff]  ;;  %v3215_v53 = vsel %vm5375_vm2, %v3210_v44, %v3214_v5  ;;  %v1179_v54 = vsel %vm1091_vm3, %v1177_v47, %v1178_v13  ;;  %v1188_v10 = vrot.slane %v1072_v33, 2  ;;  %1613 = vst.msk [vmem:[#allocation2 + $0x5c] sm:$0xf] %vm1221_vm5, %v1605_v49  ;;  %v1190_v59 = vrot.slane %v1073_v43, 2 }
  0xa6   : > { %3290 = vrot.lane.b32.xlu1 %v3215_v53, %s5131_s22  ;;  %v2968_v58 = vsel %vm5375_vm2, %v2963_v60, %v2967_v31  ;;  %v1185_v34 = vadd.f32 %v1179_v54, %v1071_v9  ;;  %v1191_v62 = vrot.slane %v1074_v46, 2  ;;  %4529 = vmatmul.msk.bf16.gmra.mxu0 %vm7670_vm6, %v4695_v52  ;;  %v1182_v1 = vsel %vm1091_vm3, %v1180_v61, %v1181_v55  ;;  %v2902_v46 = vld [vmem:[%s5362_s25 + $0x20] sm:$0xf]  ;;  %v2903_v60 = vld [vmem:[%s5362_s25 + $0x24] sm:$0x1] }
  0xa7   : > { %3031 = vrot.lane.b32.xlu2 %v2968_v58, %s5128_s30  ;;  %v1189_v3 = vsel %vm1132_vm4, %v1187_v50, %v1188_v10  ;;  %v1203_v4 = vadd.f32 %v5643_v42, %v5640_v38  ;;  %v1630_v12 = vunpack.c.h.bf16 %v5575_v2  ;;  %v1186_v8 = vadd.f32 %v1182_v1, %v1073_v43  ;;  %v4586_v2 = vld [vmem:[%s5362_s25 + $0x20] sm:$0xf]  ;;  %v2904_v53 = vld [vmem:[%s5362_s25 + $0x28] sm:$0xf]  ;;  %v2905_v1 = vld [vmem:[%s5362_s25 + $0x2c] sm:$0x1] }
  0xa8   : > { %v1192_v14 = vsel %vm1132_vm4, %v1190_v59, %v1191_v62  ;;  %v1195_v15 = vadd.f32 %v1189_v3, %v1185_v34  ;;  %v1631_v17 = vunpack.c.l.bf16 %v5672_v48  ;;  %v1632_v19 = vunpack.c.h.bf16 %v5586_v63  ;;  %v4561_v63 = vld [vmem:[%s5362_s25 + $0xd0] sm:$0xf]  ;;  %v4547_v59 = vld [vmem:[%s5362_s25 + $0x60] sm:$0xf] }
  0xa9   : > { %v1633_v20 = vunpack.c.l.bf16 %v5677_v51  ;;  %v1634_v7 = vunpack.c.l.bf16 %v1618_v56  ;;  %v1635_v21 = vunpack.c.l.bf16 %v1619_v39  ;;  %v1196_v22 = vadd.f32 %v1192_v14, %v1186_v8  ;;  %v4573_v8 = vld [vmem:[%s5362_s25 + $0x98] sm:$0xf] }
  0xaa   : > { %v1204_v38 = vadd.f32 %v1195_v15, %v5643_v42  ;;  %v1211_v23 = vadd.f32 %v1203_v4, %v1195_v15  ;;  %v1636_v45 = vunpack.c.l.bf16 %v1620_v11  ;;  %v1637_v24 = vunpack.c.l.bf16 %v1621_v16 }
  0xab   : > { %v1670_v25 = vrot.slane %v1630_v12, 1  ;;  %v1671_v5 = vrot.slane %v1631_v17, 1  ;;  %v1673_v6 = vrot.slane %v1632_v19, 1  ;;  %v1674_v27 = vrot.slane %v1633_v20, 1 }
  0xac   : > { %v1212_v18 = vadd.f32 %v1204_v38, %v1196_v22  ;;  %v1219_v26 = vpack.c.bf16 %v1211_v23, %v1211_v23  ;;  %v1676_v28 = vrot.slane %v1634_v7, 1  ;;  %v4704_v0 = vld [vmem:[#allocation2 + $0x58] sm:$0xff]  ;;  %v1677_v30 = vrot.slane %v1635_v21, 1  ;;  %v1231_v23 = vld [vmem:[%s5398_s20 + $0x8] sm:$0x1] }
  0xad   : > { %v1672_v29 = vsel %vm1091_vm3, %v1670_v25, %v1671_v5  ;;  %v1679_v31 = vrot.slane %v1636_v45, 1  ;;  %v1680_v9 = vrot.slane %v1637_v24, 1  ;;  %v1675_v33 = vsel %vm1091_vm3, %v1673_v6, %v1674_v27  ;;  %4538 = vmatmul.msk.bf16.gmra.mxu3 %vm7670_vm6, %v4704_v0  ;;  %v1234_v0 = vld [vmem:[%s5398_s20 + $0x1c] sm:$0xf] }
  0xae   : > { %3342 = vrot.lane.b32.xlu1 %v4586_v2, %s5133_s27  ;;  %v1220_v42 = vpack.c.bf16 %v1212_v18, %v1212_v18  ;;  %1228 = vst.msk [vmem:[#allocation2 + $0x18] sm:$0xf] %vm1221_vm5, %v1219_v26  ;;  %v1702_v36 = vadd.f32 %v1672_v29, %v1630_v12  ;;  %v1710_v32 = vrot.slane %v1630_v12, 2  ;;  %v1678_v37 = vsel %vm1091_vm3, %v1676_v28, %v1677_v30  ;;  %v1233_v18 = vld [vmem:[%s5398_s20 + $0x14] sm:$0x1] }
  0xaf   : > { %v1681_v41 = vsel %vm1091_vm3, %v1679_v31, %v1680_v9  ;;  %v1703_v43 = vadd.f32 %v1675_v33, %v1632_v19  ;;  %v1711_v44 = vrot.slane %v1631_v17, 2  ;;  %3129 = vrot.lane.b32.xlu2 %v4561_v63, %s5129_s21  ;;  %v1704_v47 = vadd.f32 %v1678_v37, %v1634_v7  ;;  %v1236_v37 = vld [vmem:[%s5398_s20 + $0x28] sm:$0xf] }
  0xb0   : > { %1229 = vst.msk [vmem:[#allocation2 + $0x1c] sm:$0xf] %vm1221_vm5, %v1220_v42  ;;  %v1705_v13 = vadd.f32 %v1681_v41, %v1636_v45  ;;  %v1713_v48 = vrot.slane %v1632_v19, 2  ;;  %v1714_v49 = vrot.slane %v1633_v20, 2  ;;  %v1716_v50 = vrot.slane %v1634_v7, 2 }
  0xb1   : > { %v1712_v61 = vsel %vm1132_vm4, %v1710_v32, %v1711_v44  ;;  %v1717_v51 = vrot.slane %v1635_v21, 2  ;;  %v1719_v52 = vrot.slane %v1636_v45, 2  ;;  %v1720_v55 = vrot.slane %v1637_v24, 2  ;;  %v4574_v19 = vld [vmem:[%s5362_s25 + $0x9c] sm:$0x1] }
  0xb2   : > { %v1715_v54 = vsel %vm1132_vm4, %v1713_v48, %v1714_v49  ;;  %v1742_v10 = vadd.f32 %v1712_v61, %v1702_v36  ;;  %v2970_v56 = vshrl.u32 %v2902_v46, 16  ;;  %v2973_v62 = vshll.u32 %v2902_v46, 16  ;;  %v1230_v20 = vld [vmem:[%s5398_s20 + $0x4] sm:$0xf]  ;;  %v1232_v45 = vld [vmem:[%s5398_s20 + $0x10] sm:$0xf] }
  0xb3   : > { %v1718_v58 = vsel %vm1132_vm4, %v1716_v50, %v1717_v51  ;;  %v1743_v34 = vadd.f32 %v1715_v54, %v1703_v43  ;;  %v2979_v39 = vshll.u32 %v2903_v60, 16  ;;  %v1721_v3 = vsel %vm1132_vm4, %v1719_v52, %v1720_v55  ;;  %v1235_v42 = vld [vmem:[%s5398_s20 + $0x20] sm:$0x1]  ;;  %v1237_v41 = vld [vmem:[%s5398_s20 + $0x2c] sm:$0x1] }
  0xb4   : > { %v5722_v4 = vadd.f32 %v1718_v58, %v1704_v47  ;;  %v2972_v11 = vrot.slane %v2970_v56, 4  ;;  %v2984_v12 = vshrl.u32 %v2904_v53, 16  ;;  %v5725_v14 = vadd.f32 %v1721_v3, %v1705_v13 }
  0xb5   : > { %v1774_v15 = vadd.f32 %v1743_v34, %v1742_v10  ;;  %v2975_v16 = vrot.slane %v2973_v62, 5  ;;  %v2981_v17 = vrot.slane %v2979_v39, 5  ;;  %v2987_v22 = vshll.u32 %v2904_v53, 16 }
  0xb6   : > { %v1775_v7 = vadd.f32 %v5722_v4, %v1743_v34  ;;  %2869 = vrot.lane.b32.xlu1 %v4547_v59, %s5127_s28  ;;  %v2986_v21 = vrot.slane %v2984_v12, 4  ;;  %v2993_v38 = vshll.u32 %v2905_v1, 16  ;;  %v3217_v5 = vshrl.u32 %v4573_v8, 16 }
  0xb7   : > { %v4696_v2 = vld [vmem:[#allocation2 + $0x18] sm:$0xff]  ;;  %v1782_v24 = vadd.f32 %v1774_v15, %v5722_v4  ;;  %v2976_v25 = vor.u32 %v2975_v16, %v2972_v11  ;;  %v3220_v6 = vshll.u32 %v4573_v8, 16  ;;  %v2989_v27 = vrot.slane %v2987_v22, 5 }
  0xb8   : > { %v1783_v26 = vadd.f32 %v1775_v7, %v5725_v14  ;;  %v2995_v28 = vrot.slane %v2993_v38, 5  ;;  %v3226_v63 = vshll.u32 %v4574_v19, 16  ;;  %4530 = vmatmul.msk.bf16.gmra.mxu0 %vm7670_vm6, %v4696_v2  ;;  %v3219_v31 = vrot.slane %v3217_v5, 4  ;;  %v4556_v19 = vld [vmem:[%s5362_s25 + $0xa8] sm:$0xf] }
  0xb9   : > { %v1790_v29 = vpack.c.bf16 %v1782_v24, %v1782_v24  ;;  %v2977_v30 = vrot.slane %v2976_v25, 4  ;;  %v3222_v9 = vrot.slane %v3220_v6, 5  ;;  %v2990_v36 = vor.u32 %v2989_v27, %v2986_v21  ;;  %v1623_v38 = vld [vmem:[%s5421_s26 + $0x38] sm:$0x1]  ;;  %v1625_v6 = vld [vmem:[%s5421_s26 + $0x44] sm:$0x1] }
  0xba   : > { %v1791_v33 = vpack.c.bf16 %v1783_v26, %v1783_v26  ;;  %v3228_v32 = vrot.slane %v3226_v63, 5  ;;  %v1246_v43 = vunpack.c.l.bf16 %v1230_v20  ;;  %v1247_v47 = vunpack.c.l.bf16 %v1231_v23  ;;  %v1624_v23 = vld [vmem:[%s5421_s26 + $0x40] sm:$0xf] }
  0xbb   : > { %1798 = vst.msk [vmem:[#allocation2 + $0x60] sm:$0xf] %vm1221_vm5, %v1790_v29  ;;  %v2982_v44 = vsel %vm5375_vm2, %v2977_v30, %v2981_v17  ;;  %v3223_v46 = vor.u32 %v3222_v9, %v3219_v31  ;;  %v1248_v13 = vunpack.c.l.bf16 %v1232_v45  ;;  %v2991_v48 = vrot.slane %v2990_v36, 4  ;;  %v1622_v17 = vld [vmem:[%s5421_s26 + $0x34] sm:$0xf] }
  0xbc   : > { %1799 = vst.msk [vmem:[#allocation2 + $0x64] sm:$0xf] %vm1221_vm5, %v1791_v33  ;;  %3033 = vrot.lane.b32.xlu0 %v2982_v44, %s5128_s30  ;;  %v1249_v49 = vunpack.c.l.bf16 %v1233_v18  ;;  %v1250_v60 = vunpack.c.l.bf16 %v1234_v0  ;;  %v1251_v61 = vunpack.c.l.bf16 %v1235_v42  ;;  %v1252_v51 = vunpack.c.l.bf16 %v1236_v37  ;;  %v4563_v63 = vld [vmem:[%s5362_s25 + $0xe0] sm:$0xf]  ;;  %v4592_v9 = vld [vmem:[%s5362_s25 + $0x58] sm:$0xf] }
  0xbd   : > { %v3224_v50 = vrot.slane %v3223_v46, 4  ;;  %v1253_v52 = vunpack.c.l.bf16 %v1237_v41  ;;  %v1286_v53 = vrot.slane %v1246_v43, 1  ;;  %v2996_v54 = vsel %vm5375_vm2, %v2991_v48, %v2995_v28 }
  0xbe   : > { %v1287_v55 = vrot.slane %v1247_v47, 1  ;;  %v1289_v10 = vrot.slane %v1248_v13, 1  ;;  %v1290_v56 = vrot.slane %v1249_v49, 1  ;;  %3035 = vrot.lane.b32.xlu1 %v2996_v54, %s5128_s30  ;;  %v1292_v34 = vrot.slane %v1250_v60, 1 }
  0xbf   : > { %v3229_v58 = vsel %vm5375_vm2, %v3224_v50, %v3228_v32  ;;  %v1293_v59 = vrot.slane %v1251_v61, 1  ;;  %v1295_v62 = vrot.slane %v1252_v51, 1  ;;  %v1296_v3 = vrot.slane %v1253_v52, 1 }
  0xc0   : > { %3292 = vrot.lane.b32.xlu2 %v3229_v58, %s5131_s22  ;;  %v1288_v39 = vsel %vm1091_vm3, %v1286_v53, %v1287_v55  ;;  %v1291_v1 = vsel %vm1091_vm3, %v1289_v10, %v1290_v56  ;;  %v1326_v11 = vrot.slane %v1246_v43, 2  ;;  %v1327_v16 = vrot.slane %v1247_v47, 2  ;;  %v4576_v10 = vld [vmem:[%s5362_s25 + $0xa4] sm:$0x1]  ;;  %v4577_v56 = vld [vmem:[%s5362_s25 + $0xa8] sm:$0xf] }
  0xc1   : > { %v1294_v12 = vsel %vm1091_vm3, %v1292_v34, %v1293_v59  ;;  %v1318_v8 = vadd.f32 %v1288_v39, %v1246_v43  ;;  %v1319_v15 = vadd.f32 %v1291_v1, %v1248_v13  ;;  %v1297_v20 = vsel %vm1091_vm3, %v1295_v62, %v1296_v3  ;;  %v1238_v39 = vld [vmem:[%s5398_s20 + $0x34] sm:$0xf] }
  0xc2   : > { %v1320_v7 = vadd.f32 %v1294_v12, %v1250_v60  ;;  %v1329_v21 = vrot.slane %v1248_v13, 2  ;;  %v1330_v22 = vrot.slane %v1249_v49, 2  ;;  %v1321_v2 = vadd.f32 %v1297_v20, %v1252_v51 }
  0xc3   : > { %v4705_v45 = vld [vmem:[#allocation2 + $0x60] sm:$0xff]  ;;  %v1328_v24 = vsel %vm1132_vm4, %v1326_v11, %v1327_v16  ;;  %v1332_v25 = vrot.slane %v1250_v60, 2  ;;  %v1333_v5 = vrot.slane %v1251_v61, 2  ;;  %v1335_v26 = vrot.slane %v1252_v51, 2  ;;  %v1239_v16 = vld [vmem:[%s5398_s20 + $0x38] sm:$0x1] }
  0xc4   : > { %v1331_v18 = vsel %vm1132_vm4, %v1329_v21, %v1330_v22  ;;  %v1336_v27 = vrot.slane %v1253_v52, 2  ;;  %v1358_v28 = vadd.f32 %v1328_v24, %v1318_v8  ;;  %3085 = vrot.lane.b32.xlu0 %v4556_v19, %s5130_s19  ;;  %4539 = vmatmul.msk.bf16.gmra.mxu3 %vm7670_vm6, %v4705_v45  ;;  %v1638_v30 = vunpack.c.l.bf16 %v1622_v17  ;;  %v4575_v51 = vld [vmem:[%s5362_s25 + $0xa0] sm:$0xf]  ;;  %v4578_v8 = vld [vmem:[%s5362_s25 + $0xac] sm:$0x1] }
  0xc5   : > { %v1334_v0 = vsel %vm1132_vm4, %v1332_v25, %v1333_v5  ;;  %v1359_v29 = vadd.f32 %v1331_v18, %v1319_v15  ;;  %v1639_v31 = vunpack.c.l.bf16 %v1623_v38  ;;  %v1640_v36 = vunpack.c.l.bf16 %v1624_v23  ;;  %v4548_v15 = vld [vmem:[%s5362_s25 + $0x68] sm:$0xf]  ;;  %v1240_v23 = vld [vmem:[%s5398_s20 + $0x40] sm:$0xf]  ;;  %v1241_v5 = vld [vmem:[%s5398_s20 + $0x44] sm:$0x1] }
  0xc6   : > { %v1337_v42 = vsel %vm1132_vm4, %v1335_v26, %v1336_v27  ;;  %v5769_v33 = vadd.f32 %v1334_v0, %v1320_v7  ;;  %v1641_v32 = vunpack.c.l.bf16 %v1625_v6  ;;  %v1682_v43 = vrot.slane %v1638_v30, 1  ;;  %3133 = vrot.lane.b32.xlu1 %v4563_v63, %s5129_s21  ;;  %v5802_v6 = vpop.permute.xlu0 %2861 }
  0xc7   : > { %v5771_v37 = vadd.f32 %v1337_v42, %v1321_v2  ;;  %v1390_v41 = vadd.f32 %v1359_v29, %v1358_v28  ;;  %v1683_v44 = vrot.slane %v1639_v31, 1  ;;  %v1685_v47 = vrot.slane %v1640_v36, 1 }
  0xc8   : > { %v1391_v46 = vadd.f32 %v5769_v33, %v1359_v29  ;;  %v1686_v13 = vrot.slane %v1641_v32, 1  ;;  %v1722_v48 = vrot.slane %v1638_v30, 2  ;;  %3391 = vrot.lane.b32.xlu2 %v4592_v9, %s5132_s24  ;;  %v1723_v61 = vrot.slane %v1639_v31, 2 }
  0xc9   : > { %v1398_v49 = vadd.f32 %v1390_v41, %v5769_v33  ;;  %v1684_v60 = vsel %vm1091_vm3, %v1682_v43, %v1683_v44  ;;  %v1725_v50 = vrot.slane %v1640_v36, 2  ;;  %v1726_v55 = vrot.slane %v1641_v32, 2  ;;  %v1626_v32 = vld [vmem:[%s5421_s26 + $0x4c] sm:$0xf]  ;;  %v1627_v41 = vld [vmem:[%s5421_s26 + $0x50] sm:$0x1] }
  0xca   : > { %v1399_v52 = vadd.f32 %v1391_v46, %v5771_v37  ;;  %v1687_v53 = vsel %vm1091_vm3, %v1685_v47, %v1686_v13  ;;  %v1706_v54 = vadd.f32 %v1684_v60, %v1638_v30  ;;  %v1724_v59 = vsel %vm1132_vm4, %v1722_v48, %v1723_v61  ;;  %v2828_v30 = vld [vmem:[%s5362_s25] sm:$0xf]  ;;  %v1628_v13 = vld [vmem:[%s5421_s26 + $0x58] sm:$0xf]  ;;  %v1629_v48 = vld [vmem:[%s5421_s26 + $0x5c] sm:$0x1] }
  0xcb   : > { %v1406_v58 = vpack.c.bf16 %v1398_v49, %v1398_v49  ;;  %v1707_v34 = vadd.f32 %v1687_v53, %v1640_v36  ;;  %v1776_v62 = vadd.f32 %v5725_v14, %v5722_v4  ;;  %v1727_v3 = vsel %vm1132_vm4, %v1725_v50, %v1726_v55  ;;  %2836 = vst.msk [vmem:[#allocation3] sm:$0xf] %vm1221_vm5, %v2828_v30  ;;  %v1647_v30 = vld [vmem:[%s5612_s11 + $0x8] sm:$0x1]  ;;  %s4452_s26 = sshll.u32 %s832_s18, 5 }
  0xcc   : > { %v1407_v1 = vpack.c.bf16 %v1399_v52, %v1399_v52  ;;  %v5788_v11 = vadd.f32 %v1724_v59, %v1706_v54  ;;  %v3231_v12 = vshrl.u32 %v4575_v51, 16  ;;  %v3234_v19 = vshll.u32 %v4575_v51, 16  ;;  %2886 = vst.msk [vmem:[#allocation3] sm:$0xf] %vm2885_vm7, %v5802_v6  ;;  %s5929_s12 = scalar_lea.vmem [#allocation5], %s4452_s26 }
  0xcd   : > { %1414 = vst.msk [vmem:[#allocation2 + $0x20] sm:$0xf] %vm1221_vm5, %v1406_v58  ;;  %v5794_v17 = vadd.f32 %v1727_v3, %v1707_v34  ;;  %v3240_v20 = vshll.u32 %v4576_v10, 16  ;;  %v3245_v7 = vshrl.u32 %v4577_v56, 16  ;;  %v3248_v38 = vshll.u32 %v4577_v56, 16  ;;  %v5820_v56 = vpop.permute.xlu2 %3075  ;;  %v5822_v58 = vpop.permute.xlu1 %3025 }
  0xce   : > { %1415 = vst.msk [vmem:[#allocation2 + $0x24] sm:$0xf] %vm1221_vm5, %v1407_v1  ;;  %v1777_v4 = vadd.f32 %v5788_v11, %v5725_v14  ;;  %v1784_v21 = vadd.f32 %v1776_v62, %v5788_v11  ;;  %v3233_v22 = vrot.slane %v3231_v12, 4  ;;  %v3236_v45 = vrot.slane %v3234_v19, 5  ;;  %v4555_v10 = vld [vmem:[%s5362_s25 + $0xa0] sm:$0xf] }
  0xcf   : > { %v3242_v2 = vrot.slane %v3240_v20, 5  ;;  %v3247_v24 = vrot.slane %v3245_v7, 4  ;;  %v3254_v25 = vshll.u32 %v4578_v8, 16  ;;  %v3250_v27 = vrot.slane %v3248_v38, 5  ;;  %v2829_v34 = vld [vmem:[%s5362_s25 + $0x8] sm:$0xf] }
  0xd0   : > { %v1785_v18 = vadd.f32 %v1777_v4, %v5794_v17  ;;  %v1792_v26 = vpack.c.bf16 %v1784_v21, %v1784_v21  ;;  %2871 = vrot.lane.b32.xlu2 %v4548_v15, %s5127_s28  ;;  %v1254_v14 = vunpack.c.l.bf16 %v1238_v39  ;;  %v3237_v28 = vor.u32 %v3236_v45, %v3233_v22  ;;  %v5833_v15 = vpop.permute.xlu0 %2863  ;;  %2837 = vst.msk [vmem:[#allocation3 + $0x8] sm:$0xf] %vm1221_vm5, %v2829_v34 }
  0xd1   : > { %v3256_v63 = vrot.slane %v3254_v25, 5  ;;  %v1255_v0 = vunpack.c.l.bf16 %v1239_v16  ;;  %v1256_v29 = vunpack.c.l.bf16 %v1240_v23  ;;  %v3251_v9 = vor.u32 %v3250_v27, %v3247_v24  ;;  %v4588_v27 = vld [vmem:[%s5362_s25 + $0x30] sm:$0xf]  ;;  %2887 = vst.msk [vmem:[#allocation3 + $0x8] sm:$0xf] %vm2885_vm7, %v5833_v15 }
  0xd2   : > { %v1793_v31 = vpack.c.bf16 %v1785_v18, %v1785_v18  ;;  %1800 = vst.msk [vmem:[#allocation2 + $0x68] sm:$0xf] %vm1221_vm5, %v1792_v26  ;;  %v1257_v42 = vunpack.c.l.bf16 %v1241_v5  ;;  %v1298_v36 = vrot.slane %v1254_v14, 1  ;;  %v3238_v43 = vrot.slane %v3237_v28, 4 }
  0xd3   : > { %v1299_v44 = vrot.slane %v1255_v0, 1  ;;  %v1301_v46 = vrot.slane %v1256_v29, 1  ;;  %v1338_v47 = vrot.slane %v1254_v14, 2  ;;  %v3252_v49 = vrot.slane %v3251_v9, 4 }
  0xd4   : > { %1801 = vst.msk [vmem:[#allocation2 + $0x6c] sm:$0xf] %vm1221_vm5, %v1793_v31  ;;  %v1302_v60 = vrot.slane %v1257_v42, 1  ;;  %v1339_v61 = vrot.slane %v1255_v0, 2  ;;  %v1341_v50 = vrot.slane %v1256_v29, 2  ;;  %v3243_v52 = vsel %vm5375_vm2, %v3238_v43, %v3242_v2 }
  0xd5   : > { %v4697_v51 = vld [vmem:[#allocation2 + $0x20] sm:$0xff]  ;;  %v1300_v53 = vsel %vm1091_vm3, %v1298_v36, %v1299_v44  ;;  %v1342_v54 = vrot.slane %v1257_v42, 2  ;;  %v1392_v55 = vadd.f32 %v5771_v37, %v5769_v33  ;;  %3294 = vrot.lane.b32.xlu0 %v3243_v52, %s5131_s22  ;;  %v3257_v59 = vsel %vm5375_vm2, %v3252_v49, %v3256_v63  ;;  %v4564_v36 = vld [vmem:[%s5362_s25 + $0xe8] sm:$0xf] }
  0xd6   : > { %v1303_v62 = vsel %vm1091_vm3, %v1301_v46, %v1302_v60  ;;  %v1322_v39 = vadd.f32 %v1300_v53, %v1254_v14  ;;  %v1340_v1 = vsel %vm1132_vm4, %v1338_v47, %v1339_v61  ;;  %4531 = vmatmul.msk.bf16.gmra.mxu0 %vm7670_vm6, %v4697_v51  ;;  %3296 = vrot.lane.b32.xlu1 %v3257_v59, %s5131_s22  ;;  %v1642_v12 = vunpack.c.l.bf16 %v1626_v32  ;;  %v1648_v32 = vld [vmem:[%s5612_s11 + $0x10] sm:$0xf]  ;;  %v1649_v46 = vld [vmem:[%s5612_s11 + $0x14] sm:$0x1]  ;;  %v5860_v60 = vpop.permute.xlu2 %3077  ;;  %v3028_v61 = vpop.permute.xlu1 %3027 }
  0xd7   : > { %v1323_v33 = vadd.f32 %v1303_v62, %v1256_v29  ;;  %v1343_v3 = vsel %vm1132_vm4, %v1341_v50, %v1342_v54  ;;  %v1643_v8 = vunpack.c.l.bf16 %v1627_v41  ;;  %v1644_v19 = vunpack.c.l.bf16 %v1628_v13  ;;  %v4594_v29 = vld [vmem:[%s5362_s25 + $0x68] sm:$0xf]  ;;  %v4725_v54 = vld [vmem:[%s7665_s8 + $0x38] sm:$0xff] }
  0xd8   : > { %v1362_v16 = vadd.f32 %v1340_v1, %v1322_v39  ;;  %v1645_v20 = vunpack.c.l.bf16 %v1629_v48  ;;  %v1778_v7 = vadd.f32 %v5794_v17, %v5788_v11  ;;  %3083 = vrot.lane.b32.xlu2 %v4555_v10, %s5130_s19  ;;  %v1688_v21 = vrot.slane %v1642_v12, 1  ;;  %v3126_v6 = vpop.permute.xlu0 %3125  ;;  %v4550_v39 = vld [vmem:[%s5362_s25 + $0x78] sm:$0xf]  ;;  %3696 = vmatpush.bf16.msra.mxu1 %v4725_v54 }
  0xd9   : > { %v1363_v4 = vadd.f32 %v1343_v3, %v1323_v33  ;;  %v1689_v22 = vrot.slane %v1643_v8, 1  ;;  %v1728_v38 = vrot.slane %v1642_v12, 2  ;;  %v1691_v2 = vrot.slane %v1644_v19, 1  ;;  %v2908_v3 = vld [vmem:[%s5362_s25 + $0x38] sm:$0xf] }
  0xda   : > { %v1393_v23 = vadd.f32 %v1362_v16, %v5771_v37  ;;  %v1400_v45 = vadd.f32 %v1392_v55, %v1362_v16  ;;  %v1692_v24 = vrot.slane %v1645_v20, 1  ;;  %v1729_v18 = vrot.slane %v1643_v8, 2  ;;  %v1646_v37 = vld [vmem:[%s5612_s11 + $0x4] sm:$0xf]  ;;  %v4549_v55 = vld [vmem:[%s5362_s25 + $0x70] sm:$0xf] }
  0xdb   : > { %v4706_v25 = vld [vmem:[#allocation2 + $0x68] sm:$0xff]  ;;  %v1690_v5 = vsel %vm1091_vm3, %v1688_v21, %v1689_v22  ;;  %v1731_v11 = vrot.slane %v1644_v19, 2  ;;  %v1732_v26 = vrot.slane %v1645_v20, 2  ;;  %vm7672_vm8 = vcmask 388352  }
  0xdc   : > { %v1401_v14 = vadd.f32 %v1393_v23, %v1363_v4  ;;  %v1408_v28 = vpack.c.bf16 %v1400_v45, %v1400_v45  ;;  %v1693_v63 = vsel %vm1091_vm3, %v1691_v2, %v1692_v24  ;;  %v1708_v0 = vadd.f32 %v1690_v5, %v1642_v12  ;;  %4540 = vmatmul.msk.bf16.gmra.mxu3 %vm7670_vm6, %v4706_v25  ;;  %v4587_v21 = vld [vmem:[%s5362_s25 + $0x28] sm:$0xf] }
  0xdd   : > { %v1709_v31 = vadd.f32 %v1693_v63, %v1644_v19  ;;  %v1730_v9 = vsel %vm1132_vm4, %v1728_v38, %v1729_v18  ;;  %v1733_v42 = vsel %vm1132_vm4, %v1731_v11, %v1732_v26  ;;  %3346 = vrot.lane.b32.xlu0 %v4588_v27, %s5133_s27  ;;  %v1394_v44 = vadd.f32 %v1363_v4, %v1362_v16  ;;  %v2909_v19 = vld [vmem:[%s5362_s25 + $0x3c] sm:$0x1]  ;;  %v4723_v2 = vld [vmem:[%s7665_s8 + $0x28] sm:$0xff]  ;;  %v4581_v11 = vld [vmem:[%s5362_s25 + $0xb8] sm:$0xf] }
  0xde   : > { %v1409_v41 = vpack.c.bf16 %v1401_v14, %v1401_v14  ;;  %1416 = vst.msk [vmem:[#allocation2 + $0x28] sm:$0xf] %vm1221_vm5, %v1408_v28  ;;  %v1748_v43 = vadd.f32 %v1730_v9, %v1708_v0  ;;  %3395 = vrot.lane.b32.xlu1 %v4594_v29, %s5132_s24  ;;  %v1395_v13 = vadd.f32 %v5527_v35, %v1363_v4  ;;  %v1650_v48 = vunpack.c.l.bf16 %v1646_v37  ;;  %v3128_v63 = vpop.permute.xlu1 %3127 }
  0xdf   : > { %v5854_v47 = vadd.f32 %v1733_v42, %v1709_v31  ;;  %v1651_v49 = vunpack.c.l.bf16 %v1647_v30  ;;  %v1402_v52 = vadd.f32 %v1394_v44, %v5527_v35  ;;  %v1652_v53 = vunpack.c.l.bf16 %v1648_v32  ;;  %3050 = vst.msk [vmem:[#allocation3] sm:$0xf] %vm7672_vm8, %v5822_v58  ;;  %v4557_v32 = vld [vmem:[%s5362_s25 + $0xb0] sm:$0xf]  ;;  %v4722_v44 = vld [vmem:[%s7665_s8 + $0x20] sm:$0xff] }
  0xe0   : > { %1417 = vst.msk [vmem:[#allocation2 + $0x2c] sm:$0xf] %vm1221_vm5, %v1409_v41  ;;  %v1779_v50 = vadd.f32 %v1748_v43, %v5794_v17  ;;  %v1786_v51 = vadd.f32 %v1778_v7, %v1748_v43  ;;  %3135 = vrot.lane.b32.xlu2 %v4564_v36, %s5129_s21  ;;  %v1403_v10 = vadd.f32 %v1395_v13, %v5531_v40  ;;  %v1653_v34 = vunpack.c.l.bf16 %v1649_v46  ;;  %v4724_v40 = vld [vmem:[%s7665_s8 + $0x30] sm:$0xff]  ;;  %v3289_v30 = vpop.permute.xlu0 %3288 }
  0xe1   : > { %v1754_v17 = vrot.slane %v1650_v48, 1  ;;  %v1755_v59 = vrot.slane %v1651_v49, 1  ;;  %v1410_v1 = vpack.c.bf16 %v1402_v52, %v1402_v52  ;;  %v1757_v33 = vrot.slane %v1652_v53, 1  ;;  %3051 = vst.msk [vmem:[#allocation3 + $0x8] sm:$0xf] %vm7672_vm8, %v3028_v61  ;;  %3697 = vmatpush.bf16.msra.mxu1 %v4724_v40 }
  0xe2   : > { %v1787_v62 = vadd.f32 %v1779_v50, %v5854_v47  ;;  %v1794_v35 = vpack.c.bf16 %v1786_v51, %v1786_v51  ;;  %v1411_v58 = vpack.c.bf16 %v1403_v10, %v1403_v10  ;;  %v1758_v8 = vrot.slane %v1653_v34, 1  ;;  %v2906_v36 = vld [vmem:[%s5362_s25 + $0x30] sm:$0xf] }
  0xe3   : > { %v1756_v12 = vsel %vm1091_vm3, %v1754_v17, %v1755_v59  ;;  %v1764_v16 = vrot.slane %v1650_v48, 2  ;;  %v1765_v7 = vrot.slane %v1651_v49, 2  ;;  %v1767_v4 = vrot.slane %v1652_v53, 2  ;;  %1418 = vst.msk [vmem:[#allocation2 + $0x30] sm:$0xf] %vm1221_vm5, %v1410_v1 }
  0xe4   : > { %v1795_v20 = vpack.c.bf16 %v1787_v62, %v1787_v62  ;;  %1802 = vst.msk [vmem:[#allocation2 + $0x70] sm:$0xf] %vm1221_vm5, %v1794_v35  ;;  %v1762_v15 = vadd.f32 %v1756_v12, %v1650_v48  ;;  %v1759_v22 = vsel %vm1091_vm3, %v1757_v33, %v1758_v8  ;;  %v1768_v38 = vrot.slane %v1653_v34, 2  ;;  %v4595_v13 = vld [vmem:[%s5362_s25 + $0x70] sm:$0xf]  ;;  %v4721_v34 = vld [vmem:[%s7665_s8 + $0x18] sm:$0xff] }
  0xe5   : > { %v1780_v23 = vadd.f32 %v5854_v47, %v1748_v43  ;;  %v3012_v45 = vshrl.u32 %v2908_v3, 16  ;;  %2873 = vrot.lane.b32.xlu0 %v4549_v55, %s5127_s28  ;;  %v1763_v24 = vadd.f32 %v1759_v22, %v1652_v53  ;;  %v1766_v25 = vsel %vm1132_vm4, %v1764_v16, %v1765_v7  ;;  %1419 = vst.msk [vmem:[#allocation2 + $0x34] sm:$0xf] %vm1221_vm5, %v1411_v58  ;;  %v4582_v48 = vld [vmem:[%s5362_s25 + $0xbc] sm:$0x1] }
  0xe6   : > { %1803 = vst.msk [vmem:[#allocation2 + $0x74] sm:$0xf] %vm1221_vm5, %v1795_v20  ;;  %v3015_v5 = vshll.u32 %v2908_v3, 16  ;;  %v3021_v18 = vshll.u32 %v2909_v19, 16  ;;  %2875 = vrot.lane.b32.xlu1 %v4550_v39, %s5127_s28  ;;  %v1769_v27 = vsel %vm1132_vm4, %v1767_v4, %v1768_v38  ;;  %v1772_v14 = vadd.f32 %v1766_v25, %v1762_v15  ;;  %3698 = vmatpush.bf16.msra.mxu1 %v4723_v2  ;;  %v2907_v49 = vld [vmem:[%s5362_s25 + $0x34] sm:$0x1]  ;;  %v3337_v59 = vpop.permute.xlu1 %3336 }
  0xe7   : > { %v4698_v26 = vld [vmem:[#allocation2 + $0x28] sm:$0xff]  ;;  %v3014_v28 = vrot.slane %v3012_v45, 4  ;;  %vm7675_vm9 = vcmask 519552   ;;  %v1773_v0 = vadd.f32 %v1769_v27, %v1763_v24  ;;  %vm7674_vm10 = vcmask 650752   ;;  %v3434_v35 = vld [vmem:[%s5929_s12] sm:$0xf] }
  0xe8   : > { %3344 = vrot.lane.b32.xlu2 %v4587_v21, %s5133_s27  ;;  %v3017_v29 = vrot.slane %v3015_v5, 5  ;;  %3100 = vst.msk [vmem:[#allocation3] sm:$0xf] %vm7675_vm9, %v5820_v56  ;;  %v3287_v37 = vpop.permute.xlu2 %3286  ;;  %4532 = vmatmul.msk.bf16.gmra.mxu0 %vm7670_vm6, %v4698_v26  ;;  %v1781_v31 = vadd.f32 %v1772_v14, %v5854_v47  ;;  %v1788_v9 = vadd.f32 %v1780_v23, %v1772_v14  ;;  %vm7673_vm11 = vcmask 781952   ;;  %v3388_v33 = vpop.permute.xlu0 %3387  ;;  %v3435_v3 = vld [vmem:[%s5929_s12 + $0x4] sm:$0x1] }
  0xe9   : > { %3150 = vst.msk [vmem:[#allocation3] sm:$0xf] %vm7674_vm10, %v3126_v6  ;;  %v3273_v42 = vshrl.u32 %v4581_v11, 16  ;;  %v3023_v43 = vrot.slane %v3021_v18, 5  ;;  %v3276_v56 = vshll.u32 %v4581_v11, 16  ;;  %v2998_v51 = vshrl.u32 %v2906_v36, 16 }
  0xea   : > { %v3018_v41 = vor.u32 %v3017_v29, %v3014_v28  ;;  %3101 = vst.msk [vmem:[#allocation3 + $0x8] sm:$0xf] %vm7675_vm9, %v5860_v60  ;;  %v1789_v46 = vadd.f32 %v1781_v31, %v1773_v0  ;;  %v1796_v47 = vpack.c.bf16 %v1788_v9, %v1788_v9  ;;  %vm7671_vm12 = vcmask 913152   ;;  %3699 = vmatpush.bf16.msra.mxu1 %v4722_v44  ;;  %v4566_v20 = vld [vmem:[%s5362_s25 + $0xf8] sm:$0xf]  ;;  %v4720_v2 = vld [vmem:[%s7665_s8 + $0x10] sm:$0xff] }
  0xeb   : > { %3311 = vst.msk [vmem:[#allocation3] sm:$0xf] %vm7673_vm11, %v3287_v37  ;;  %v3275_v50 = vrot.slane %v3273_v42, 4  ;;  %v3278_v60 = vrot.slane %v3276_v56, 5  ;;  %v3001_v6 = vshll.u32 %v2906_v36, 16  ;;  %v3007_v54 = vshll.u32 %v2907_v49, 16 }
  0xec   : > { %v3019_v61 = vrot.slane %v3018_v41, 4  ;;  %3151 = vst.msk [vmem:[#allocation3 + $0x8] sm:$0xf] %vm7674_vm10, %v3128_v63  ;;  %v1797_v53 = vpack.c.bf16 %v1789_v46, %v1789_v46  ;;  %v3282_v10 = vshll.u32 %v4582_v48, 16  ;;  %v3000_v17 = vrot.slane %v2998_v51, 4  ;;  %v4699_v18 = vld [vmem:[#allocation2 + $0x30] sm:$0xff] }
  0xed   : > { %v4707_v52 = vld [vmem:[#allocation2 + $0x70] sm:$0xff]  ;;  %1804 = vst.msk [vmem:[#allocation2 + $0x78] sm:$0xf] %vm1221_vm5, %v1796_v47  ;;  %vm7669_vm13 = vcmask 1044352   ;;  %v3003_v62 = vrot.slane %v3001_v6, 5  ;;  %v3279_v39 = vor.u32 %v3278_v60, %v3275_v50  ;;  %v3535_v40 = vshrl.u32 %v3434_v35, 16 }
  0xee   : > { %v3024_v55 = vsel %vm5375_vm2, %v3019_v61, %v3023_v43  ;;  %3312 = vst.msk [vmem:[#allocation3 + $0x8] sm:$0xf] %vm7673_vm11, %v3289_v30  ;;  %4541 = vmatmul.msk.bf16.gmra.mxu3 %vm7670_vm6, %v4707_v52  ;;  %3087 = vrot.lane.b32.xlu1 %v4557_v32, %s5130_s19  ;;  %v3009_v12 = vrot.slane %v3007_v54, 5  ;;  %v3538_v8 = vshll.u32 %v3434_v35, 16  ;;  %v3544_v16 = vshll.u32 %v3435_v3, 16  ;;  %v4726_v28 = vld [vmem:[%s7665_s8 + $0x40] sm:$0xff]  ;;  %v3390_v30 = vpop.permute.xlu1 %3389 }
  0xef   : > { %1805 = vst.msk [vmem:[#allocation2 + $0x7c] sm:$0xf] %vm1221_vm5, %v1797_v53  ;;  %3039 = vrot.lane.b32.xlu0 %v3024_v55, %s5128_s30  ;;  %v3004_v58 = vor.u32 %v3003_v62, %v3000_v17  ;;  %v1988_v19 = vpop.f32.mrf.mxu0  ;;  %3700 = vmatpush.bf16.msra.mxu1 %v4721_v34  ;;  %v3537_v15 = vrot.slane %v3535_v40, 4  ;;  %v5942_v7 = vld [vmem:[%s7664_s7] ss:$0 sm:$0xff]  ;;  %v3284_v21 = vrot.slane %v3282_v10, 5 }
  0xf0   : > { %3397 = vrot.lane.b32.xlu2 %v4595_v13, %s5132_s24  ;;  %v3339_v1 = vpop.permute.xlu2 %3338  ;;  %3361 = vst.msk [vmem:[#allocation3] sm:$0xf] %vm7671_vm12, %v3337_v59  ;;  %v4565_v4 = vld [vmem:[%s5362_s25 + $0xf0] sm:$0xf]  ;;  %v3540_v38 = vrot.slane %v3538_v8, 5  ;;  %v5947_v45 = vadd.f32 %v5942_v7, %v1988_v19  ;;  %v3280_v11 = vrot.slane %v3279_v39, 4  ;;  %3732 = vmatpush.bf16.msrb.mxu2 %v4726_v28  ;;  %v2868_v13 = vpop.permute.xlu0 %2867 }
  0xf1   : > { %3362 = vst.msk [vmem:[#allocation3 + $0x8] sm:$0xf] %vm7671_vm12, %v3339_v1  ;;  %v3005_v22 = vrot.slane %v3004_v58, 4  ;;  %v4598_v23 = vld [vmem:[%s5362_s25 + $0x8] sm:$0xf]  ;;  %v3546_v14 = vrot.slane %v3544_v16, 5 }
  0xf2   : > { %3412 = vst.msk [vmem:[#allocation3] sm:$0xf] %vm7669_vm13, %v3388_v33  ;;  %v2830_v24 = vld [vmem:[%s5362_s25 + $0x10] sm:$0xf]  ;;  %v2831_v25 = vld [vmem:[%s5362_s25 + $0x18] sm:$0xf]  ;;  %v3541_v27 = vor.u32 %v3540_v38, %v3537_v15  ;;  %v3285_v53 = vsel %vm5375_vm2, %v3280_v11, %v3284_v21 }
  0xf3   : > { %v3437_v5 = vshrl.u32 %v4598_v23, 16  ;;  %v3010_v26 = vsel %vm5375_vm2, %v3005_v22, %v3009_v12  ;;  %2838 = vst.msk [vmem:[#allocation3 + $0x10] sm:$0xf] %vm1221_vm5, %v2830_v24  ;;  %v2068_v63 = vsub.f32 0.0, %v5947_v45  ;;  %3701 = vmatpush.bf16.msra.mxu1 %v4720_v2  ;;  %v4719_v0 = vld [vmem:[%s7665_s8 + $0x8] sm:$0xff]  ;;  %v3440_v41 = vshll.u32 %v4598_v23, 16 }
  0xf4   : > { %2839 = vst.msk [vmem:[#allocation3 + $0x18] sm:$0xf] %vm1221_vm5, %v2831_v25  ;;  %v4599_v29 = vld [vmem:[%s5362_s25 + $0xc] sm:$0x1]  ;;  %v3542_v37 = vrot.slane %v3541_v27, 4  ;;  %v4718_v8 = vld [vmem:[%s7665_s8] sm:$0xff] }
  0xf5   : > { %v4600_v31 = vld [vmem:[%s5362_s25 + $0x10] sm:$0xf]  ;;  %v4601_v9 = vld [vmem:[%s5362_s25 + $0x14] sm:$0x1]  ;;  %v3439_v42 = vrot.slane %v3437_v5, 4  ;;  %v3446_v43 = vshll.u32 %v4599_v29, 16 }
  0xf6   : > { %3139 = vrot.lane.b32.xlu1 %v4566_v20, %s5129_s21  ;;  %v2100_v36 = vmul.f32 1.442695, %v2068_v63  ;;  %3413 = vst.msk [vmem:[#allocation3 + $0x8] sm:$0xf] %vm7669_vm13, %v3390_v30  ;;  %v3547_v56 = vsel %vm5375_vm2, %v3542_v37, %v3546_v14  ;;  %v3451_v44 = vshrl.u32 %v4600_v31, 16  ;;  %v3454_v46 = vshll.u32 %v4600_v31, 16 }
  0xf7   : > { %3137 = vrot.lane.b32.xlu0 %v4565_v4, %s5129_s21  ;;  %v3460_v47 = vshll.u32 %v4601_v9, 16  ;;  %3563 = vst.msk [vmem:[#allocation3 + $0x3c] sm:$0xf] %vm1221_vm5, %v3547_v56  ;;  %3702 = vmatpush.bf16.msra.mxu1 %v4719_v0  ;;  %v3442_v48 = vrot.slane %v3440_v41, 5  ;;  %v4708_v49 = vld [vmem:[#allocation2 + $0x78] sm:$0xff]  ;;  %v3448_v52 = vrot.slane %v3446_v43, 5  ;;  %v1990_v58 = vpop.f32.mrf.mxu0 }
  0xf8   : > { %3037 = vrot.lane.b32.xlu2 %v3010_v26, %s5128_s30  ;;  %v2866_v32 = vpop.permute.xlu2 %2865  ;;  %4533 = vmatmul.msk.bf16.gmra.mxu0 %vm7670_vm6, %v4699_v18  ;;  %4814 = vpow2.f32 %v2100_v36  ;;  %2889 = vst.msk [vmem:[#allocation3 + $0x18] sm:$0xf] %vm2885_vm7, %v2868_v13  ;;  %v3453_v61 = vrot.slane %v3451_v44, 4  ;;  %v3456_v50 = vrot.slane %v3454_v46, 5  ;;  %v4589_v60 = vld [vmem:[%s5362_s25 + $0x38] sm:$0xf]  ;;  %v6005_v19 = vadd.f32 %v5942_v7, %v1990_v58  ;;  %v3080_v5 = vpop.permute.xlu0 %3079 }
  0xf9   : > { %2888 = vst.msk [vmem:[#allocation3 + $0x10] sm:$0xf] %vm2885_vm7, %v2866_v32  ;;  %v3443_v51 = vor.u32 %v3442_v48, %v3439_v42  ;;  %v4558_v6 = vld [vmem:[%s5362_s25 + $0xb8] sm:$0xf]  ;;  %v3462_v55 = vrot.slane %v3460_v47, 5 }
  0xfa   : > { %v3457_v54 = vor.u32 %v3456_v50, %v3453_v61  ;;  %v4579_v62 = vld [vmem:[%s5362_s25 + $0xb0] sm:$0xf]  ;;  %v4597_v12 = vld [vmem:[%s5929_s12 + $0x8] sm:$0xf]  ;;  %v4580_v20 = vld [vmem:[%s5362_s25 + $0xb4] sm:$0x1] }
  0xfb   : > { %v3444_v10 = vrot.slane %v3443_v51, 4  ;;  %v3259_v33 = vshrl.u32 %v4579_v62, 16  ;;  %v3262_v3 = vshll.u32 %v4579_v62, 16  ;;  %v4596_v21 = vld [vmem:[%s5362_s25 + $0x78] sm:$0xf]  ;;  %3703 = vmatpush.bf16.msra.mxu1 %v4718_v8  ;;  %v2069_v25 = vsub.f32 0.0, %v6005_v19 }
  0xfc   : > { %v3458_v34 = vrot.slane %v3457_v54, 4  ;;  %v4614_v23 = vld [vmem:[#allocation3] sm:$0xf]  ;;  %v3268_v26 = vshll.u32 %v4580_v20, 16 }
  0xfd   : > { %v3449_v59 = vsel %vm5375_vm2, %v3444_v10, %v3448_v52  ;;  %v3261_v15 = vrot.slane %v3259_v33, 4  ;;  %v3264_v4 = vrot.slane %v3262_v3, 5  ;;  %v4711_v2 = vld [vmem:[#allocation3 + $0x4] sm:$0xf0]  ;;  %v2102_v27 = vmul.f32 1.442695, %v2069_v25 }
  0xfe   : > { %4542 = vmatmul.msk.bf16.gmra.mxu3 %vm7670_vm6, %v4708_v49  ;;  %3348 = vrot.lane.b32.xlu1 %v4589_v60, %s5133_s27  ;;  %v4815_v17 = vpop.eup %4814  ;;  %v3463_v1 = vsel %vm5375_vm2, %v3458_v34, %v3462_v55  ;;  %3556 = vst.msk [vmem:[#allocation3 + $0x4] sm:$0xf] %vm1221_vm5, %v3449_v59  ;;  %v4615_v18 = vor.u32 %v4711_v2, %v4614_v23  ;;  %v3270_v29 = vrot.slane %v3268_v26, 5  ;;  %v3327_v51 = vld [vmem:[%s5929_s12] sm:$0xf] }
  0xff   : > { %3300 = vrot.lane.b32.xlu0 %v3285_v53, %s5131_s22  ;;  %v5989_v35 = vadd.f32 1.0, %v4815_v17  ;;  %3557 = vst.msk [vmem:[#allocation3 + $0xc] sm:$0xf] %vm1221_vm5, %v3463_v1  ;;  %v3265_v11 = vor.u32 %v3264_v4, %v3261_v15 }
 0x100   : > { %3089 = vrot.lane.b32.xlu2 %v4558_v6, %s5130_s19  ;;  %v2033_v39 = vpop.f32.mrf.mxu3  ;;  %3704 = vmatmul.bf16.vlgmr.msra.gmra.mxu1 %v4615_v18  ;;  %v3132_v46 = vpop.permute.xlu0 %3131 }
 0x101   : > { %v5995_v40 = vadd.f32 %v5942_v7, %v2033_v39  ;;  %4816 = vrcp.f32 %v5989_v35  ;;  %v3030_v22 = vpop.permute.xlu1 %3029  ;;  %v3032_v38 = vpop.permute.xlu2 %3031  ;;  %v3266_v0 = vrot.slane %v3265_v11, 4  ;;  %vm2201_vm14 = vweird.f32 %v5989_v35 }
 0x102   : > { %3052 = vst.msk [vmem:[#allocation3 + $0x10] sm:$0xf] %vm7672_vm8, %v3030_v22  ;;  %v2207_v62 = vand.u32 2147483648, %v5989_v35 }
 0x103   : > { %v2086_v16 = vsub.f32 0.0, %v5995_v40  ;;  %3053 = vst.msk [vmem:[#allocation3 + $0x18] sm:$0xf] %vm7672_vm8, %v3032_v38  ;;  %v3271_v31 = vsel %vm5375_vm2, %v3266_v0, %v3270_v29 }
 0x104   : > { %3102 = vst.msk [vmem:[#allocation3 + $0x10] sm:$0xf] %vm7675_vm9, %v3080_v5  ;;  %v2208_v25 = vor.u32 1.1754944e-38, %v2207_v62 }
 0x105   : > { %v2136_v24 = vmul.f32 1.442695, %v2086_v16  ;;  %v4710_v14 = vld [vmem:[#allocation3 + $0x4] sm:$0xf]  ;;  %v2205_v16 = vand.u32 2147483647, %v5989_v35 }
 0x106   : > { %3401 = vrot.lane.b32.xlu1 %v4597_v12, %s5132_s24  ;;  %v4616_v63 = vld [vmem:[#allocation3 + $0x8] sm:$0xf0] }
 0x107   : > { %3399 = vrot.lane.b32.xlu0 %v4596_v21, %s5132_s24  ;;  %4818 = vpow2.f32 %v2136_v24  ;;  %v6015_v28 = vpop.eup %4816  ;;  %v4619_v30 = vor.u32 %v4710_v14, %v4616_v63  ;;  %vm2206_vm1 = vcmp.eq.f32.partialorder %v2205_v16, 8.507059e+37 }
 0x108   : > { %v2035_v37 = vpop.f32.mrf.mxu3  ;;  %4820 = vpow2.f32 %v2102_v27  ;;  %v2197_v42 = vmul.f32 %v6015_v28, %v5989_v35  ;;  %3298 = vrot.lane.b32.xlu2 %v3271_v31, %s5131_s22  ;;  %v3341_v17 = vpop.permute.xlu0 %3340  ;;  %vm2202_vm15 = vweird.f32 %v6015_v28 }
 0x109   : > { %v6020_v9 = vadd.f32 %v5942_v7, %v2035_v37  ;;  %4680 = vmatmul.msk.bf16.vlgmr.msrb.gmra.mxu2 %vm7670_vm6, %v4619_v30  ;;  %v3082_v41 = vpop.permute.xlu1 %3081  ;;  %v3130_v44 = vpop.permute.xlu2 %3129  ;;  %vm6077_vm0 = vmor %vm2201_vm14, %vm2202_vm15  ;;  %v4602_v37 = vld [vmem:[%s5362_s25 + $0x18] sm:$0xf] }
 0x10a   : > { %3103 = vst.msk [vmem:[#allocation3 + $0x18] sm:$0xf] %vm7675_vm9, %v3082_v41  ;;  %v2198_v61 = vsub.f32 1.0, %v2197_v42 }
 0x10b   : > { %v2087_v36 = vsub.f32 0.0, %v6020_v9  ;;  %3152 = vst.msk [vmem:[#allocation3 + $0x10] sm:$0xf] %vm7674_vm10, %v3130_v44  ;;  %v4603_v44 = vld [vmem:[%s5362_s25 + $0x1c] sm:$0x1] }
 0x10c   : > { %v1993_v32 = vpop.f32.mrf.mxu0  ;;  %v2023_v48 = vpop.f32.mrf.mxu2  ;;  %3153 = vst.msk [vmem:[#allocation3 + $0x18] sm:$0xf] %vm7674_vm10, %v3132_v46  ;;  %v2199_v54 = vmul.f32 %v6015_v28, %v2198_v61  ;;  %v3465_v61 = vshrl.u32 %v4602_v37, 16 }
 0x10d   : > { %v4819_v43 = vpop.eup %4818  ;;  %v6028_v56 = vadd.f32 %v5942_v7, %v1993_v32  ;;  %v2138_v13 = vmul.f32 1.442695, %v2087_v36  ;;  %v6037_v60 = vadd.f32 %v5942_v7, %v2023_v48 }
 0x10e   : > { %v6031_v47 = vadd.f32 1.0, %v4819_v43  ;;  %v4821_v49 = vpop.eup %4820  ;;  %v2200_v33 = vadd.f32 %v6015_v28, %v2199_v54 }
 0x10f   : > { %v2070_v50 = vsub.f32 0.0, %v6028_v56  ;;  %v6041_v52 = vadd.f32 1.0, %v4821_v49  ;;  %v2082_v6 = vsub.f32 0.0, %v6037_v60 }
 0x110   : > { %4822 = vrcp.f32 %v6031_v47  ;;  %3350 = vrot.lane.b32.xlu2 %v3327_v51, %s5133_s27  ;;  %v2475_v5 = vand.u32 2147483647, %v6031_v47  ;;  %v2204_v11 = vsel %vm6077_vm0, %v6015_v28, %v2200_v33  ;;  %v2477_v26 = vand.u32 2147483648, %v6031_v47  ;;  %v3394_v31 = vpop.permute.xlu0 %3393 }
 0x111   : > { %4824 = vpow2.f32 %v2138_v13  ;;  %v2104_v53 = vmul.f32 1.442695, %v2070_v50  ;;  %v2128_v55 = vmul.f32 1.442695, %v2082_v6  ;;  %v2209_v30 = vsel %vm2206_vm1, %v2208_v25, %v2204_v11  ;;  %v6119_v6 = vld [vmem:[%s5362_s25 + $0x20] sm:$0xf] }
 0x112   : > { %4826 = vrcp.f32 %v6041_v52  ;;  %vm2471_vm3 = vweird.f32 %v6031_v47  ;;  %v2220_v28 = vand.u32 2147483647, %v6041_v52  ;;  %vm6098_vm4 = vcmp.eq.f32.partialorder %v2475_v5, 8.507059e+37 }
 0x113   : > { %4828 = vpow2.f32 %v2104_v53  ;;  %v2478_v13 = vor.u32 1.1754944e-38, %v2477_v26  ;;  %v2222_v49 = vand.u32 2147483648, %v6041_v52  ;;  %v6111_v50 = vmul.f32 %v2209_v30, %v5947_v45 }
 0x114   : > { %v1995_v10 = vpop.f32.mrf.mxu0  ;;  %4830 = vpow2.f32 %v2128_v55  ;;  %v2025_v39 = vpop.f32.mrf.mxu2  ;;  %vm2216_vm15 = vweird.f32 %v6041_v52  ;;  %vm6121_vm0 = vcmp.eq.f32.partialorder %v2220_v28, 8.507059e+37  ;;  %v3468_v45 = vshll.u32 %v4602_v37, 16 }
 0x115   : > { %v6048_v34 = vadd.f32 %v5942_v7, %v1995_v10  ;;  %v6060_v8 = vadd.f32 %v5942_v7, %v2025_v39  ;;  %v3474_v10 = vshll.u32 %v4603_v44, 16 }
 0x116   : > { %v6050_v59 = vpop.eup %4822  ;;  %v6153_v25 = vrot.slane %v3468_v45, 5 }
 0x117   : > { %v4825_v1 = vpop.eup %4824  ;;  %v2467_v3 = vmul.f32 %v6050_v59, %v6031_v47  ;;  %v2071_v58 = vsub.f32 0.0, %v6048_v34  ;;  %v2083_v23 = vsub.f32 0.0, %v6060_v8  ;;  %vm2472_vm14 = vweird.f32 %v6050_v59 }
 0x118   : > { %v3291_v12 = vpop.permute.xlu1 %3290  ;;  %v6063_v20 = vadd.f32 1.0, %v4825_v1  ;;  %v2038_v15 = vpop.f32.mrf.mxu3  ;;  %vm6136_vm1 = vmor %vm2471_vm3, %vm2472_vm14  ;;  %v3479_v47 = vshrl.u32 %v6119_v6, 16  ;;  %v6166_v26 = vrot.slane %v3474_v10, 5 }
 0x119   : > { %3313 = vst.msk [vmem:[#allocation3 + $0x10] sm:$0xf] %vm7673_vm11, %v3291_v12  ;;  %v6066_v4 = vpop.eup %4826  ;;  %v6069_v21 = vadd.f32 %v5942_v7, %v2038_v15  ;;  %v2106_v22 = vmul.f32 1.442695, %v2071_v58  ;;  %v2468_v35 = vsub.f32 1.0, %v2467_v3  ;;  %v2223_v58 = vor.u32 1.1754944e-38, %v2222_v49 }
 0x11a   : > { %v3293_v38 = vpop.permute.xlu2 %3292  ;;  %3363 = vst.msk [vmem:[#allocation3 + $0x10] sm:$0xf] %vm7671_vm12, %v3341_v17  ;;  %v4829_v2 = vpop.eup %4828  ;;  %v2212_v18 = vmul.f32 %v6066_v4, %v6041_v52  ;;  %4832 = vrcp.f32 %v6063_v20  ;;  %v2130_v29 = vmul.f32 1.442695, %v2083_v23  ;;  %v6142_v12 = vrot.slane %v3465_v61, 4 }
 0x11b   : > { %3314 = vst.msk [vmem:[#allocation3 + $0x18] sm:$0xf] %vm7673_vm11, %v3293_v38  ;;  %v6090_v27 = vadd.f32 1.0, %v4829_v2  ;;  %v4831_v14 = vpop.eup %4830  ;;  %v2088_v0 = vsub.f32 0.0, %v6069_v21  ;;  %4834 = vpow2.f32 %v2106_v22  ;;  %v2469_v42 = vmul.f32 %v6050_v59, %v2468_v35 }
 0x11c   : > { %v2213_v63 = vsub.f32 1.0, %v2212_v18  ;;  %v6102_v32 = vadd.f32 1.0, %v4831_v14  ;;  %v2490_v22 = vand.u32 2147483647, %v6063_v20  ;;  %v2492_v38 = vand.u32 2147483648, %v6063_v20 }
 0x11d   : > { %4836 = vrcp.f32 %v6090_v27  ;;  %v2140_v41 = vmul.f32 1.442695, %v2088_v0  ;;  %v2470_v62 = vadd.f32 %v6050_v59, %v2469_v42  ;;  %vm2486_vm14 = vweird.f32 %v6063_v20 }
 0x11e   : > { %4838 = vpow2.f32 %v2130_v29  ;;  %v2214_v48 = vmul.f32 %v6066_v4, %v2213_v63  ;;  %v2237_v11 = vand.u32 2147483648, %v6090_v27  ;;  %v2493_v37 = vor.u32 1.1754944e-38, %v2492_v38 }
 0x11f   : > { %4840 = vrcp.f32 %v6102_v32  ;;  %v2474_v5 = vsel %vm6136_vm1, %v6050_v59, %v2470_v62  ;;  %v6183_v30 = vrot.slane %v3479_v47, 4  ;;  %vm2231_vm1 = vweird.f32 %v6090_v27 }
 0x120   : > { %v3343_v43 = vpop.permute.xlu1 %3342  ;;  %v6105_v46 = vpop.eup %4832  ;;  %4842 = vpow2.f32 %v2140_v41  ;;  %v2215_v3 = vadd.f32 %v6066_v4, %v2214_v48  ;;  %v2417_v44 = vand.u32 2147483648, %v6102_v32  ;;  %v6207_v49 = vor.u32 1.1754944e-38, %v2237_v11 }
 0x121   : > { %3364 = vst.msk [vmem:[#allocation3 + $0x18] sm:$0xf] %vm7671_vm12, %v3343_v43  ;;  %v2482_v51 = vmul.f32 %v6105_v46, %v6063_v20  ;;  %v4835_v54 = vpop.eup %4834  ;;  %v2040_v23 = vpop.f32.mrf.mxu3  ;;  %v2235_v43 = vand.u32 2147483647, %v6090_v27  ;;  %v2415_v10 = vand.u32 2147483647, %v6102_v32 }
 0x122   : > { %v3392_v53 = vpop.permute.xlu2 %3391  ;;  %3415 = vst.msk [vmem:[#allocation3 + $0x18] sm:$0xf] %vm7669_vm13, %v3394_v31  ;;  %v6130_v1 = vadd.f32 1.0, %v4835_v54  ;;  %v6176_v52 = vadd.f32 %v5942_v7, %v2040_v23  ;;  %v6231_v33 = vor.u32 1.1754944e-38, %v2417_v44 }
 0x123   : > { %3414 = vst.msk [vmem:[#allocation3 + $0x10] sm:$0xf] %vm7669_vm13, %v3392_v53  ;;  %v6127_v17 = vpop.eup %4836  ;;  %v2483_v39 = vsub.f32 1.0, %v2482_v51  ;;  %vm2217_vm13 = vweird.f32 %v6066_v4  ;;  %v1998_v35 = vpop.f32.mrf.mxu0 }
 0x124   : > { %v4839_v16 = vpop.eup %4838  ;;  %v2227_v2 = vmul.f32 %v6127_v17, %v6090_v27  ;;  %4844 = vrcp.f32 %v6130_v1  ;;  %vm6160_vm3 = vmor %vm2216_vm15, %vm2217_vm13  ;;  %vm2487_vm13 = vweird.f32 %v6105_v46  ;;  %vm6178_vm15 = vcmp.eq.f32.partialorder %v2490_v22, 8.507059e+37 }
 0x125   : > { %v2484_v15 = vmul.f32 %v6105_v46, %v2483_v39  ;;  %v6151_v24 = vadd.f32 1.0, %v4839_v16  ;;  %v6168_v14 = vpop.eup %4840  ;;  %v2219_v63 = vsel %vm6160_vm3, %v6066_v4, %v2215_v3  ;;  %v2479_v4 = vsel %vm6098_vm4, %v2478_v13, %v2474_v5  ;;  %vm6194_vm3 = vmor %vm2486_vm14, %vm2487_vm13  ;;  %v2028_v61 = vpop.f32.mrf.mxu2 }
 0x126   : > { %v4843_v0 = vpop.eup %4842  ;;  %v2228_v28 = vsub.f32 1.0, %v2227_v2  ;;  %v2224_v42 = vsel %vm6121_vm0, %v2223_v58, %v2219_v63  ;;  %v2407_v36 = vmul.f32 %v6168_v14, %v6102_v32  ;;  %v2089_v20 = vsub.f32 0.0, %v6176_v52  ;;  %v2832_v58 = vld [vmem:[%s5362_s25 + $0x20] sm:$0xf] }
 0x127   : > { %v2485_v59 = vadd.f32 %v6105_v46, %v2484_v15  ;;  %4846 = vrcp.f32 %v6151_v24  ;;  %v6188_v31 = vadd.f32 1.0, %v4843_v0  ;;  %v6212_v51 = vmul.f32 %v2479_v4, %v5995_v40  ;;  %2840 = vst.msk [vmem:[#allocation3 + $0x20] sm:$0xf] %vm1221_vm5, %v2832_v58 }
 0x128   : > { %v2252_v53 = vand.u32 2147483648, %v6130_v1  ;;  %v6216_v54 = vadd.f32 %v5942_v7, %v1998_v35  ;;  %v6219_v55 = vadd.f32 %v5942_v7, %v2028_v61  ;;  %v2229_v45 = vmul.f32 %v6127_v17, %v2228_v28  ;;  %v2870_v38 = vpop.permute.xlu1 %2869 }
 0x129   : > { %v2489_v48 = vsel %vm6194_vm3, %v6105_v46, %v2485_v59  ;;  %4848 = vrcp.f32 %v6188_v31  ;;  %v6222_v46 = vmul.f32 %v2224_v42, %v6005_v19  ;;  %vm2411_vm4 = vweird.f32 %v6102_v32  ;;  %2890 = vst.msk [vmem:[#allocation3 + $0x20] sm:$0xf] %vm2885_vm7, %v2870_v38 }
 0x12a   : > { %v6202_v13 = vpop.eup %4844  ;;  %v2494_v40 = vsel %vm6178_vm15, %v2493_v37, %v2489_v48  ;;  %v2408_v39 = vsub.f32 1.0, %v2407_v36  ;;  %vm2232_vm0 = vweird.f32 %v6127_v17  ;;  %vm6237_vm14 = vcmp.eq.f32.partialorder %v2235_v43, 8.507059e+37  ;;  %v2872_v23 = vpop.permute.xlu2 %2871 }
 0x12b   : > { %v2242_v3 = vmul.f32 %v6202_v13, %v6130_v1  ;;  %v2250_v16 = vand.u32 2147483647, %v6130_v1  ;;  %v2142_v22 = vmul.f32 1.442695, %v2089_v20  ;;  %vm2412_vm13 = vweird.f32 %v6168_v14  ;;  %v2000_v11 = vpop.f32.mrf.mxu0  ;;  %vm6276_vm6 = vmor %vm2231_vm1, %vm2232_vm0 }
 0x12c   : > { %v6246_v47 = vor.u32 1.1754944e-38, %v2252_v53  ;;  %v2072_v2 = vsub.f32 0.0, %v6216_v54  ;;  %v2084_v5 = vsub.f32 0.0, %v6219_v55  ;;  %v6254_v63 = vmul.f32 %v2494_v40, %v6020_v9 }
 0x12d   : > { %v6227_v62 = vpop.eup %4846  ;;  %v2230_v59 = vadd.f32 %v6127_v17, %v2229_v45  ;;  %vm2426_vm15 = vweird.f32 %v6151_v24  ;;  %4850 = vpow2.f32 %v2142_v22  ;;  %v2409_v29 = vmul.f32 %v6168_v14, %v2408_v39  ;;  %v4605_v22 = vld [vmem:[%s5362_s25 + $0x24] sm:$0x1] }
 0x12e   : > { %v2422_v15 = vmul.f32 %v6227_v62, %v6151_v24  ;;  %v2243_v4 = vsub.f32 1.0, %v2242_v3  ;;  %v2108_v28 = vmul.f32 1.442695, %v2072_v2  ;;  %vm6264_vm3 = vcmp.eq.f32.partialorder %v2415_v10, 8.507059e+37  ;;  %v2833_v10 = vld [vmem:[%s5362_s25 + $0x28] sm:$0xf] }
 0x12f   : > { %v6251_v35 = vpop.eup %4848  ;;  %v2132_v41 = vmul.f32 1.442695, %v2084_v5  ;;  %v6270_v36 = vadd.f32 %v5942_v7, %v2000_v11  ;;  %vm2246_vm12 = vweird.f32 %v6130_v1  ;;  %v2430_v48 = vand.u32 2147483647, %v6151_v24  ;;  %2841 = vst.msk [vmem:[#allocation3 + $0x28] sm:$0xf] %vm1221_vm5, %v2833_v10 }
 0x130   : > { %v2043_v18 = vpop.f32.mrf.mxu3  ;;  %v2497_v37 = vmul.f32 %v6251_v35, %v6188_v31  ;;  %v2423_v9 = vsub.f32 1.0, %v2422_v15  ;;  %v2432_v20 = vand.u32 2147483648, %v6151_v24  ;;  %4852 = vpow2.f32 %v2108_v28  ;;  %v3034_v15 = vpop.permute.xlu0 %3033  ;;  %2891 = vst.msk [vmem:[#allocation3 + $0x28] sm:$0xf] %vm2885_vm7, %v2872_v23 }
 0x131   : > { %v6259_v0 = vadd.f32 %v5942_v7, %v2043_v18  ;;  %v3471_v61 = vor.u32 %v6153_v25, %v6142_v12  ;;  %v2234_v53 = vsel %vm6276_vm6, %v6127_v17, %v2230_v59  ;;  %4854 = vpow2.f32 %v2132_v41  ;;  %vm6297_vm6 = vmor %vm2411_vm4, %vm2412_vm13  ;;  %v3036_v2 = vpop.permute.xlu1 %3035  ;;  %3054 = vst.msk [vmem:[#allocation3 + $0x20] sm:$0xf] %vm7672_vm8, %v3034_v15 }
 0x132   : > { %v2498_v27 = vsub.f32 1.0, %v2497_v37  ;;  %v2410_v40 = vadd.f32 %v6168_v14, %v2409_v29  ;;  %v2244_v39 = vmul.f32 %v6202_v13, %v2243_v4  ;;  %v2073_v3 = vsub.f32 0.0, %v6270_v36  ;;  %v3084_v5 = vpop.permute.xlu2 %3083  ;;  %3055 = vst.msk [vmem:[#allocation3 + $0x28] sm:$0xf] %vm7672_vm8, %v3036_v2 }
 0x133   : > { %v2090_v43 = vsub.f32 0.0, %v6259_v0  ;;  %v3472_v58 = vrot.slane %v3471_v61, 4  ;;  %v4851_v12 = vpop.eup %4850  ;;  %vm2501_vm1 = vweird.f32 %v6188_v31  ;;  %v2424_v25 = vmul.f32 %v6227_v62, %v2423_v9  ;;  %3104 = vst.msk [vmem:[#allocation3 + $0x20] sm:$0xf] %vm7675_vm9, %v3084_v5 }
 0x134   : > { %v3482_v38 = vshll.u32 %v6119_v6, 16  ;;  %v2239_v32 = vsel %vm6237_vm14, %v6207_v49, %v2234_v53  ;;  %vm2247_vm4 = vweird.f32 %v6202_v13  ;;  %v6310_v18 = vadd.f32 1.0, %v4851_v12 }
 0x135   : > { %v2144_v45 = vmul.f32 1.442695, %v2090_v43  ;;  %v2110_v11 = vmul.f32 1.442695, %v2073_v3  ;;  %v2499_v59 = vmul.f32 %v6251_v35, %v2498_v27  ;;  %vm6314_vm0 = vcmp.eq.f32.partialorder %v2250_v16, 8.507059e+37  ;;  %vm6355_vm8 = vmor %vm2246_vm12, %vm2247_vm4 }
 0x136   : > { %vm2427_vm13 = vweird.f32 %v6227_v62  ;;  %v3477_v6 = vsel %vm5375_vm2, %v3472_v58, %v6166_v26  ;;  %v3484_v49 = vrot.slane %v3482_v38, 5  ;;  %v4853_v19 = vpop.eup %4852  ;;  %v2414_v23 = vsel %vm6297_vm6, %v6168_v14, %v2410_v40 }
 0x137   : > { %4856 = vpow2.f32 %v2144_v45  ;;  %vm2502_vm14 = vweird.f32 %v6251_v35  ;;  %v2245_v16 = vadd.f32 %v6202_v13, %v2244_v39  ;;  %3558 = vst.msk [vmem:[#allocation3 + $0x14] sm:$0xf] %vm1221_vm5, %v3477_v6  ;;  %v4855_v37 = vpop.eup %4854  ;;  %v2425_v4 = vadd.f32 %v6227_v62, %v2424_v25  ;;  %vm6340_vm6 = vmor %vm2426_vm15, %vm2427_vm13  ;;  %v4622_v39 = vld [vmem:[#allocation3 + $0x10] sm:$0xf] }
 0x138   : > { %4858 = vrcp.f32 %v6310_v18  ;;  %v6331_v26 = vadd.f32 1.0, %v4853_v19  ;;  %v3488_v28 = vshll.u32 %v4605_v22, 16  ;;  %v2505_v9 = vand.u32 2147483647, %v6188_v31  ;;  %v2045_v61 = vpop.f32.mrf.mxu3  ;;  %vm6371_vm12 = vmor %vm2501_vm1, %vm2502_vm14  ;;  %v3086_v15 = vpop.permute.xlu0 %3085 }
 0x139   : > { %4860 = vpow2.f32 %v2110_v11  ;;  %v2507_v14 = vand.u32 2147483648, %v6188_v31  ;;  %v6344_v43 = vadd.f32 1.0, %v4855_v37  ;;  %v3485_v44 = vor.u32 %v3484_v49, %v6183_v30  ;;  %v2030_v30 = vpop.f32.mrf.mxu2  ;;  %3105 = vst.msk [vmem:[#allocation3 + $0x28] sm:$0xf] %vm7675_vm9, %v3086_v15  ;;  %v3134_v17 = vpop.permute.xlu1 %3133 }
 0x13a   : > { %v6348_v27 = vmul.f32 %v2239_v32, %v6028_v56  ;;  %v2500_v45 = vadd.f32 %v6251_v35, %v2499_v59  ;;  %vm6359_vm15 = vcmp.eq.f32.partialorder %v2430_v48, 8.507059e+37  ;;  %4862 = vrcp.f32 %v6331_v26  ;;  %v4713_v56 = vld [vmem:[#allocation3 + $0x14] sm:$0xf0]  ;;  %v3136_v25 = vpop.permute.xlu2 %3135  ;;  %3154 = vst.msk [vmem:[#allocation3 + $0x20] sm:$0xf] %vm7674_vm10, %v3134_v17  ;;  %v2003_v11 = vpop.f32.mrf.mxu0 }
 0x13b   : > { %v2419_v3 = vsel %vm6264_vm3, %v6231_v33, %v2414_v23  ;;  %v2249_v48 = vsel %vm6355_vm8, %v6202_v13, %v2245_v16  ;;  %v2433_v58 = vor.u32 1.1754944e-38, %v2432_v20  ;;  %4864 = vrcp.f32 %v6344_v43  ;;  %3155 = vst.msk [vmem:[#allocation3 + $0x28] sm:$0xf] %vm7674_vm10, %v3136_v25 }
 0x13c   : > { %v2429_v33 = vsel %vm6340_vm6, %v6227_v62, %v2425_v4  ;;  %v3486_v31 = vrot.slane %v3485_v44, 4  ;;  %v3490_v12 = vrot.slane %v3488_v28, 5  ;;  %v2508_v13 = vor.u32 1.1754944e-38, %v2507_v14 }
 0x13d   : > { %v4857_v53 = vpop.eup %4856  ;;  %v2522_v24 = vand.u32 2147483648, %v6310_v18  ;;  %v6391_v20 = vadd.f32 %v5942_v7, %v2030_v30  ;;  %v4623_v38 = vor.u32 %v4713_v56, %v4622_v39  ;;  %v2504_v2 = vsel %vm6371_vm12, %v6251_v35, %v2500_v45 }
 0x13e   : > { %v6384_v42 = vadd.f32 1.0, %v4857_v53  ;;  %v6387_v22 = vpop.eup %4858  ;;  %vm6397_vm8 = vcmp.eq.f32.partialorder %v2505_v9, 8.507059e+37  ;;  %v6406_v59 = vmul.f32 %v2419_v3, %v6037_v60  ;;  %v6411_v6 = vsel %vm6314_vm0, %v6246_v47, %v2249_v48 }
 0x13f   : > { %v4861_v62 = vpop.eup %4860  ;;  %v2512_v32 = vmul.f32 %v6387_v22, %v6310_v18  ;;  %v6415_v35 = vsel %vm6359_vm15, %v2433_v58, %v2429_v33  ;;  %3709 = vmatmul.bf16.gmra.mxu1 %v4623_v38  ;;  %vm2516_vm3 = vweird.f32 %v6310_v18  ;;  %v2520_v23 = vand.u32 2147483647, %v6310_v18  ;;  %v4712_v38 = vld [vmem:[#allocation3 + $0x14] sm:$0xf] }
 0x140   : > { %4866 = vrcp.f32 %v6384_v42  ;;  %v6417_v49 = vadd.f32 1.0, %v4861_v62  ;;  %v6419_v19 = vpop.eup %4862  ;;  %v3491_v60 = vsel %vm5375_vm2, %v3486_v31, %v3490_v12  ;;  %v2085_v29 = vsub.f32 0.0, %v6391_v20 }
 0x141   : > { %v6427_v47 = vadd.f32 %v5942_v7, %v2045_v61  ;;  %v6429_v16 = vpop.eup %4864  ;;  %v6433_v37 = vsel %vm6397_vm8, %v2508_v13, %v2504_v2  ;;  %v6435_v4 = vor.u32 1.1754944e-38, %v2522_v24  ;;  %v2257_v28 = vmul.f32 %v6419_v19, %v6331_v26  ;;  %3559 = vst.msk [vmem:[#allocation3 + $0x1c] sm:$0xf] %vm1221_vm5, %v3491_v60 }
 0x142   : > { %v2267_v9 = vand.u32 2147483648, %v6331_v26  ;;  %v2513_v14 = vsub.f32 1.0, %v2512_v32  ;;  %v2437_v41 = vmul.f32 %v6429_v16, %v6344_v43  ;;  %v2447_v44 = vand.u32 2147483648, %v6344_v43  ;;  %v3345_v48 = vpop.permute.xlu2 %3344 }
 0x143   : > { %4868 = vrcp.f32 %v6417_v49  ;;  %v2258_v61 = vsub.f32 1.0, %v2257_v28  ;;  %vm2261_vm1 = vweird.f32 %v6331_v26  ;;  %v2265_v53 = vand.u32 2147483647, %v6331_v26 }
 0x144   : > { %v2445_v45 = vand.u32 2147483647, %v6344_v43  ;;  %v2438_v39 = vsub.f32 1.0, %v2437_v41  ;;  %vm2441_vm4 = vweird.f32 %v6344_v43  ;;  %v2134_v56 = vmul.f32 1.442695, %v2085_v29  ;;  %v2005_v29 = vpop.f32.mrf.mxu0 }
 0x145   : > { %v2091_v3 = vsub.f32 0.0, %v6427_v47  ;;  %vm2517_vm0 = vweird.f32 %v6387_v22  ;;  %v6454_v58 = vor.u32 1.1754944e-38, %v2267_v9  ;;  %v2535_v33 = vand.u32 2147483647, %v6384_v42  ;;  %v4606_v9 = vld [vmem:[%s5362_s25 + $0x28] sm:$0xf] }
 0x146   : > { %v6448_v30 = vpop.eup %4866  ;;  %v2514_v31 = vmul.f32 %v6387_v22, %v2513_v14  ;;  %v6461_v12 = vor.u32 1.1754944e-38, %v2447_v44  ;;  %v2537_v17 = vand.u32 2147483648, %v6384_v42  ;;  %4870 = vpow2.f32 %v2134_v56  ;;  %vm6499_vm10 = vmor %vm2516_vm3, %vm2517_vm0 }
 0x147   : > { %v2048_v10 = vpop.f32.mrf.mxu3  ;;  %v3295_v40 = vpop.permute.xlu0 %3294  ;;  %v2527_v15 = vmul.f32 %v6448_v30, %v6384_v42  ;;  %vm7722_vm13 = vcmask 913152   ;;  %v2259_v25 = vmul.f32 %v6419_v19, %v2258_v61  ;;  %v2439_v13 = vmul.f32 %v6429_v16, %v2438_v39 }
 0x148   : > { %3315 = vst.msk [vmem:[#allocation3 + $0x20] sm:$0xf] %vm7673_vm11, %v3295_v40  ;;  %v3297_v1 = vpop.permute.xlu1 %3296  ;;  %v2146_v62 = vmul.f32 1.442695, %v2091_v3  ;;  %vm2262_vm14 = vweird.f32 %v6419_v19  ;;  %vm2531_vm6 = vweird.f32 %v6384_v42  ;;  %v4624_v5 = vld [vmem:[#allocation3 + $0x18] sm:$0xf0]  ;;  %v6472_v32 = vadd.f32 %v5942_v7, %v2003_v11 }
 0x149   : > { %3316 = vst.msk [vmem:[#allocation3 + $0x28] sm:$0xf] %vm7673_vm11, %v3297_v1  ;;  %v2528_v24 = vsub.f32 1.0, %v2527_v15  ;;  %v6467_v2 = vpop.eup %4868  ;;  %v6475_v60 = vadd.f32 %v5942_v7, %v2048_v10  ;;  %vm6477_vm15 = vcmp.eq.f32.partialorder %v2520_v23, 8.507059e+37  ;;  %vm2442_vm12 = vweird.f32 %v6429_v16 }
 0x14a   : > { %3365 = vst.msk [vmem:[#allocation3 + $0x20] sm:$0xf] %vm7722_vm13, %v3345_v48  ;;  %vm6482_vm8 = vcmp.eq.f32.partialorder %v2445_v45, 8.507059e+37  ;;  %vm6487_vm13 = vcmp.eq.f32.partialorder %v2535_v33, 8.507059e+37  ;;  %v2272_v11 = vmul.f32 %v6467_v2, %v6417_v49  ;;  %vm2532_vm11 = vweird.f32 %v6448_v30  ;;  %vm6509_vm9 = vmor %vm2441_vm4, %vm2442_vm12 }
 0x14b   : > { %v2529_v14 = vmul.f32 %v6448_v30, %v2528_v24  ;;  %v2538_v23 = vor.u32 1.1754944e-38, %v2537_v17  ;;  %v4627_v44 = vor.u32 %v4712_v38, %v4624_v5  ;;  %4872 = vpow2.f32 %v2146_v62  ;;  %vm6525_vm4 = vmor %vm2531_vm6, %vm2532_vm11 }
 0x14c   : > { %v2515_v61 = vadd.f32 %v6387_v22, %v2514_v31  ;;  %v2260_v10 = vadd.f32 %v6419_v19, %v2259_v25  ;;  %v2440_v40 = vadd.f32 %v6429_v16, %v2439_v13  ;;  %v2273_v39 = vsub.f32 1.0, %v2272_v11  ;;  %v4871_v1 = vpop.eup %4870  ;;  %v3398_v25 = vpop.permute.xlu2 %3397 }
 0x14d   : > { %v2530_v18 = vadd.f32 %v6448_v30, %v2529_v14  ;;  %vm7733_vm3 = vcmask 130048   ;;  %v2074_v15 = vsub.f32 0.0, %v6472_v32  ;;  %v2092_v33 = vsub.f32 0.0, %v6475_v60 }
 0x14e   : > { %4681 = vmatmul.msk.bf16.gmra.mxu2 %vm7733_vm3, %v4627_v44  ;;  %v6518_v31 = vadd.f32 %v5942_v7, %v2005_v29  ;;  %vm7734_vm0 = vcmask 913152   ;;  %v2274_v13 = vmul.f32 %v6467_v2, %v2273_v39  ;;  %v2280_v24 = vand.u32 2147483647, %v6417_v49  ;;  %vm6541_vm3 = vmor %vm2261_vm1, %vm2262_vm14 }
 0x14f   : > { %v2050_v56 = vpop.f32.mrf.mxu3  ;;  %v3347_v3 = vpop.permute.xlu0 %3346  ;;  %v6531_v38 = vadd.f32 1.0, %v4871_v1  ;;  %vm7737_vm12 = vcmask 1044352   ;;  %v2282_v5 = vand.u32 2147483648, %v6417_v49  ;;  %v2112_v29 = vmul.f32 1.442695, %v2074_v15 }
 0x150   : > { %3366 = vst.msk [vmem:[#allocation3 + $0x28] sm:$0xf] %vm7734_vm0, %v3347_v3  ;;  %v3396_v17 = vpop.permute.xlu1 %3395  ;;  %v6534_v62 = vadd.f32 %v5942_v7, %v2050_v56  ;;  %v2148_v14 = vmul.f32 1.442695, %v2092_v33  ;;  %v2075_v11 = vsub.f32 0.0, %v6518_v31  ;;  %v2519_v7 = vsel %vm6499_vm10, %v6387_v22, %v2515_v61  ;;  %vm7740_vm1 = vmmov %vm7737_vm12 }
 0x151   : > { %3416 = vst.msk [vmem:[#allocation3 + $0x20] sm:$0xf] %vm7737_vm12, %v3396_v17  ;;  %v2264_v44 = vsel %vm6541_vm3, %v6419_v19, %v2260_v10  ;;  %vm2277_vm11 = vweird.f32 %v6467_v2  ;;  %4874 = vrcp.f32 %v6531_v38  ;;  %v4873_v39 = vpop.eup %4872  ;;  %v2444_v56 = vsel %vm6509_vm9, %v6429_v16, %v2440_v40  ;;  %v6626_v17 = vld [vmem:[%s7664_s7] ss:$0 sm:$0xff] }
 0x152   : > { %3417 = vst.msk [vmem:[#allocation3 + $0x28] sm:$0xf] %vm7740_vm1, %v3398_v25  ;;  %v2534_v45 = vsel %vm6525_vm4, %v6448_v30, %v2530_v18  ;;  %4876 = vpow2.f32 %v2112_v29  ;;  %v2114_v22 = vmul.f32 1.442695, %v2075_v11  ;;  %v2275_v61 = vadd.f32 %v6467_v2, %v2274_v13  ;;  %v6644_v29 = vld [vmem:[%s5362_s25 + $0x30] sm:$0xf] }
 0x153   : > { %v6563_v19 = vadd.f32 1.0, %v4873_v39  ;;  %4878 = vpow2.f32 %v2148_v14  ;;  %v2093_v10 = vsub.f32 0.0, %v6534_v62  ;;  %v6568_v3 = vmul.f32 %v6411_v6, %v6048_v34  ;;  %v2008_v30 = vpop.f32.mrf.mxu0 }
 0x154   : > { %v2524_v16 = vsel %vm6477_vm15, %v6435_v4, %v2519_v7  ;;  %vm2266_vm9 = vcmp.eq.f32.partialorder %v2265_v53, 8.507059e+37  ;;  %4880 = vpow2.f32 %v2114_v22  ;;  %v6577_v40 = vmul.f32 %v6415_v35, %v6060_v8 }
 0x155   : > { %v2269_v1 = vsel %vm2266_vm9, %v6454_v58, %v2264_v44  ;;  %vm2276_vm10 = vweird.f32 %v6417_v49  ;;  %4882 = vrcp.f32 %v6563_v19  ;;  %v6584_v34 = vmul.f32 %v6433_v37, %v6069_v21 }
 0x156   : > { %v2449_v26 = vsel %vm6482_vm8, %v6461_v12, %v2444_v56  ;;  %v2539_v6 = vsel %vm6487_vm13, %v2538_v23, %v2534_v45  ;;  %vm6593_vm14 = vmor %vm2276_vm10, %vm2277_vm11  ;;  %v2150_v35 = vmul.f32 1.442695, %v2093_v10  ;;  %v6600_v4 = vmul.f32 %v2524_v16, %v6176_v52 }
 0x157   : > { %v6597_v49 = vpop.eup %4874  ;;  %v2279_v21 = vsel %vm6593_vm14, %v6467_v2, %v2275_v61  ;;  %vm2281_vm6 = vcmp.eq.f32.partialorder %v2280_v24, 8.507059e+37  ;;  %v2283_v37 = vor.u32 1.1754944e-38, %v2282_v5  ;;  %v6606_v58 = vmul.f32 %v2269_v1, %v6216_v54 }
 0x158   : > { %v4877_v53 = vpop.eup %4876  ;;  %v2452_v12 = vmul.f32 %v6597_v49, %v6531_v38  ;;  %v2460_v28 = vand.u32 2147483647, %v6531_v38  ;;  %4884 = vpow2.f32 %v2150_v35  ;;  %v6613_v41 = vmul.f32 %v2449_v26, %v6219_v55 }
 0x159   : > { %v4879_v52 = vpop.eup %4878  ;;  %v6616_v2 = vmul.f32 %v2539_v6, %v6259_v0  ;;  %v2462_v23 = vand.u32 2147483648, %v6531_v38  ;;  %v6619_v48 = vadd.f32 1.0, %v4877_v53  ;;  %v2284_v18 = vsel %vm2281_vm6, %v2283_v37, %v2279_v21  ;;  %v4607_v0 = vld [vmem:[%s5362_s25 + $0x2c] sm:$0x1] }
 0x15a   : > { %v4881_v54 = vpop.eup %4880  ;;  %v2453_v15 = vsub.f32 1.0, %v2452_v12  ;;  %v6621_v33 = vadd.f32 1.0, %v4879_v52  ;;  %v6629_v55 = vadd.f32 %v6626_v17, %v2008_v30  ;;  %v2552_v43 = vand.u32 2147483648, %v6563_v19 }
 0x15b   : > { %v6632_v25 = vpop.eup %4882  ;;  %4886 = vrcp.f32 %v6619_v48  ;;  %v3493_v13 = vshrl.u32 %v4606_v9, 16  ;;  %v3496_v24 = vshll.u32 %v4606_v9, 16  ;;  %vm2456_vm15 = vweird.f32 %v6531_v38  ;;  %v2010_v10 = vpop.f32.mrf.mxu0 }
 0x15c   : > { %v2454_v42 = vmul.f32 %v6597_v49, %v2453_v15  ;;  %vm6638_vm8 = vcmp.eq.f32.partialorder %v2460_v28, 8.507059e+37  ;;  %4888 = vrcp.f32 %v6621_v33  ;;  %v6647_v14 = vmul.f32 %v2284_v18, %v6270_v36 }
 0x15d   : > { %v2463_v11 = vor.u32 1.1754944e-38, %v2462_v23  ;;  %v2542_v7 = vmul.f32 %v6632_v25, %v6563_v19  ;;  %v3502_v39 = vshll.u32 %v4607_v0, 16  ;;  %vm2457_vm13 = vweird.f32 %v6597_v49 }
 0x15e   : > { %v4885_v56 = vpop.eup %4884  ;;  %v2550_v45 = vand.u32 2147483647, %v6563_v19  ;;  %v6653_v22 = vadd.f32 1.0, %v4881_v54  ;;  %v2076_v61 = vsub.f32 0.0, %v6629_v55  ;;  %v6656_v16 = vor.u32 1.1754944e-38, %v2552_v43  ;;  %vm6672_vm0 = vmor %vm2456_vm15, %vm2457_vm13 }
 0x15f   : > { %v2053_v44 = vpop.f32.mrf.mxu3  ;;  %v6658_v36 = vrot.slane %v3493_v13, 4  ;;  %v6660_v30 = vrot.slane %v3496_v24, 5  ;;  %v2455_v26 = vadd.f32 %v6597_v49, %v2454_v42  ;;  %v2297_v6 = vand.u32 2147483648, %v6619_v48 }
 0x160   : > { %4890 = vrcp.f32 %v6653_v22  ;;  %v6666_v8 = vadd.f32 1.0, %v4885_v56  ;;  %v2543_v37 = vsub.f32 1.0, %v2542_v7  ;;  %vm2546_vm4 = vweird.f32 %v6563_v19 }
 0x161   : > { %v6668_v35 = vpop.eup %4886  ;;  %v2565_v53 = vand.u32 2147483647, %v6621_v33  ;;  %v6679_v12 = vadd.f32 %v6626_v17, %v2010_v10  ;;  %v6681_v28 = vrot.slane %v3502_v39, 5  ;;  %v2295_v38 = vand.u32 2147483647, %v6619_v48 }
 0x162   : > { %v6683_v9 = vpop.eup %4888  ;;  %v2287_v52 = vmul.f32 %v6668_v35, %v6619_v48  ;;  %v2116_v23 = vmul.f32 1.442695, %v2076_v61  ;;  %v6689_v54 = vadd.f32 %v6626_v17, %v2053_v44  ;;  %vm2547_vm12 = vweird.f32 %v6632_v25 }
 0x163   : > { %vm2291_vm3 = vweird.f32 %v6619_v48  ;;  %v2557_v18 = vmul.f32 %v6683_v9, %v6621_v33  ;;  %v2567_v15 = vand.u32 2147483648, %v6621_v33  ;;  %v2459_v0 = vsel %vm6672_vm0, %v6597_v49, %v2455_v26  ;;  %vm6762_vm0 = vmor %vm2546_vm4, %vm2547_vm12  ;;  %v4609_v48 = vld [vmem:[%s5362_s25 + $0x34] sm:$0x1] }
 0x164   : > { %v2288_v43 = vsub.f32 1.0, %v2287_v52  ;;  %v2298_v13 = vor.u32 1.1754944e-38, %v2297_v6  ;;  %4892 = vrcp.f32 %v6666_v8  ;;  %v2544_v24 = vmul.f32 %v6632_v25, %v2543_v37 }
 0x165   : > { %v2558_v42 = vsub.f32 1.0, %v2557_v18  ;;  %vm2561_vm11 = vweird.f32 %v6621_v33  ;;  %vm6702_vm1 = vcmp.eq.f32.partialorder %v2565_v53, 8.507059e+37  ;;  %vm6709_vm9 = vcmp.eq.f32.partialorder %v2295_v38, 8.507059e+37 }
 0x166   : > { %v6706_v44 = vpop.eup %4890  ;;  %v2289_v39 = vmul.f32 %v6668_v35, %v2288_v43  ;;  %vm2562_vm10 = vweird.f32 %v6683_v9  ;;  %4894 = vpow2.f32 %v2116_v23  ;;  %v2094_v49 = vsub.f32 0.0, %v6689_v54 }
 0x167   : > { %v2464_v61 = vsel %vm6638_vm8, %v2463_v11, %v2459_v0  ;;  %v2559_v10 = vmul.f32 %v6683_v9, %v2558_v42  ;;  %v2568_v26 = vor.u32 1.1754944e-38, %v2567_v15  ;;  %v2302_v6 = vmul.f32 %v6706_v44, %v6653_v22  ;;  %v2055_v21 = vpop.f32.mrf.mxu3  ;;  %vm6733_vm15 = vmor %vm2561_vm11, %vm2562_vm10  ;;  %v2013_v15 = vpop.f32.mrf.mxu0 }
 0x168   : > { %v2290_v37 = vadd.f32 %v6668_v35, %v2289_v39  ;;  %vm2292_vm14 = vweird.f32 %v6668_v35  ;;  %v2152_v53 = vmul.f32 1.442695, %v2094_v49  ;;  %v2077_v52 = vsub.f32 0.0, %v6679_v12 }
 0x169   : > { %v2545_v38 = vadd.f32 %v6632_v25, %v2544_v24  ;;  %vm6724_vm6 = vcmp.eq.f32.partialorder %v2550_v45, 8.507059e+37  ;;  %v2560_v5 = vadd.f32 %v6683_v9, %v2559_v10  ;;  %v2303_v18 = vsub.f32 1.0, %v2302_v6  ;;  %vm6749_vm13 = vmor %vm2291_vm3, %vm2292_vm14 }
 0x16a   : > { %vm2306_vm8 = vweird.f32 %v6653_v22  ;;  %v6738_v0 = vpop.eup %4892  ;;  %4896 = vpow2.f32 %v2152_v53  ;;  %v2118_v45 = vmul.f32 1.442695, %v2077_v52  ;;  %v6741_v43 = vadd.f32 %v6626_v17, %v2055_v21  ;;  %v2835_v53 = vld [vmem:[%s5362_s25 + $0x38] sm:$0xf]  ;;  %v2834_v52 = vld [vmem:[%s5362_s25 + $0x30] sm:$0xf] }
 0x16b   : > { %v3499_v33 = vor.u32 %v6660_v30, %v6658_v36  ;;  %v2304_v42 = vmul.f32 %v6706_v44, %v2303_v18  ;;  %v2310_v39 = vand.u32 2147483647, %v6653_v22  ;;  %v2312_v49 = vand.u32 2147483648, %v6653_v22  ;;  %2843 = vst.msk [vmem:[#allocation3 + $0x38] sm:$0xf] %vm1221_vm5, %v2835_v53 }
 0x16c   : > { %v2572_v10 = vmul.f32 %v6738_v0, %v6666_v8  ;;  %v4895_v6 = vpop.eup %4894  ;;  %v2294_v36 = vsel %vm6749_vm13, %v6668_v35, %v2290_v37  ;;  %v2564_v30 = vsel %vm6733_vm15, %v6683_v9, %v2560_v5  ;;  %4898 = vpow2.f32 %v2118_v45  ;;  %v2876_v35 = vpop.permute.xlu1 %2875  ;;  %2842 = vst.msk [vmem:[#allocation3 + $0x30] sm:$0xf] %vm1221_vm5, %v2834_v52 }
 0x16d   : > { %v6773_v21 = vadd.f32 %v6626_v17, %v2013_v15  ;;  %v6778_v19 = vmul.f32 %v2464_v61, %v6391_v20  ;;  %v2549_v18 = vsel %vm6762_vm0, %v6632_v25, %v2545_v38  ;;  %v6783_v24 = vadd.f32 1.0, %v4895_v6  ;;  %v2874_v9 = vpop.permute.xlu0 %2873  ;;  %2893 = vst.msk [vmem:[#allocation3 + $0x38] sm:$0xf] %vm2885_vm7, %v2876_v35 }
 0x16e   : > { %v2573_v1 = vsub.f32 1.0, %v2572_v10  ;;  %vm2307_vm4 = vweird.f32 %v6706_v44  ;;  %v2580_v37 = vand.u32 2147483647, %v6666_v8  ;;  %v2095_v5 = vsub.f32 0.0, %v6741_v43  ;;  %2892 = vst.msk [vmem:[#allocation3 + $0x30] sm:$0xf] %vm2885_vm7, %v2874_v9 }
 0x16f   : > { %v3500_v11 = vrot.slane %v3499_v33, 4  ;;  %v2299_v20 = vsel %vm6709_vm9, %v2298_v13, %v2294_v36  ;;  %v2569_v25 = vsel %vm6702_vm1, %v2568_v26, %v2564_v30  ;;  %v2305_v61 = vadd.f32 %v6706_v44, %v2304_v42  ;;  %vm6823_vm7 = vmor %vm2306_vm8, %vm2307_vm4  ;;  %v3038_v36 = vpop.permute.xlu2 %3037 }
 0x170   : > { %4900 = vrcp.f32 %v6783_v24  ;;  %v4897_v38 = vpop.eup %4896  ;;  %vm6797_vm12 = vcmp.eq.f32.partialorder %v2310_v39, 8.507059e+37  ;;  %v2313_v45 = vor.u32 1.1754944e-38, %v2312_v49  ;;  %v2574_v33 = vmul.f32 %v6738_v0, %v2573_v1 }
 0x171   : > { %v2078_v56 = vsub.f32 0.0, %v6773_v21  ;;  %vm2576_vm3 = vweird.f32 %v6666_v8  ;;  %v2582_v13 = vand.u32 2147483648, %v6666_v8  ;;  %v6806_v7 = vadd.f32 1.0, %v4897_v38 }
 0x172   : > { %v2154_v26 = vmul.f32 1.442695, %v2095_v5  ;;  %v4899_v42 = vpop.eup %4898  ;;  %v6811_v39 = vsel %vm6724_vm6, %v6656_v16, %v2549_v18  ;;  %v6814_v1 = vmul.f32 %v2299_v20, %v6472_v32  ;;  %v6817_v49 = vmul.f32 %v2569_v25, %v6475_v60  ;;  %v4630_v20 = vld [vmem:[#allocation3 + $0x20] sm:$0xf]  ;;  %v4715_v25 = vld [vmem:[#allocation3 + $0x24] sm:$0xf0] }
 0x173   : > { %v3505_v23 = vsel %vm5375_vm2, %v3500_v11, %v6681_v28  ;;  %v2309_v32 = vsel %vm6823_vm7, %v6706_v44, %v2305_v61  ;;  %vm6833_vm11 = vcmp.eq.f32.partialorder %v2580_v37, 8.507059e+37  ;;  %v2325_v60 = vand.u32 2147483647, %v6783_v24  ;;  %v2058_v61 = vpop.f32.mrf.mxu3 }
 0x174   : > { %4902 = vrcp.f32 %v6806_v7  ;;  %3560 = vst.msk [vmem:[#allocation3 + $0x24] sm:$0xf] %vm1221_vm5, %v3505_v23  ;;  %v2575_v22 = vadd.f32 %v6738_v0, %v2574_v33  ;;  %vm2577_vm1 = vweird.f32 %v6738_v0  ;;  %v6842_v6 = vadd.f32 1.0, %v4899_v42  ;;  %v3088_v18 = vpop.permute.xlu1 %3087 }
 0x175   : > { %v2120_v28 = vmul.f32 1.442695, %v2078_v56  ;;  %v2583_v30 = vor.u32 1.1754944e-38, %v2582_v13  ;;  %v2327_v53 = vand.u32 2147483648, %v6783_v24  ;;  %4904 = vpow2.f32 %v2154_v26  ;;  %v3040_v35 = vpop.permute.xlu0 %3039  ;;  %vm6865_vm14 = vmor %vm2576_vm3, %vm2577_vm1  ;;  %v2015_v56 = vpop.f32.mrf.mxu0 }
 0x176   : > { %v6845_v44 = vpop.eup %4900  ;;  %v3510_v52 = vshll.u32 %v6644_v29, 16  ;;  %vm7765_vm9 = vcmask 388352   ;;  %v2684_v37 = vmax.f32 %v6613_v41, %v6817_v49  ;;  %v6856_v5 = vsel %vm6797_vm12, %v2313_v45, %v2309_v32 }
 0x177   : > { %3056 = vst.msk [vmem:[#allocation3 + $0x30] sm:$0xf] %vm7765_vm9, %v3038_v36  ;;  %v2317_v11 = vmul.f32 %v6845_v44, %v6783_v24  ;;  %vm7766_vm10 = vcmask 519552   ;;  %vm2321_vm6 = vweird.f32 %v6783_v24  ;;  %vm6870_vm15 = vcmp.eq.f32.partialorder %v2325_v60, 8.507059e+37  ;;  %vm7772_vm8 = vmmov %vm7765_vm9 }
 0x178   : > { %3106 = vst.msk [vmem:[#allocation3 + $0x30] sm:$0xf] %vm7766_vm10, %v3088_v18  ;;  %4906 = vrcp.f32 %v6842_v6  ;;  %v7771_v45 = vshrl.u32 %v6644_v29, 16  ;;  %v2579_v8 = vsel %vm6865_vm14, %v6738_v0, %v2575_v22  ;;  %v3512_v26 = vrot.slane %v3510_v52, 5  ;;  %vm7775_vm12 = vmmov %vm7766_vm10 }
 0x179   : > { %3057 = vst.msk [vmem:[#allocation3 + $0x38] sm:$0xf] %vm7772_vm8, %v3040_v35  ;;  %v2318_v13 = vsub.f32 1.0, %v2317_v11  ;;  %4908 = vpow2.f32 %v2120_v28  ;;  %v2328_v10 = vor.u32 1.1754944e-38, %v2327_v53  ;;  %v3516_v23 = vshll.u32 %v4609_v48, 16 }
 0x17a   : > { %v3509_v33 = vrot.slane %v7771_v45, 4  ;;  %v6881_v42 = vpop.eup %4902  ;;  %v4631_v32 = vor.u32 %v4715_v25, %v4630_v20  ;;  %v6884_v60 = vadd.f32 %v6626_v17, %v2058_v61  ;;  %vm2322_vm13 = vweird.f32 %v6845_v44  ;;  %v3090_v20 = vpop.permute.xlu2 %3089 }
 0x17b   : > { %v2319_v29 = vmul.f32 %v6845_v44, %v2318_v13  ;;  %v2587_v36 = vmul.f32 %v6881_v42, %v6806_v7  ;;  %vm2591_vm0 = vweird.f32 %v6806_v7  ;;  %v4905_v0 = vpop.eup %4904  ;;  %v2584_v22 = vsel %vm6833_vm11, %v2583_v30, %v2579_v8  ;;  %vm6905_vm4 = vmor %vm2321_vm6, %vm2322_vm13  ;;  %3107 = vst.msk [vmem:[#allocation3 + $0x38] sm:$0xf] %vm7775_vm12, %v3090_v20 }
 0x17c   : > { %v2595_v28 = vand.u32 2147483647, %v6806_v7  ;;  %v3513_v48 = vor.u32 %v3512_v26, %v3509_v33  ;;  %3714 = vmatmul.bf16.gmra.mxu1 %v4631_v32  ;;  %v2096_v53 = vsub.f32 0.0, %v6884_v60  ;;  %v2597_v35 = vand.u32 2147483648, %v6806_v7  ;;  %v3140_v33 = vpop.permute.xlu1 %3139 }
 0x17d   : > { %v2320_v52 = vadd.f32 %v6845_v44, %v2319_v29  ;;  %v2588_v18 = vsub.f32 1.0, %v2587_v36  ;;  %v6897_v11 = vadd.f32 1.0, %v4905_v0  ;;  %v3518_v61 = vrot.slane %v3516_v23, 5  ;;  %v3138_v8 = vpop.permute.xlu0 %3137 }
 0x17e   : > { %v6899_v25 = vpop.eup %4906  ;;  %v3514_v30 = vrot.slane %v3513_v48, 4  ;;  %v2156_v38 = vmul.f32 1.442695, %v2096_v53  ;;  %v6910_v45 = vadd.f32 %v6626_v17, %v2015_v56  ;;  %vm2592_vm3 = vweird.f32 %v6881_v42  ;;  %v2060_v53 = vpop.f32.mrf.mxu3 }
 0x17f   : > { %v4909_v13 = vpop.eup %4908  ;;  %v2324_v26 = vsel %vm6905_vm4, %v6845_v44, %v2320_v52  ;;  %v2589_v24 = vmul.f32 %v6881_v42, %v2588_v18  ;;  %v2332_v23 = vmul.f32 %v6899_v25, %v6842_v6  ;;  %vm7776_vm7 = vcmask 650752   ;;  %vm6934_vm1 = vmor %vm2591_vm0, %vm2592_vm3 }
 0x180   : > { %3157 = vst.msk [vmem:[#allocation3 + $0x38] sm:$0xf] %vm7776_vm7, %v3140_v33  ;;  %v6922_v56 = vmul.f32 %v2584_v22, %v6534_v62  ;;  %v2329_v32 = vsel %vm6870_vm15, %v2328_v10, %v2324_v26  ;;  %v2340_v29 = vand.u32 2147483647, %v6842_v6  ;;  %4910 = vrcp.f32 %v6897_v11  ;;  %vm7777_vm11 = vmmov %vm7776_vm7  ;;  %v2018_v22 = vpop.f32.mrf.mxu0 }
 0x181   : > { %3156 = vst.msk [vmem:[#allocation3 + $0x30] sm:$0xf] %vm7777_vm11, %v3138_v8  ;;  %v2330_v44 = vmul.f32 %v2329_v32, %v6629_v55  ;;  %v2590_v36 = vadd.f32 %v6881_v42, %v2589_v24  ;;  %v2333_v0 = vsub.f32 1.0, %v2332_v23  ;;  %v2342_v48 = vand.u32 2147483648, %v6842_v6 }
 0x182   : > { %v6938_v15 = vadd.f32 1.0, %v4909_v13  ;;  %v3519_v10 = vsel %vm5375_vm2, %v3514_v30, %v3518_v61  ;;  %4912 = vpow2.f32 %v2156_v38  ;;  %v2079_v55 = vsub.f32 0.0, %v6910_v45  ;;  %v3299_v33 = vpop.permute.xlu2 %3298 }
 0x183   : > { %v2676_v52 = vmax.f32 %v6111_v50, %v2330_v44  ;;  %vm6944_vm9 = vcmp.eq.f32.partialorder %v2595_v28, 8.507059e+37  ;;  %v2598_v7 = vor.u32 1.1754944e-38, %v2597_v35  ;;  %v2334_v20 = vmul.f32 %v6899_v25, %v2333_v0  ;;  %3561 = vst.msk [vmem:[#allocation3 + $0x2c] sm:$0xf] %vm1221_vm5, %v3519_v10 }
 0x184   : > { %v2685_v16 = vmax.f32 %v6778_v19, %v6922_v56  ;;  %vm2337_vm10 = vweird.f32 %v6899_v25  ;;  %4914 = vrcp.f32 %v6938_v15  ;;  %v6955_v30 = vadd.f32 %v6626_v17, %v2060_v53  ;;  %v3349_v24 = vpop.permute.xlu1 %3348 }
 0x185   : > { %v6960_v28 = vmax.f32 %v2676_v52, %v2684_v37  ;;  %v2594_v35 = vsel %vm6934_vm1, %v6881_v42, %v2590_v36  ;;  %v2335_v61 = vadd.f32 %v6899_v25, %v2334_v20  ;;  %v6967_v38 = vadd.f32 %v6626_v17, %v2018_v22 }
 0x186   : > { %v6969_v8 = vpop.eup %4910  ;;  %vm2336_vm14 = vweird.f32 %v6842_v6  ;;  %vm6972_vm6 = vcmp.eq.f32.partialorder %v2340_v29, 8.507059e+37  ;;  %v2343_v37 = vor.u32 1.1754944e-38, %v2342_v48  ;;  %v2122_v26 = vmul.f32 1.442695, %v2079_v55  ;;  %v3301_v6 = vpop.permute.xlu0 %3300  ;;  %v4714_v48 = vld [vmem:[#allocation3 + $0x24] sm:$0xf] }
 0x187   : > { %v2724_v23 = vsub.f32 %v2330_v44, %v6960_v28  ;;  %vm2338_vm15 = vmor %vm2336_vm14, %vm2337_vm10  ;;  %vm2606_vm8 = vweird.f32 %v6897_v11  ;;  %v2610_v42 = vand.u32 2147483647, %v6897_v11  ;;  %v2612_v32 = vand.u32 2147483648, %v6897_v11 }
 0x188   : > { %vm7784_vm13 = vcmask 781952   ;;  %v4913_v29 = vpop.eup %4912  ;;  %v2599_v36 = vsel %vm6944_vm9, %v2598_v7, %v2594_v35  ;;  %v2339_v0 = vsel %vm2338_vm15, %v6899_v25, %v2335_v61  ;;  %v2602_v44 = vmul.f32 %v6969_v8, %v6897_v11 }
 0x189   : > { %3317 = vst.msk [vmem:[#allocation3 + $0x30] sm:$0xf] %vm7784_vm13, %v3299_v33  ;;  %vm2351_vm0 = vweird.f32 %v6938_v15  ;;  %vm7785_vm4 = vcmask 913152   ;;  %v2732_v53 = vmul.f32 1.442695, %v2724_v23  ;;  %v2344_v62 = vsel %vm6972_vm6, %v2343_v37, %v2339_v0  ;;  %vm7786_vm12 = vmmov %vm7784_vm13 }
 0x18a   : > { %3367 = vst.msk [vmem:[#allocation3 + $0x30] sm:$0xf] %vm7785_vm4, %v3349_v24  ;;  %v2097_v10 = vsub.f32 0.0, %v6955_v30  ;;  %v2080_v55 = vsub.f32 0.0, %v6967_v38  ;;  %v4915_v22 = vpop.eup %4914  ;;  %v2345_v52 = vmul.f32 %v2344_v62, %v6679_v12  ;;  %v2603_v25 = vsub.f32 1.0, %v2602_v44  ;;  %v2063_v44 = vpop.f32.mrf.mxu3 }
 0x18b   : > { %v4632_v18 = vld [vmem:[#allocation3 + $0x28] sm:$0xf0]  ;;  %v6995_v7 = vadd.f32 1.0, %v4913_v29  ;;  %4916 = vpow2.f32 %v2122_v26  ;;  %3318 = vst.msk [vmem:[#allocation3 + $0x38] sm:$0xf] %vm7786_vm12, %v3301_v6  ;;  %v2347_v20 = vmul.f32 %v4915_v22, %v6938_v15  ;;  %v7001_v33 = vmul.f32 %v2599_v36, %v6689_v54 }
 0x18c   : > { %4918 = vpow2.f32 %v2732_v53  ;;  %v2355_v35 = vand.u32 2147483647, %v6938_v15  ;;  %v4635_v61 = vor.u32 %v4714_v48, %v4632_v18  ;;  %v2677_v13 = vmax.f32 %v6222_v46, %v2345_v52 }
 0x18d   : > { %v2604_v12 = vmul.f32 %v6969_v8, %v2603_v25  ;;  %4920 = vrcp.f32 %v6995_v7  ;;  %vm2607_vm3 = vweird.f32 %v6969_v8  ;;  %v2348_v37 = vsub.f32 1.0, %v2347_v20 }
 0x18e   : > { %v2357_v26 = vand.u32 2147483648, %v6938_v15  ;;  %vm7787_vm7 = vcmask 130048   ;;  %v2158_v24 = vmul.f32 1.442695, %v2097_v10  ;;  %v2748_v23 = vsub.f32 %v6613_v41, %v6960_v28  ;;  %vm7022_vm1 = vmor %vm2606_vm8, %vm2607_vm3 }
 0x18f   : > { %4682 = vmatmul.msk.bf16.gmra.mxu2 %vm7787_vm7, %v4635_v61  ;;  %v7011_v6 = vmax.f32 %v2677_v13, %v2685_v16  ;;  %v2605_v54 = vadd.f32 %v6969_v8, %v2604_v12  ;;  %v2124_v29 = vmul.f32 1.442695, %v2080_v55  ;;  %v2772_v36 = vsub.f32 %v6817_v49, %v6960_v28 }
 0x190   : > { %v2349_v0 = vmul.f32 %v4915_v22, %v2348_v37  ;;  %vm2352_vm11 = vweird.f32 %v4915_v22  ;;  %4922 = vpow2.f32 %v2158_v24  ;;  %v2686_v53 = vmax.f32 %v6212_v51, %v7001_v33 }
 0x191   : > { %v4917_v48 = vpop.eup %4916  ;;  %vm7026_vm9 = vcmp.eq.f32.partialorder %v2610_v42, 8.507059e+37  ;;  %v2613_v49 = vor.u32 1.1754944e-38, %v2612_v32  ;;  %vm7030_vm10 = vcmp.eq.f32.partialorder %v2355_v35, 8.507059e+37  ;;  %v2609_v55 = vsel %vm7022_vm1, %v6969_v8, %v2605_v54  ;;  %vm2353_vm14 = vmor %vm2351_vm0, %vm2352_vm11 }
 0x192   : > { %v7034_v10 = vpop.eup %4918  ;;  %v2350_v11 = vadd.f32 %v4915_v22, %v2349_v0  ;;  %v7039_v25 = vadd.f32 1.0, %v4917_v48  ;;  %4924 = vpow2.f32 %v2124_v29  ;;  %v7043_v42 = vmul.f32 1.442695, %v2748_v23 }
 0x193   : > { %v7041_v18 = vpop.eup %4920  ;;  %v2725_v32 = vsub.f32 %v2345_v52, %v7011_v6  ;;  %v2358_v20 = vor.u32 1.1754944e-38, %v2357_v26  ;;  %v7050_v35 = vadd.f32 %v6626_v17, %v2063_v44  ;;  %3922 = vrot.lane.b32.xlu2 %v7034_v10, %s5127_s28  ;;  %v7054_v8 = vmul.f32 1.442695, %v2772_v36 }
 0x194   : > { %v2354_v61 = vsel %vm2353_vm14, %v4915_v22, %v2350_v11  ;;  %v2617_v13 = vmul.f32 %v7041_v18, %v6995_v7  ;;  %4926 = vrcp.f32 %v7039_v25  ;;  %v2614_v52 = vsel %vm7026_vm9, %v2613_v49, %v2609_v55 }
 0x195   : > { %v2359_v15 = vsel %vm7030_vm10, %v2358_v20, %v2354_v61  ;;  %v2625_v12 = vand.u32 2147483647, %v6995_v7  ;;  %v2627_v37 = vand.u32 2147483648, %v6995_v7  ;;  %v2749_v24 = vsub.f32 %v6778_v19, %v7011_v6 }
 0x196   : > { %v4923_v26 = vpop.eup %4922  ;;  %v7068_v22 = vmul.f32 %v2359_v15, %v6773_v21  ;;  %v2618_v23 = vsub.f32 1.0, %v2617_v13  ;;  %vm2621_vm6 = vweird.f32 %v6995_v7  ;;  %v2734_v54 = vmul.f32 1.442695, %v2725_v32  ;;  %v2020_v32 = vpop.f32.mrf.mxu0 }
 0x197   : > { %v2773_v29 = vsub.f32 %v6922_v56, %v7011_v6  ;;  %v7073_v36 = vadd.f32 1.0, %v4923_v26  ;;  %v2098_v0 = vsub.f32 0.0, %v7050_v35  ;;  %v7077_v48 = vmul.f32 %v2614_v52, %v6741_v43  ;;  %v2065_v15 = vpop.f32.mrf.mxu3 }
 0x198   : > { %v4925_v44 = vpop.eup %4924  ;;  %v2678_v19 = vmax.f32 %v6348_v27, %v7068_v22  ;;  %v2619_v21 = vmul.f32 %v7041_v18, %v2618_v23  ;;  %vm2622_vm15 = vweird.f32 %v7041_v18  ;;  %vm7083_vm8 = vcmp.eq.f32.partialorder %v2625_v12, 8.507059e+37 }
 0x199   : > { %v2628_v56 = vor.u32 1.1754944e-38, %v2627_v37  ;;  %v2370_v16 = vand.u32 2147483647, %v7039_v25  ;;  %4928 = vrcp.f32 %v7073_v36  ;;  %v2372_v55 = vand.u32 2147483648, %v7039_v25  ;;  %vm7101_vm13 = vmor %vm2621_vm6, %vm2622_vm15 }
 0x19a   : > { %v4927_v49 = vpop.eup %4926  ;;  %v7089_v62 = vmax.f32 %v2678_v19, %v2686_v53  ;;  %v2620_v43 = vadd.f32 %v7041_v18, %v2619_v21  ;;  %v7093_v11 = vadd.f32 1.0, %v4925_v44  ;;  %v7095_v20 = vmul.f32 1.442695, %v2749_v24  ;;  %v3351_v44 = vpop.permute.xlu2 %3350 }
 0x19b   : > { %v7097_v61 = vmul.f32 1.442695, %v2773_v29  ;;  %v2362_v53 = vmul.f32 %v4927_v49, %v7039_v25  ;;  %v2160_v52 = vmul.f32 1.442695, %v2098_v0  ;;  %4930 = vpow2.f32 %v2734_v54 }
 0x19c   : > { %v2642_v26 = vand.u32 2147483648, %v7073_v36  ;;  %vm2366_vm0 = vweird.f32 %v7039_v25  ;;  %4932 = vrcp.f32 %v7093_v11  ;;  %v7114_v7 = vadd.f32 %v6626_v17, %v2020_v32  ;;  %v4610_v32 = vld [vmem:[%s5362_s25 + $0x38] sm:$0xf] }
 0x19d   : > { %v2363_v24 = vsub.f32 1.0, %v2362_v53  ;;  %v2624_v23 = vsel %vm7101_vm13, %v7041_v18, %v2620_v43  ;;  %vm7119_vm4 = vcmp.eq.f32.partialorder %v2370_v16, 8.507059e+37  ;;  %v2373_v29 = vor.u32 1.1754944e-38, %v2372_v55  ;;  %v3402_v18 = vpop.permute.xlu1 %3401  ;;  %v3400_v16 = vpop.permute.xlu0 %3399 }
 0x19e   : > { %v7124_v0 = vadd.f32 %v6626_v17, %v2065_v15  ;;  %vm2367_vm12 = vweird.f32 %v4927_v49  ;;  %vm2636_vm3 = vweird.f32 %v7073_v36  ;;  %4934 = vpow2.f32 %v2160_v52 }
 0x19f   : > { %v7126_v19 = vpop.eup %4928  ;;  %v2364_v21 = vmul.f32 %v4927_v49, %v2363_v24  ;;  %vm7800_vm7 = vcmask 913152   ;;  %v2726_v43 = vsub.f32 %v7068_v22, %v7089_v62  ;;  %v2640_v55 = vand.u32 2147483647, %v7073_v36  ;;  %vm2368_vm9 = vmor %vm2366_vm0, %vm2367_vm12 }
 0x1a0   : > { %3368 = vst.msk [vmem:[#allocation3 + $0x38] sm:$0xf] %vm7800_vm7, %v3351_v44  ;;  %v2632_v17 = vmul.f32 %v7126_v19, %v7073_v36  ;;  %v7136_v13 = vor.u32 1.1754944e-38, %v2642_v26  ;;  %vm7801_vm11 = vcmask 1044352   ;;  %v2774_v53 = vsub.f32 %v7001_v33, %v7089_v62 }
 0x1a1   : > { %3419 = vst.msk [vmem:[#allocation3 + $0x38] sm:$0xf] %vm7801_vm11, %v3402_v18  ;;  %v2629_v52 = vsel %vm7083_vm8, %v2628_v56, %v2624_v23  ;;  %v2365_v15 = vadd.f32 %v4927_v49, %v2364_v21  ;;  %v2081_v24 = vsub.f32 0.0, %v7114_v7  ;;  %vm7802_vm1 = vmmov %vm7801_vm11  ;;  %v7145_v22 = vpop.eup %4930  ;;  %vm2381_vm10 = vweird.f32 %v7093_v11 }
 0x1a2   : > { %3418 = vst.msk [vmem:[#allocation3 + $0x30] sm:$0xf] %vm7802_vm1, %v3400_v16  ;;  %v2633_v26 = vsub.f32 1.0, %v2632_v17  ;;  %v2385_v44 = vand.u32 2147483647, %v7093_v11  ;;  %v2099_v33 = vsub.f32 0.0, %v7124_v0  ;;  %v4933_v41 = vpop.eup %4932  ;;  %4936 = vpow2.f32 %v7043_v42 }
 0x1a3   : > { %v2369_v56 = vsel %vm2368_vm9, %v4927_v49, %v2365_v15  ;;  %v2126_v23 = vmul.f32 1.442695, %v2081_v24  ;;  %v3521_v21 = vshrl.u32 %v4610_v32, 16  ;;  %v2377_v16 = vmul.f32 %v4933_v41, %v7093_v11 }
 0x1a4   : > { %v2374_v18 = vsel %vm7119_vm4, %v2373_v29, %v2369_v56  ;;  %v2634_v25 = vmul.f32 %v7126_v19, %v2633_v26  ;;  %v3524_v17 = vshll.u32 %v4610_v32, 16  ;;  %v4935_v9 = vpop.eup %4934  ;;  %vm7159_vm14 = vcmp.eq.f32.partialorder %v2640_v55, 8.507059e+37  ;;  %v4611_v29 = vld [vmem:[%s5362_s25 + $0x3c] sm:$0x1] }
 0x1a5   : > { %v2375_v37 = vmul.f32 %v2374_v18, %v6910_v45  ;;  %v2387_v49 = vand.u32 2147483648, %v7093_v11  ;;  %4938 = vpow2.f32 %v2126_v23  ;;  %v2162_v15 = vmul.f32 1.442695, %v2099_v33 }
 0x1a6   : > { %vm2637_vm6 = vweird.f32 %v7126_v19  ;;  %v2378_v42 = vsub.f32 1.0, %v2377_v16  ;;  %vm2382_vm15 = vweird.f32 %v4933_v41  ;;  %v7165_v54 = vadd.f32 1.0, %v4935_v9 }
 0x1a7   : > { %v2679_v32 = vmax.f32 %v6568_v3, %v2375_v37  ;;  %v2635_v24 = vadd.f32 %v7126_v19, %v2634_v25  ;;  %4940 = vpow2.f32 %v2162_v15  ;;  %v3523_v26 = vrot.slane %v3521_v21, 4  ;;  %vm7194_vm8 = vmor %vm2636_vm3, %vm2637_vm6 }
 0x1a8   : > { %v2379_v55 = vmul.f32 %v4933_v41, %v2378_v42  ;;  %4942 = vrcp.f32 %v7165_v54  ;;  %v3526_v33 = vrot.slane %v3524_v17, 5  ;;  %v7173_v56 = vpop.eup %4936  ;;  %v2736_v23 = vmul.f32 1.442695, %v2726_v43  ;;  %vm2383_vm13 = vmor %vm2381_vm10, %vm2382_vm15 }
 0x1a9   : > { %v7176_v9 = vmul.f32 %v2629_v52, %v6884_v60  ;;  %v7805_v18 = vmax.f32 %v6254_v63, %v7077_v48  ;;  %v3530_v25 = vshll.u32 %v4611_v29, 16  ;;  %v7806_v15 = vsub.f32 %v6212_v51, %v7089_v62  ;;  %4002 = vrot.lane.b32.xlu0 %v7173_v56, %s5128_s30 }
 0x1aa   : > { %v7188_v45 = vmul.f32 1.442695, %v2774_v53  ;;  %v2380_v43 = vadd.f32 %v4933_v41, %v2379_v55  ;;  %4944 = vpow2.f32 %v7095_v20  ;;  %v2639_v36 = vsel %vm7194_vm8, %v7126_v19, %v2635_v24 }
 0x1ab   : > { %v7181_v16 = vmax.f32 %v2679_v32, %v7805_v18  ;;  %v7186_v42 = vmul.f32 1.442695, %v7806_v15  ;;  %v4939_v52 = vpop.eup %4938  ;;  %v2388_v21 = vor.u32 1.1754944e-38, %v2387_v49  ;;  %vm2386_vm0 = vcmp.eq.f32.partialorder %v2385_v44, 8.507059e+37  ;;  %v4638_v44 = vld [vmem:[#allocation3 + $0x30] sm:$0xf] }
 0x1ac   : > { %v2384_v17 = vsel %vm2383_vm13, %v4933_v41, %v2380_v43  ;;  %v7210_v29 = vadd.f32 1.0, %v4939_v52  ;;  %v3527_v20 = vor.u32 %v3526_v33, %v3523_v26  ;;  %4946 = vpow2.f32 %v2736_v23  ;;  %v4717_v41 = vld [vmem:[#allocation3 + $0x34] sm:$0xf0] }
 0x1ad   : > { %v2727_v51 = vsub.f32 %v2375_v37, %v7181_v16  ;;  %v2751_v53 = vsub.f32 %v6254_v63, %v7181_v16  ;;  %v4941_v32 = vpop.eup %4940  ;;  %v2688_v37 = vmax.f32 %v6584_v34, %v7176_v9  ;;  %v2389_v63 = vsel %vm2386_vm0, %v2388_v21, %v2384_v17 }
 0x1ae   : > { %v3532_v55 = vrot.slane %v3530_v25, 5  ;;  %v4943_v18 = vpop.eup %4942  ;;  %v2644_v19 = vsel %vm7159_vm14, %v7136_v13, %v2639_v36  ;;  %v7218_v11 = vmul.f32 %v2389_v63, %v6967_v38  ;;  %vm2651_vm4 = vweird.f32 %v7165_v54 }
 0x1af   : > { %4948 = vrcp.f32 %v7210_v29  ;;  %v2738_v49 = vmul.f32 1.442695, %v2727_v51  ;;  %v2647_v24 = vmul.f32 %v4943_v18, %v7165_v54  ;;  %v2655_v26 = vand.u32 2147483647, %v7165_v54 }
 0x1b0   : > { %v2657_v33 = vand.u32 2147483648, %v7165_v54  ;;  %v7225_v23 = vpop.eup %4944  ;;  %v2680_v12 = vmax.f32 %v6606_v58, %v7218_v11  ;;  %v2400_v38 = vand.u32 2147483647, %v7210_v29  ;;  %v7230_v13 = vadd.f32 1.0, %v4941_v32 }
 0x1b1   : > { %v3528_v25 = vrot.slane %v3527_v20, 4  ;;  %v2648_v15 = vsub.f32 1.0, %v2647_v24  ;;  %vm2652_vm12 = vweird.f32 %v4943_v18  ;;  %4004 = vrot.lane.b32.xlu1 %v7225_v23, %s5128_s30  ;;  %4950 = vpow2.f32 %v7054_v8  ;;  %3924 = vrot.lane.b32.xlu0 %v7145_v22, %s5127_s28  ;;  %v7257_v20 = vld [vmem:[%s7666_s9] ss:$0 sm:$0xff] }
 0x1b2   : > { %v4639_v60 = vor.u32 %v4717_v41, %v4638_v44  ;;  %v7236_v43 = vmul.f32 %v2644_v19, %v6955_v30  ;;  %v7238_v52 = vmax.f32 %v2680_v12, %v2688_v37  ;;  %v2402_v51 = vand.u32 2147483648, %v7210_v29  ;;  %v7244_v36 = vpop.eup %4946  ;;  %vm7264_vm7 = vmor %vm2651_vm4, %vm2652_vm12  ;;  %v3734_v12 = vpop.f32.mrf.mxu2 }
 0x1b3   : > { %4952 = vrcp.f32 %v7230_v13  ;;  %v2775_v21 = vsub.f32 %v7077_v48, %v7181_v16  ;;  %v2649_v17 = vmul.f32 %v4943_v18, %v2648_v15  ;;  %vm7248_vm3 = vcmp.eq.f32.partialorder %v2655_v26, 8.507059e+37 }
 0x1b4   : > { %v3533_v30 = vsel %vm5375_vm2, %v3528_v25, %v3532_v55  ;;  %3719 = vmatmul.bf16.gmra.mxu1 %v4639_v60  ;;  %v2762_v37 = vmul.f32 1.442695, %v2751_v53  ;;  %v2752_v63 = vsub.f32 %v6584_v34, %v7238_v52  ;;  %v2658_v57 = vor.u32 1.1754944e-38, %v2657_v33  ;;  %v3705_v55 = vpop.f32.mrf.mxu1 }
 0x1b5   : > { %v4949_v32 = vpop.eup %4948  ;;  %vm2396_vm2 = vweird.f32 %v7210_v29  ;;  %3562 = vst.msk [vmem:[#allocation3 + $0x34] sm:$0xf] %vm1221_vm5, %v3533_v30  ;;  %4954 = vpow2.f32 %v2738_v49  ;;  %v2650_v44 = vadd.f32 %v4943_v18, %v2649_v17  ;;  %vm7271_vm11 = vcmp.eq.f32.partialorder %v2400_v38, 8.507059e+37 }
 0x1b6   : > { %v2392_v53 = vmul.f32 %v4949_v32, %v7210_v29  ;;  %v2403_v34 = vor.u32 1.1754944e-38, %v2402_v51  ;;  %vm2666_vm1 = vweird.f32 %v7230_v13  ;;  %v2670_v54 = vand.u32 2147483647, %v7230_v13 }
 0x1b7   : > { %4956 = vpow2.f32 %v7097_v61  ;;  %v7278_v24 = vpop.eup %4950  ;;  %v2654_v26 = vsel %vm7264_vm7, %v4943_v18, %v2650_v44  ;;  %v3706_v33 = vadd.f32 %v7257_v20, %v3705_v55  ;;  %v2728_v25 = vsub.f32 %v7218_v11, %v7238_v52  ;;  %v4640_v11 = vld [vmem:[#allocation3 + $0x38] sm:$0xf0] }
 0x1b8   : > { %v2393_v49 = vsub.f32 1.0, %v2392_v53  ;;  %4958 = vpow2.f32 %v7186_v42  ;;  %v2659_v15 = vsel %vm7248_vm3, %v2658_v57, %v2654_v26  ;;  %v2672_v61 = vand.u32 2147483648, %v7230_v13  ;;  %4082 = vrot.lane.b32.xlu2 %v7278_v24, %s5130_s19 }
 0x1b9   : > { %v7284_v38 = vpop.eup %4952  ;;  %v2701_v18 = vsub.f32 %v6222_v46, %v7011_v6  ;;  %v7296_v42 = vmul.f32 %v2659_v15, %v7050_v35  ;;  %vm2397_vm5 = vweird.f32 %v4949_v32  ;;  %3926 = vrot.lane.b32.xlu1 %v7244_v36, %s5127_s28  ;;  %4960 = vpow2.f32 %v7188_v45 }
 0x1ba   : > { %v2394_v60 = vmul.f32 %v4949_v32, %v2393_v49  ;;  %v2662_v51 = vmul.f32 %v7284_v38, %v7230_v13  ;;  %v7303_v17 = vadd.f32 %v3734_v12, %v3706_v33  ;;  %v7815_v8 = vsub.f32 %v6111_v50, %v6960_v28  ;;  %vm2398_vm9 = vmor %vm2396_vm2, %vm2397_vm5 }
 0x1bb   : > { %v2702_v6 = vsub.f32 %v6348_v27, %v7089_v62  ;;  %v7310_v35 = vpop.eup %4954  ;;  %v2764_v30 = vmul.f32 1.442695, %v2752_v63  ;;  %v2690_v19 = vmax.f32 %v6616_v2, %v7296_v42  ;;  %v2673_v50 = vor.u32 1.1754944e-38, %v2672_v61 }
 0x1bc   : > { %v2708_v46 = vmul.f32 1.442695, %v7815_v8  ;;  %v2395_v57 = vadd.f32 %v4949_v32, %v2394_v60  ;;  %v2663_v55 = vsub.f32 1.0, %v2662_v51  ;;  %v4716_v44 = vld [vmem:[#allocation3 + $0x34] sm:$0xf]  ;;  %4962 = vpow2.f32 %v2762_v37 }
 0x1bd   : > { %v7314_v53 = vpop.eup %4956  ;;  %v4643_v28 = vor.u32 %v4716_v44, %v4640_v11  ;;  %v3754_v27 = vsub.f32 0.0, %v7303_v17  ;;  %v7816_v45 = vmax.f32 %v6814_v1, %v6406_v59  ;;  %vm2667_vm10 = vweird.f32 %v7284_v38 }
 0x1be   : > { %v7320_v62 = vpop.eup %4958  ;;  %v2399_v26 = vsel %vm2398_vm9, %v4949_v32, %v2395_v57  ;;  %v2664_v49 = vmul.f32 %v7284_v38, %v2663_v55  ;;  %4084 = vrot.lane.b32.xlu0 %v7314_v53, %s5130_s19  ;;  %vm7817_vm14 = vcmask 130048   ;;  %4964 = vpow2.f32 %v2708_v46  ;;  %vm2668_vm6 = vmor %vm2666_vm1, %vm2667_vm10 }
 0x1bf   : > { %v7325_v63 = vmax.f32 %v7816_v45, %v2690_v19  ;;  %v2404_v29 = vsel %vm7271_vm11, %v2403_v34, %v2399_v26  ;;  %4683 = vmatmul.msk.bf16.gmra.mxu2 %vm7817_vm14, %v4643_v28  ;;  %v3762_v37 = vmul.f32 1.442695, %v3754_v27  ;;  %v2710_v33 = vmul.f32 1.442695, %v2701_v18  ;;  %v7339_v61 = vpop.eup %4960  ;;  %v7375_v18 = vpop.f32.mrf.mxu1 }
 0x1c0   : > { %v2405_v15 = vmul.f32 %v2404_v29, %v7114_v7  ;;  %4966 = vpow2.f32 %v2764_v30  ;;  %v7343_v41 = vmul.f32 %v6811_v39, %v6427_v47  ;;  %v2740_v34 = vmul.f32 1.442695, %v2728_v25  ;;  %4006 = vrot.lane.b32.xlu2 %v7320_v62, %s5128_s30 }
 0x1c1   : > { %v2730_v12 = vsub.f32 %v6406_v59, %v7325_v63  ;;  %v2754_v32 = vsub.f32 %v6616_v2, %v7325_v63  ;;  %v2665_v60 = vadd.f32 %v7284_v38, %v2664_v49  ;;  %4968 = vpow2.f32 %v3762_v37  ;;  %4086 = vrot.lane.b32.xlu1 %v7339_v61, %s5130_s19  ;;  %v7418_v49 = vpop.f32.mrf.mxu2 }
 0x1c2   : > { %v7350_v59 = vmul.f32 %v6856_v5, %v6518_v31  ;;  %v2786_v2 = vmul.f32 1.442695, %v2775_v21  ;;  %v2689_v7 = vmax.f32 %v6600_v4, %v7236_v43  ;;  %v2681_v47 = vmax.f32 %v6647_v14, %v2405_v15  ;;  %v7364_v39 = vpop.eup %4962 }
 0x1c3   : > { %v2669_v31 = vsel %vm2668_vm6, %v7284_v38, %v2665_v60  ;;  %vm2671_vm15 = vcmp.eq.f32.partialorder %v2670_v54, 8.507059e+37  ;;  %4970 = vpow2.f32 %v2710_v33  ;;  %v2704_v5 = vsub.f32 %v6606_v58, %v7238_v52 }
 0x1c4   : > { %v2776_v48 = vsub.f32 %v7176_v9, %v7238_v52  ;;  %v7373_v21 = vmax.f32 %v2681_v47, %v2689_v7  ;;  %v2674_v25 = vsel %vm2671_vm15, %v2673_v50, %v2669_v31  ;;  %v2703_v51 = vsub.f32 %v6568_v3, %v7181_v16  ;;  %v7379_v11 = vpop.eup %4964 }
 0x1c5   : > { %4972 = vpow2.f32 %v2740_v34  ;;  %v7382_v13 = vmul.f32 %v2674_v25, %v7124_v0  ;;  %v2716_v54 = vmul.f32 1.442695, %v2704_v5  ;;  %v2712_v38 = vmul.f32 1.442695, %v2702_v6 }
 0x1c6   : > { %v4967_v58 = vpop.eup %4966  ;;  %v2778_v9 = vsub.f32 %v7296_v42, %v7325_v63  ;;  %v2729_v52 = vsub.f32 %v2405_v15, %v7373_v21  ;;  %v2753_v8 = vsub.f32 %v6600_v4, %v7373_v21  ;;  %4008 = vrot.lane.b32.xlu0 %v7364_v39, %s5128_s30  ;;  %v2683_v16 = vmax.f32 %v7350_v59, %v6577_v40 }
 0x1c7   : > { %v4969_v3 = vpop.eup %4968  ;;  %v2691_v0 = vmax.f32 %v7343_v41, %v7382_v13  ;;  %4974 = vpow2.f32 %v2786_v2  ;;  %v2796_v46 = vadd.f32 %v7379_v11, %v7034_v10  ;;  %v2788_v42 = vmul.f32 1.442695, %v2776_v48  ;;  %v3710_v29 = vpop.f32.mrf.mxu1 }
 0x1c8   : > { %v2744_v6 = vmul.f32 1.442695, %v2730_v12  ;;  %v2742_v30 = vmul.f32 1.442695, %v2729_v52  ;;  %4976 = vpow2.f32 %v2716_v54  ;;  %3928 = vrot.lane.b32.xlu2 %v7310_v35, %s5127_s28  ;;  %v7403_v57 = vadd.f32 1.0, %v4969_v3 }
 0x1c9   : > { %v7397_v19 = vpop.eup %4970  ;;  %v7399_v4 = vmax.f32 %v2683_v16, %v2691_v0  ;;  %v2804_v55 = vadd.f32 %v7173_v56, %v2796_v46  ;;  %4978 = vpow2.f32 %v2712_v38  ;;  %v2792_v44 = vmul.f32 1.442695, %v2778_v9  ;;  %4010 = vrot.lane.b32.xlu1 %v4967_v58, %s5128_s30 }
 0x1ca   : > { %4980 = vpow2.f32 %v2742_v30  ;;  %v2797_v10 = vadd.f32 %v7397_v19, %v7145_v22  ;;  %v2705_v50 = vsub.f32 %v6647_v14, %v7373_v21  ;;  %v2777_v27 = vsub.f32 %v7236_v43, %v7373_v21 }
 0x1cb   : > { %v4973_v28 = vpop.eup %4972  ;;  %v2731_v45 = vsub.f32 %v6577_v40, %v7399_v4  ;;  %v2755_v56 = vsub.f32 %v7343_v41, %v7399_v4  ;;  %4982 = vrcp.f32 %v7403_v57  ;;  %v2768_v26 = vmul.f32 1.442695, %v2754_v32 }
 0x1cc   : > { %4984 = vpow2.f32 %v2788_v42  ;;  %v2790_v40 = vmul.f32 1.442695, %v2777_v27  ;;  %v7428_v37 = vadd.f32 %v7278_v24, %v2804_v55  ;;  %v2805_v12 = vadd.f32 %v7225_v23, %v2797_v10 }
 0x1cd   : > { %v7420_v22 = vpop.eup %4974  ;;  %4986 = vpow2.f32 %v2792_v44  ;;  %v2770_v41 = vmul.f32 1.442695, %v2755_v56  ;;  %v3711_v34 = vadd.f32 %v7257_v20, %v3710_v29  ;;  %v2714_v60 = vmul.f32 1.442695, %v2703_v51 }
 0x1ce   : > { %v7422_v14 = vpop.eup %4976  ;;  %3930 = vrot.lane.b32.xlu0 %v4973_v28, %s5127_s28  ;;  %4988 = vpow2.f32 %v2744_v6  ;;  %v2766_v24 = vmul.f32 1.442695, %v2753_v8  ;;  %v2746_v7 = vmul.f32 1.442695, %v2731_v45  ;;  %v7443_v23 = vadd.f32 %v7314_v53, %v2805_v12 }
 0x1cf   : > { %v7425_v43 = vpop.eup %4978  ;;  %4990 = vpow2.f32 %v2768_v26  ;;  %v2800_v2 = vadd.f32 %v7422_v14, %v4973_v28  ;;  %v2707_v48 = vsub.f32 %v7350_v59, %v7399_v4  ;;  %v2779_v25 = vsub.f32 %v7382_v13, %v7399_v4  ;;  %v3712_v13 = vpop.f32.mrf.mxu1 }
 0x1d0   : > { %v7430_v33 = vpop.eup %4980  ;;  %v2798_v32 = vadd.f32 %v7425_v43, %v7244_v36  ;;  %4088 = vrot.lane.b32.xlu2 %v7420_v22, %s5130_s19  ;;  %4992 = vpow2.f32 %v2790_v40  ;;  %v2718_v38 = vmul.f32 1.442695, %v2705_v50  ;;  %v2706_v53 = vsub.f32 %v6814_v1, %v7325_v63 }
 0x1d1   : > { %v4983_v15 = vpop.eup %4982  ;;  %3932 = vrot.lane.b32.xlu1 %v7430_v33, %s5127_s28  ;;  %v2808_v5 = vadd.f32 %v4967_v58, %v2800_v2  ;;  %v3739_v54 = vpop.f32.mrf.mxu2  ;;  %v3797_v52 = vand.u32 2147483648, %v7403_v57  ;;  %4994 = vpow2.f32 %v2770_v41  ;;  %v3795_v1 = vand.u32 2147483647, %v7403_v57 }
 0x1d2   : > { %v3787_v47 = vmul.f32 %v4983_v15, %v7403_v57  ;;  %v4985_v36 = vpop.eup %4984  ;;  %v2806_v31 = vadd.f32 %v7320_v62, %v2798_v32  ;;  %v7455_v62 = vadd.f32 %v3739_v54, %v3711_v34  ;;  %vm3792_vm8 = vweird.f32 %v4983_v15 }
 0x1d3   : > { %v7448_v21 = vpop.eup %4986  ;;  %4996 = vpow2.f32 %v2714_v60  ;;  %v7461_v3 = vadd.f32 %v4985_v36, %v2808_v5  ;;  %v2722_v16 = vmul.f32 1.442695, %v2707_v48  ;;  %vm3791_vm13 = vweird.f32 %v7403_v57 }
 0x1d4   : > { %v3788_v51 = vsub.f32 1.0, %v3787_v47  ;;  %v4989_v9 = vpop.eup %4988  ;;  %v7458_v58 = vadd.f32 %v7339_v61, %v2806_v31  ;;  %4998 = vpow2.f32 %v2746_v7  ;;  %v3756_v63 = vsub.f32 0.0, %v7455_v62  ;;  %vm3793_vm0 = vmor %vm3791_vm13, %vm3792_vm8 }
 0x1d5   : > { %v4991_v59 = vpop.eup %4990  ;;  %5000 = vpow2.f32 %v2718_v38  ;;  %v2720_v61 = vmul.f32 1.442695, %v2706_v53  ;;  %v3713_v6 = vadd.f32 %v7257_v20, %v3712_v13  ;;  %v3798_v4 = vor.u32 1.1754944e-38, %v3797_v52 }
 0x1d6   : > { %v3789_v8 = vmul.f32 %v4983_v15, %v3788_v51  ;;  %4090 = vrot.lane.b32.xlu0 %v4985_v36, %s5130_s19  ;;  %v4993_v46 = vpop.eup %4992  ;;  %5002 = vpow2.f32 %v2766_v24  ;;  %v3766_v42 = vmul.f32 1.442695, %v3756_v63  ;;  %vm3796_vm4 = vcmp.eq.f32.partialorder %v3795_v1, 8.507059e+37 }
 0x1d7   : > { %5004 = vpow2.f32 %v2722_v16  ;;  %v4995_v55 = vpop.eup %4994  ;;  %v2794_v57 = vmul.f32 1.442695, %v2779_v25  ;;  %v3708_v48 = vadd.f32 %v7257_v20, %v7375_v18 }
 0x1d8   : > { %v3790_v0 = vadd.f32 %v4983_v15, %v3789_v8  ;;  %3934 = vrot.lane.b32.xlu2 %v4989_v9, %s5127_s28  ;;  %5006 = vpow2.f32 %v3766_v42 }
 0x1d9   : > { %4092 = vrot.lane.b32.xlu1 %v4993_v46, %s5130_s19  ;;  %v7469_v44 = vpop.eup %4996  ;;  %v3741_v50 = vpop.f32.mrf.mxu2  ;;  %5008 = vpow2.f32 %v2720_v61  ;;  %v7513_v25 = vadd.f32 %v7418_v49, %v3708_v48 }
 0x1da   : > { %v3794_v30 = vsel %vm3793_vm0, %v4983_v15, %v3790_v0  ;;  %v4999_v28 = vpop.eup %4998  ;;  %v7471_v27 = vadd.f32 %v3741_v50, %v3713_v6  ;;  %v2799_v45 = vadd.f32 %v7469_v44, %v7310_v35  ;;  %5010 = vpow2.f32 %v2794_v57 }
 0x1db   : > { %v3799_v10 = vsel %vm3796_vm4, %v3798_v4, %v3794_v30  ;;  %v7475_v56 = vpop.eup %5000  ;;  %v3755_v53 = vsub.f32 0.0, %v7513_v25 }
 0x1dc   : > { %v5003_v26 = vpop.eup %5002  ;;  %v7479_v29 = vmul.f32 %v3799_v10, %v7303_v17  ;;  %v3757_v40 = vsub.f32 0.0, %v7471_v27  ;;  %v2807_v12 = vadd.f32 %v7364_v39, %v2799_v45  ;;  %v2801_v32 = vadd.f32 %v7475_v56, %v7430_v33 }
 0x1dd   : > { %v7485_v15 = vpop.eup %5004  ;;  %v3764_v18 = vmul.f32 1.442695, %v3755_v53 }
 0x1de   : > { %4014 = vrot.lane.b32.xlu0 %v4991_v59, %s5128_s30  ;;  %v5007_v41 = vpop.eup %5006  ;;  %v3768_v35 = vmul.f32 1.442695, %v3757_v40  ;;  %v7490_v34 = vadd.f32 %v7420_v22, %v2807_v12  ;;  %v2809_v17 = vadd.f32 %v5003_v26, %v2801_v32  ;;  %v2803_v60 = vadd.f32 %v7485_v15, %v4999_v28 }
 0x1df   : > { %v7493_v2 = vpop.eup %5008  ;;  %v7498_v39 = vmul.f32 %v7379_v11, %v7479_v29  ;;  %v3780_v7 = vadd.f32 1.0, %v5007_v41 }
 0x1e0   : > { %4094 = vrot.lane.b32.xlu2 %v7448_v21, %s5130_s19  ;;  %5012 = vpow2.f32 %v3768_v35  ;;  %v7500_v33 = vadd.f32 %v4993_v46, %v2809_v17  ;;  %v2802_v24 = vadd.f32 %v7493_v2, %v4989_v9  ;;  %v2811_v22 = vadd.f32 %v4995_v55, %v2803_v60  ;;  %v5011_v36 = vpop.eup %5010 }
 0x1e1   : > { %4016 = vrot.lane.b32.xlu1 %v4995_v55, %s5128_s30  ;;  %5014 = vrcp.f32 %v3780_v7  ;;  %vm3821_vm12 = vweird.f32 %v3780_v7  ;;  %v3827_v16 = vand.u32 2147483648, %v3780_v7  ;;  %v3825_v0 = vand.u32 2147483647, %v3780_v7 }
 0x1e2   : > { %v2810_v47 = vadd.f32 %v4991_v59, %v2802_v24  ;;  %v7507_v5 = vadd.f32 %v5011_v36, %v2811_v22 }
 0x1e3   : > { %v3828_v6 = vor.u32 1.1754944e-38, %v3827_v16  ;;  %vm3826_vm2 = vcmp.eq.f32.partialorder %v3825_v0, 8.507059e+37 }
 0x1e4   : > { %v7505_v31 = vadd.f32 %v7448_v21, %v2810_v47 }
 0x1e6   : > { %3936 = vrot.lane.b32.xlu0 %v4999_v28, %s5127_s28  ;;  %v5013_v11 = vpop.eup %5012  ;;  %s4692_s28 = sshll.u32 %s7837_s15, 6 }
 0x1e7   : > { %v3781_v51 = vadd.f32 1.0, %v5013_v11  ;;  %v5015_v54 = vpop.eup %5014 }
 0x1e8   : > { %4012 = vrot.lane.b32.xlu2 %v5003_v26, %s5128_s30  ;;  %v3817_v9 = vmul.f32 %v5015_v54, %v3780_v7  ;;  %vm3822_vm3 = vweird.f32 %v5015_v54 }
 0x1e9   : > { %5016 = vrcp.f32 %v3781_v51  ;;  %vm3823_vm7 = vmor %vm3821_vm12, %vm3822_vm3  ;;  %v3842_v55 = vand.u32 2147483648, %v3781_v51  ;;  %vm3836_vm1 = vweird.f32 %v3781_v51  ;;  %v3840_v10 = vand.u32 2147483647, %v3781_v51 }
 0x1ea   : > { %v3818_v52 = vsub.f32 1.0, %v3817_v9  ;;  %5018 = vpow2.f32 %v3764_v18 }
 0x1eb   : > { %v3843_v28 = vor.u32 1.1754944e-38, %v3842_v55  ;;  %vm3841_vm9 = vcmp.eq.f32.partialorder %v3840_v10, 8.507059e+37 }
 0x1ec   : > { %v3819_v8 = vmul.f32 %v5015_v54, %v3818_v52 }
 0x1ed   : > { %v3923_v38 = vpop.permute.xlu2 %3922 }
 0x1ee   : > { %4096 = vrot.lane.b32.xlu0 %v5011_v36, %s5130_s19  ;;  %v3946_v21 = vmul.f32 %v3923_v38, %v7479_v29  ;;  %v3820_v13 = vadd.f32 %v5015_v54, %v3819_v8 }
 0x1ef   : > { %v5017_v59 = vpop.eup %5016 }
 0x1f0   : > { %3962 = vrot.lane.b32.xlu1 %v3946_v21, %s5132_s24  ;;  %v3832_v49 = vmul.f32 %v5017_v59, %v3781_v51  ;;  %v5019_v63 = vpop.eup %5018  ;;  %v3824_v46 = vsel %vm3823_vm7, %v5015_v54, %v3820_v13  ;;  %vm3837_vm11 = vweird.f32 %v5017_v59 }
 0x1f1   : > { %v3779_v61 = vadd.f32 1.0, %v5019_v63  ;;  %v3829_v30 = vsel %vm3826_vm2, %v3828_v6, %v3824_v46  ;;  %vm3838_vm5 = vmor %vm3836_vm1, %vm3837_vm11 }
 0x1f2   : > { %v3833_v1 = vsub.f32 1.0, %v3832_v49  ;;  %v7520_v57 = vmul.f32 %v3829_v30, %v7455_v62 }
 0x1f3   : > { %5020 = vrcp.f32 %v3779_v61  ;;  %v3812_v54 = vand.u32 2147483648, %v3779_v61  ;;  %vm3806_vm14 = vweird.f32 %v3779_v61  ;;  %v3810_v21 = vand.u32 2147483647, %v3779_v61 }
 0x1f4   : > { %v3834_v42 = vmul.f32 %v5017_v59, %v3833_v1  ;;  %v7524_v40 = vmul.f32 %v7425_v43, %v7520_v57 }
 0x1f5   : > { %v3813_v8 = vor.u32 1.1754944e-38, %v3812_v54  ;;  %vm3811_vm15 = vcmp.eq.f32.partialorder %v3810_v21, 8.507059e+37 }
 0x1f6   : > { %v3835_v4 = vadd.f32 %v5017_v59, %v3834_v42 }
 0x1f8   : > { %v3839_v50 = vsel %vm3838_vm5, %v5017_v59, %v3835_v4 }
 0x1f9   : > { %v3715_v45 = vpop.f32.mrf.mxu1  ;;  %v5021_v26 = vpop.eup %5020  ;;  %v3844_v12 = vsel %vm3841_vm9, %v3843_v28, %v3839_v50 }
 0x1fa   : > { %v3802_v32 = vmul.f32 %v5021_v26, %v3779_v61  ;;  %v7527_v41 = vmul.f32 %v3844_v12, %v7471_v27  ;;  %v3716_v62 = vadd.f32 %v7257_v20, %v3715_v45  ;;  %vm3807_vm10 = vweird.f32 %v5021_v26 }
 0x1fb   : > { %vm3808_vm6 = vmor %vm3806_vm14, %vm3807_vm10 }
 0x1fc   : > { %v3803_v35 = vsub.f32 1.0, %v3802_v32  ;;  %v7534_v7 = vmul.f32 %v7469_v44, %v7527_v41 }
 0x1fe   : > { %v3804_v36 = vmul.f32 %v5021_v26, %v3803_v35 }
 0x200   : > { %v3805_v11 = vadd.f32 %v5021_v26, %v3804_v36 }
 0x201   : > { %v3717_v43 = vpop.f32.mrf.mxu1 }
 0x202   : > { %v3718_v48 = vadd.f32 %v7257_v20, %v3717_v43  ;;  %v3809_v18 = vsel %vm3808_vm6, %v5021_v26, %v3805_v11 }
 0x203   : > { %v3814_v1 = vsel %vm3811_vm15, %v3813_v8, %v3809_v18 }
 0x204   : > { %v7546_v16 = vmul.f32 %v3814_v1, %v7513_v25 }
 0x212   : > { %v3744_v17 = vpop.f32.mrf.mxu2  ;;  %v4083_v24 = vpop.permute.xlu2 %4082 }
 0x213   : > { %v7530_v60 = vadd.f32 %v3744_v17, %v3716_v62  ;;  %v4106_v47 = vmul.f32 %v4083_v24, %v7479_v29 }
 0x215   : > { %v3758_v22 = vsub.f32 0.0, %v7530_v60  ;;  %4122 = vrot.lane.b32.xlu0 %v4106_v47, %s5131_s22 }
 0x217   : > { %v3770_v27 = vmul.f32 1.442695, %v3758_v22 }
 0x219   : > { %5022 = vpow2.f32 %v3770_v27 }
 0x21a   : > { %v3746_v51 = vpop.f32.mrf.mxu2  ;;  %v4007_v44 = vpop.permute.xlu2 %4006 }
 0x21b   : > { %v7540_v38 = vadd.f32 %v3746_v51, %v3718_v48  ;;  %v4003_v9 = vpop.permute.xlu0 %4002  ;;  %v4028_v11 = vmul.f32 %v4007_v44, %v7520_v57 }
 0x21c   : > { %v4026_v52 = vmul.f32 %v4003_v9, %v7479_v29 }
 0x21d   : > { %v3759_v53 = vsub.f32 0.0, %v7540_v38 }
 0x21e   : > { %4042 = vrot.lane.b32.xlu1 %v4026_v52, %s5133_s27 }
 0x21f   : > { %v5023_v59 = vpop.eup %5022  ;;  %v3772_v49 = vmul.f32 1.442695, %v3759_v53 }
 0x220   : > { %v3782_v13 = vadd.f32 1.0, %v5023_v59 }
 0x221   : > { %5024 = vpow2.f32 %v3772_v49 }
 0x222   : > { %5026 = vrcp.f32 %v3782_v13  ;;  %v3929_v63 = vpop.permute.xlu2 %3928  ;;  %v3857_v55 = vand.u32 2147483648, %v3782_v13  ;;  %v3855_v45 = vand.u32 2147483647, %v3782_v13  ;;  %vm3851_vm13 = vweird.f32 %v3782_v13 }
 0x223   : > { %v4005_v0 = vpop.permute.xlu1 %4004  ;;  %v3925_v61 = vpop.permute.xlu0 %3924  ;;  %v3949_v59 = vmul.f32 %v3929_v63, %v7527_v41 }
 0x224   : > { %v3947_v46 = vmul.f32 %v3925_v61, %v7546_v16  ;;  %v4027_v26 = vmul.f32 %v4005_v0, %v7546_v16  ;;  %v3858_v62 = vor.u32 1.1754944e-38, %v3857_v55  ;;  %vm3856_vm4 = vcmp.eq.f32.partialorder %v3855_v45, 8.507059e+37 }
 0x226   : > { %3964 = vrot.lane.b32.xlu2 %v3947_v46, %s5132_s24 }
 0x227   : > { %v5025_v42 = vpop.eup %5024 }
 0x228   : > { %v5027_v29 = vpop.eup %5026  ;;  %v3783_v6 = vadd.f32 1.0, %v5025_v42 }
 0x229   : > { %v3847_v30 = vmul.f32 %v5027_v29, %v3782_v13  ;;  %vm3852_vm8 = vweird.f32 %v5027_v29 }
 0x22a   : > { %5028 = vrcp.f32 %v3783_v6  ;;  %v4089_v10 = vpop.permute.xlu2 %4088  ;;  %vm3853_vm0 = vmor %vm3851_vm13, %vm3852_vm8  ;;  %v3870_v27 = vand.u32 2147483647, %v3783_v6  ;;  %v3872_v48 = vand.u32 2147483648, %v3783_v6  ;;  %vm3866_vm3 = vweird.f32 %v3783_v6 }
 0x22b   : > { %v3848_v4 = vsub.f32 1.0, %v3847_v30  ;;  %v3927_v50 = vpop.permute.xlu1 %3926  ;;  %v4109_v13 = vmul.f32 %v4089_v10, %v7527_v41  ;;  %vm7818_vm8 = vcmask 130048  }
 0x22c   : > { %v3948_v25 = vmul.f32 %v3927_v50, %v7520_v57  ;;  %vm3871_vm2 = vcmp.eq.f32.partialorder %v3870_v27, 8.507059e+37  ;;  %vm7819_vm13 = vmmov %vm7818_vm8 }
 0x22d   : > { %v3849_v28 = vmul.f32 %v5027_v29, %v3848_v4 }
 0x22e   : > { %3966 = vrot.lane.b32.xlu0 %v3948_v25, %s5132_s24  ;;  %4044 = vrot.lane.b32.xlu2 %v4027_v26, %s5133_s27 }
 0x22f   : > { %v3850_v12 = vadd.f32 %v5027_v29, %v3849_v28 }
 0x230   : > { %v5029_v32 = vpop.eup %5028  ;;  %v4085_v35 = vpop.permute.xlu0 %4084 }
 0x231   : > { %v3854_v17 = vsel %vm3853_vm0, %v5027_v29, %v3850_v12  ;;  %v3862_v24 = vmul.f32 %v5029_v32, %v3783_v6  ;;  %v4107_v47 = vmul.f32 %v4085_v35, %v7546_v16  ;;  %vm3867_vm12 = vweird.f32 %v5029_v32  ;;  %vm7820_vm0 = vmmov %vm7818_vm8 }
 0x232   : > { %v3859_v43 = vsel %vm3856_vm4, %v3858_v62, %v3854_v17  ;;  %v7562_v9 = vpop.permute.xlu2 %3934  ;;  %vm3868_vm7 = vmor %vm3866_vm3, %vm3867_vm12 }
 0x233   : > { %v3860_v22 = vmul.f32 %v3859_v43, %v7530_v60  ;;  %v3863_v36 = vsub.f32 1.0, %v3862_v24  ;;  %4124 = vrot.lane.b32.xlu1 %v4107_v47, %s5131_s22  ;;  %v4087_v51 = vpop.permute.xlu1 %4086  ;;  %v3873_v60 = vor.u32 1.1754944e-38, %v3872_v48  ;;  %vm7821_vm4 = vmmov %vm7820_vm0 }
 0x234   : > { %v4108_v21 = vmul.f32 %v4087_v51, %v7520_v57  ;;  %v3720_v57 = vpop.f32.mrf.mxu1  ;;  %vm7822_vm12 = vmmov %vm7820_vm0 }
 0x235   : > { %v3864_v54 = vmul.f32 %v5029_v32, %v3863_v36  ;;  %v7560_v53 = vmul.f32 %v7422_v14, %v3860_v22  ;;  %v3721_v0 = vadd.f32 %v7257_v20, %v3720_v57  ;;  %vm7823_vm3 = vmmov %vm7820_vm0 }
 0x236   : > { %4046 = vrot.lane.b32.xlu0 %v4028_v11, %s5133_s27  ;;  %4126 = vrot.lane.b32.xlu2 %v4108_v21, %s5131_s22 }
 0x237   : > { %v3865_v18 = vadd.f32 %v5029_v32, %v3864_v54 }
 0x238   : > { %v4009_v52 = vpop.permute.xlu0 %4008 }
 0x239   : > { %v3869_v44 = vsel %vm3868_vm7, %v5029_v32, %v3865_v18  ;;  %v4029_v46 = vmul.f32 %v4009_v52, %v7527_v41  ;;  %vm7824_vm7 = vmmov %vm7820_vm0 }
 0x23a   : > { %v3874_v8 = vsel %vm3871_vm2, %v3873_v60, %v3869_v44  ;;  %v4095_v61 = vpop.permute.xlu2 %4094  ;;  %vm7825_vm2 = vmmov %vm7820_vm0 }
 0x23b   : > { %v7568_v14 = vmul.f32 %v3874_v8, %v7540_v38  ;;  %3968 = vrot.lane.b32.xlu1 %v3949_v59, %s5132_s24  ;;  %v4011_v49 = vpop.permute.xlu1 %4010 }
 0x23c   : > { %v3722_v6 = vpop.f32.mrf.mxu1  ;;  %v4030_v41 = vmul.f32 %v4011_v49, %v3860_v22 }
 0x23d   : > { %v7574_v1 = vmul.f32 %v7475_v56, %v7568_v14  ;;  %v3723_v10 = vadd.f32 %v7257_v20, %v3722_v6 }
 0x23e   : > { %4128 = vrot.lane.b32.xlu0 %v4109_v13, %s5131_s22 }
 0x240   : > { %v3931_v63 = vpop.permute.xlu0 %3930 }
 0x241   : > { %v3950_v42 = vmul.f32 %v3931_v63, %v3860_v22 }
 0x242   : > { %v3749_v38 = vpop.f32.mrf.mxu2  ;;  %v4013_v25 = vpop.permute.xlu2 %4012 }
 0x243   : > { %v3750_v29 = vadd.f32 %v3749_v38, %v3721_v0  ;;  %3970 = vrot.lane.b32.xlu2 %v3950_v42, %s5132_s24  ;;  %4048 = vrot.lane.b32.xlu1 %v4029_v46, %s5133_s27  ;;  %v3933_v30 = vpop.permute.xlu1 %3932  ;;  %v4031_v32 = vmul.f32 %v4013_v25, %v7568_v14 }
 0x244   : > { %v3951_v56 = vmul.f32 %v3933_v30, %v7568_v14 }
 0x245   : > { %v3760_v4 = vsub.f32 0.0, %v3750_v29 }
 0x246   : > { %3972 = vrot.lane.b32.xlu0 %v3951_v56, %s5132_s24 }
 0x247   : > { %v3774_v55 = vmul.f32 1.442695, %v3760_v4 }
 0x248   : > { %v4091_v50 = vpop.permute.xlu0 %4090 }
 0x249   : > { %5030 = vpow2.f32 %v3774_v55  ;;  %v4110_v28 = vmul.f32 %v4091_v50, %v3860_v22 }
 0x24a   : > { %v3751_v45 = vpop.f32.mrf.mxu2 }
 0x24b   : > { %v3752_v26 = vadd.f32 %v3751_v45, %v3723_v10  ;;  %4050 = vrot.lane.b32.xlu2 %v4030_v41, %s5133_s27  ;;  %4130 = vrot.lane.b32.xlu1 %v4110_v28, %s5131_s22  ;;  %v4093_v6 = vpop.permute.xlu1 %4092 }
 0x24c   : > { %v4111_v41 = vmul.f32 %v4093_v6, %v7568_v14 }
 0x24d   : > { %v3761_v12 = vsub.f32 0.0, %v3752_v26 }
 0x24e   : > { %4052 = vrot.lane.b32.xlu0 %v4031_v32, %s5133_s27 }
 0x24f   : > { %v5031_v62 = vpop.eup %5030  ;;  %v3776_v35 = vmul.f32 1.442695, %v3761_v12 }
 0x250   : > { %v3784_v20 = vadd.f32 1.0, %v5031_v62  ;;  %v4015_v21 = vpop.permute.xlu0 %4014 }
 0x251   : > { %5032 = vpow2.f32 %v3776_v35 }
 0x252   : > { %5034 = vrcp.f32 %v3784_v20  ;;  %v3887_v36 = vand.u32 2147483648, %v3784_v20  ;;  %v3885_v48 = vand.u32 2147483647, %v3784_v20  ;;  %vm3881_vm1 = vweird.f32 %v3784_v20 }
 0x254   : > { %v3888_v54 = vor.u32 1.1754944e-38, %v3887_v36  ;;  %vm3886_vm9 = vcmp.eq.f32.partialorder %v3885_v48, 8.507059e+37 }
 0x257   : > { %v5033_v17 = vpop.eup %5032 }
 0x258   : > { %v5035_v24 = vpop.eup %5034  ;;  %v3785_v47 = vadd.f32 1.0, %v5033_v17 }
 0x259   : > { %v3877_v43 = vmul.f32 %v5035_v24, %v3784_v20  ;;  %vm3882_vm11 = vweird.f32 %v5035_v24 }
 0x25a   : > { %5036 = vrcp.f32 %v3785_v47  ;;  %vm3883_vm5 = vmor %vm3881_vm1, %vm3882_vm11  ;;  %v3900_v8 = vand.u32 2147483647, %v3785_v47  ;;  %v3902_v57 = vand.u32 2147483648, %v3785_v47  ;;  %vm3896_vm14 = vweird.f32 %v3785_v47 }
 0x25b   : > { %v3878_v22 = vsub.f32 1.0, %v3877_v43  ;;  %5038 = vrcp.f32 %v7428_v37 }
 0x25c   : > { %v3903_v42 = vor.u32 1.1754944e-38, %v3902_v57  ;;  %vm3901_vm15 = vcmp.eq.f32.partialorder %v3900_v8, 8.507059e+37  ;;  %5040 = vrcp.f32 %v7443_v23 }
 0x25d   : > { %v3879_v27 = vmul.f32 %v5035_v24, %v3878_v22  ;;  %5042 = vrcp.f32 %v7458_v58 }
 0x25e   : > { %5044 = vrcp.f32 %v7490_v34 }
 0x25f   : > { %v3880_v11 = vadd.f32 %v5035_v24, %v3879_v27  ;;  %5046 = vrcp.f32 %v7461_v3 }
 0x260   : > { %v5037_v51 = vpop.eup %5036  ;;  %5048 = vrcp.f32 %v7500_v33 }
 0x261   : > { %v3884_v18 = vsel %vm3883_vm5, %v5035_v24, %v3880_v11  ;;  %v3892_v60 = vmul.f32 %v5037_v51, %v3785_v47  ;;  %vm3897_vm10 = vweird.f32 %v5037_v51  ;;  %v5039_v62 = vpop.eup %5038  ;;  %5050 = vrcp.f32 %v7505_v31 }
 0x262   : > { %v3889_v52 = vsel %vm3886_vm9, %v3888_v54, %v3884_v18  ;;  %vm3898_vm6 = vmor %vm3896_vm14, %vm3897_vm10  ;;  %v5041_v22 = vpop.eup %5040  ;;  %5052 = vrcp.f32 %v7507_v5 }
 0x263   : > { %v3890_v44 = vmul.f32 %v3889_v52, %v3750_v29  ;;  %v3893_v59 = vsub.f32 1.0, %v3892_v60 }
 0x265   : > { %v4112_v49 = vmul.f32 %v4095_v61, %v3890_v44  ;;  %v3894_v13 = vmul.f32 %v5037_v51, %v3893_v59  ;;  %v3952_v0 = vmul.f32 %v7562_v9, %v3890_v44  ;;  %v7590_v63 = vmul.f32 %v7493_v2, %v3890_v44  ;;  %v3937_v61 = vpop.permute.xlu0 %3936  ;;  %v4017_v2 = vpop.permute.xlu1 %4016 }
 0x266   : > { %v4032_v4 = vmul.f32 %v4015_v21, %v3890_v44 }
 0x267   : > { %v3895_v46 = vadd.f32 %v5037_v51, %v3894_v13  ;;  %4134 = vrot.lane.b32.xlu0 %v4112_v49, %s5131_s22  ;;  %3974 = vrot.lane.b32.xlu1 %v3952_v0, %s5132_s24 }
 0x269   : > { %v3899_v38 = vsel %vm3898_vm6, %v5037_v51, %v3895_v46 }
 0x26a   : > { %v3904_v29 = vsel %vm3901_vm15, %v3903_v42, %v3899_v38 }
 0x26b   : > { %v3905_v30 = vmul.f32 %v3904_v29, %v3752_v26 }
 0x26d   : > { %v3953_v56 = vmul.f32 %v3937_v61, %v3905_v30  ;;  %v7595_v9 = vmul.f32 %v7485_v15, %v3905_v30  ;;  %v4097_v55 = vpop.permute.xlu0 %4096  ;;  %v4033_v10 = vmul.f32 %v4017_v2, %v3905_v30  ;;  %v3963_v28 = vpop.permute.xlu1 %3962 }
 0x26e   : > { %v4113_v50 = vmul.f32 %v4097_v55, %v3905_v30  ;;  %v3986_v15 = vadd.f32 %v3963_v28, %v7498_v39  ;;  %v3907_v39 = vmul.f32 %v7397_v19, %v7546_v16  ;;  %v5043_v16 = vpop.eup %5042 }
 0x26f   : > { %3976 = vrot.lane.b32.xlu2 %v3953_v56, %s5132_s24  ;;  %4054 = vrot.lane.b32.xlu1 %v4032_v4, %s5133_s27  ;;  %s7609_s24 = scalar_lea.vmem %s7667_s10, %s4692_s28  ;;  %v5045_v52 = vpop.eup %5044 }
 0x270   : > { %v5047_v34 = vpop.eup %5046 }
 0x271   : > { %v5049_v30 = vpop.eup %5048 }
 0x277   : > { %4056 = vrot.lane.b32.xlu2 %v4033_v10, %s5133_s27  ;;  %4136 = vrot.lane.b32.xlu1 %v4113_v50, %s5131_s22  ;;  %v5051_v50 = vpop.eup %5050 }
 0x27f   : > { %4132 = vrot.lane.b32.xlu2 %v4111_v41, %s5131_s22 }
 0x280   : > { %v3965_v45 = vpop.permute.xlu2 %3964 }
 0x281   : > { %v3987_v20 = vadd.f32 %v3965_v45, %v3907_v39 }
 0x287   : > { %v4123_v12 = vpop.permute.xlu0 %4122 }
 0x288   : > { %v4045_v37 = vpop.permute.xlu2 %4044 }
 0x289   : > { %v4067_v17 = vadd.f32 %v4045_v37, %v3987_v20 }
 0x290   : > { %v4043_v25 = vpop.permute.xlu1 %4042  ;;  %v4127_v24 = vpop.permute.xlu2 %4126 }
 0x291   : > { %v4066_v26 = vadd.f32 %v4043_v25, %v3986_v15  ;;  %v5053_v25 = vpop.eup %5052 }
 0x293   : > { %v4146_v32 = vadd.f32 %v4123_v12, %v4066_v26 }
 0x295   : > { %v4154_v14 = vmul.f32 %v5039_v62, %v4146_v32 }
 0x297   : > { %4162 = vst.msk [vmem:[%s7609_s24] sm:$0xff] %vm7818_vm8, %v4154_v14 }
 0x29d   : > { %v3971_v54 = vpop.permute.xlu2 %3970 }
 0x29e   : > { %v3990_v59 = vadd.f32 %v3971_v54, %v7560_v53 }
 0x2a0   : > { %v3967_v35 = vpop.permute.xlu0 %3966 }
 0x2a1   : > { %v3988_v36 = vadd.f32 %v3967_v35, %v7524_v40 }
 0x2a5   : > { %v4125_v47 = vpop.permute.xlu1 %4124  ;;  %v4051_v44 = vpop.permute.xlu2 %4050 }
 0x2a6   : > { %v4147_v43 = vadd.f32 %v4125_v47, %v4067_v17  ;;  %v4070_v57 = vadd.f32 %v4051_v44, %v3990_v59 }
 0x2a8   : > { %v4155_v27 = vmul.f32 %v5041_v22, %v4147_v43  ;;  %v4047_v48 = vpop.permute.xlu0 %4046 }
 0x2a9   : > { %v4068_v11 = vadd.f32 %v4047_v48, %v3988_v36 }
 0x2aa   : > { %4163 = vst.msk [vmem:[%s7609_s24 + $0x8] sm:$0xff] %vm7819_vm13, %v4155_v27 }
 0x2ab   : > { %v4148_v19 = vadd.f32 %v4127_v24, %v4068_v11 }
 0x2ad   : > { %v3969_v51 = vpop.permute.xlu1 %3968  ;;  %v4156_v23 = vmul.f32 %v5043_v16, %v4148_v19 }
 0x2ae   : > { %v3989_v21 = vadd.f32 %v3969_v51, %v7534_v7 }
 0x2af   : > { %4164 = vst.msk [vmem:[%s7609_s24 + $0x10] sm:$0xff] %vm7820_vm0, %v4156_v23 }
 0x2b0   : > { %v4129_v18 = vpop.permute.xlu0 %4128 }
 0x2b5   : > { %v4049_v58 = vpop.permute.xlu1 %4048 }
 0x2b6   : > { %v4069_v40 = vadd.f32 %v4049_v58, %v3989_v21 }
 0x2b8   : > { %v4149_v60 = vadd.f32 %v4129_v18, %v4069_v40  ;;  %v3973_v46 = vpop.permute.xlu0 %3972 }
 0x2b9   : > { %v3991_v3 = vadd.f32 %v3973_v46, %v7574_v1 }
 0x2ba   : > { %v4157_v8 = vmul.f32 %v5045_v52, %v4149_v60 }
 0x2bc   : > { %4165 = vst.msk [vmem:[%s7609_s24 + $0x18] sm:$0xff] %vm7821_vm4, %v4157_v8 }
 0x2bd   : > { %v4131_v49 = vpop.permute.xlu1 %4130 }
 0x2be   : > { %v4150_v13 = vadd.f32 %v4131_v49, %v4070_v57 }
 0x2c0   : > { %v4158_v7 = vmul.f32 %v5047_v34, %v4150_v13  ;;  %v4053_v38 = vpop.permute.xlu0 %4052 }
 0x2c1   : > { %v4071_v53 = vadd.f32 %v4053_v38, %v3991_v3 }
 0x2c2   : > { %4166 = vst.msk [vmem:[%s7609_s24 + $0x20] sm:$0xff] %vm7822_vm12, %v4158_v7 }
 0x2c9   : > { %v3977_v0 = vpop.permute.xlu2 %3976 }
 0x2ca   : > { %v3993_v1 = vadd.f32 %v3977_v0, %v7595_v9 }
 0x2d1   : > { %v4057_v42 = vpop.permute.xlu2 %4056 }
 0x2d2   : > { %v4073_v28 = vadd.f32 %v4057_v42, %v3993_v1 }
 0x2d9   : > { %v4133_v29 = vpop.permute.xlu2 %4132  ;;  %v3975_v61 = vpop.permute.xlu1 %3974 }
 0x2da   : > { %v4151_v6 = vadd.f32 %v4133_v29, %v4071_v53  ;;  %v3992_v56 = vadd.f32 %v3975_v61, %v7590_v63  ;;  %v4135_v10 = vpop.permute.xlu0 %4134 }
 0x2dc   : > { %v4159_v4 = vmul.f32 %v5049_v30, %v4151_v6 }
 0x2de   : > { %4167 = vst.msk [vmem:[%s7609_s24 + $0x28] sm:$0xff] %vm7823_vm3, %v4159_v4 }
 0x2e1   : > { %v4055_v2 = vpop.permute.xlu1 %4054 }
 0x2e2   : > { %v4072_v55 = vadd.f32 %v4055_v2, %v3992_v56 }
 0x2e4   : > { %v4152_v33 = vadd.f32 %v4135_v10, %v4072_v55 }
 0x2e6   : > { %v4160_v41 = vmul.f32 %v5051_v50, %v4152_v33 }
 0x2e8   : > { %4168 = vst.msk [vmem:[%s7609_s24 + $0x30] sm:$0xff] %vm7824_vm7, %v4160_v41 }
 0x2e9   : > { %v4137_v15 = vpop.permute.xlu1 %4136 }
 0x2ea   : > { %v4153_v45 = vadd.f32 %v4137_v15, %v4073_v28 }
 0x2ec   : > { %v4161_v31 = vmul.f32 %v5053_v25, %v4153_v45 }
 0x2ee   : > { %4169 = vst.msk [vmem:[%s7609_s24 + $0x38] sm:$0xff] %vm7825_vm2, %v4161_v31 }
 0x2ef PF: > { %s20_s17 = sadd.s32 1, %s5109_s17   ;;  %s7826_s15 = sld [smem:[#allocation7_spill]] }
 0x2f0   : > { %p17_p12 = scmp.ge.s32.totalorder %s20_s17, 4   ;;  %s7827_s22 = sld [smem:[#allocation6_spill]] }
 0x2f1   : > { %s7828_s13 = smov %s5097_s14 }
 0x2f2   :  { %19 = sbr.rel (!%p17_p12) target bundleno = 5 (0x5), region = 260 }
 0x2f5   : > { %s7829_s14 = smov %s7826_s15  ;;  %s7830_s15 = smov %s5105_s16 }
 0x2f6   : > { %s7831_s16 = smov %s7827_s22 }

</bundles_post_ra>
